<compile_context>
chip_gen: v7x
topology: tpu7x:2x2x1
jax: 0.10.0
libtpu: 0.0.40
codegen_flags: <defaults>
</compile_context>

<pallas_src>
import functools

import jax
import jax.numpy as jnp
from jax.experimental import pallas as pl
from jax.experimental.pallas import tpu as pltpu

LANE = 128


def _round_up(v, m):
    return (v + m - 1) // m * m


# ----------------------------- Pallas kernel ------------------------------ #
def _conv_mm_kernel(mode, *refs):
    """Fused im2col-matmul + bias + activation / residual kernel.

    mode == "lrelu":    out = leaky_relu(patches @ W + b, 0.2)
    mode == "residual": out = 0.2 * (patches @ W + b) + residual
    """
    if mode == "residual":
        x_ref, w_ref, b_ref, res_ref, o_ref = refs
    else:
        x_ref, w_ref, b_ref, o_ref = refs

    # bf16 x bf16 -> f32 accumulation on the MXU.
    acc = jnp.dot(x_ref[...], w_ref[...], preferred_element_type=jnp.float32)
    acc = acc + b_ref[...]
    if mode == "lrelu":
        acc = jnp.where(acc >= 0.0, acc, 0.2 * acc)
    elif mode == "residual":
        acc = acc * 0.2 + res_ref[...]
    o_ref[...] = acc.astype(o_ref.dtype)


# ------------------------------- wrappers --------------------------------- #
def _im2col_3x3(x_nhwc):
    """(N,H,W,C) -> (N*H*W, 9*C) patches, tap order (dh, dw, ci)."""
    n, h, w, c = x_nhwc.shape
    xp = jnp.pad(x_nhwc, ((0, 0), (1, 1), (1, 1), (0, 0)))
    cols = []
    for dh in range(3):
        for dw in range(3):
            cols.append(xp[:, dh:dh + h, dw:dw + w, :])
    return jnp.concatenate(cols, axis=-1).reshape(n * h * w, 9 * c)


def conv3x3_pallas(x_nhwc, w_hwio, b, mode, residual_nhwc=None, tile_m=256):
    n, h, w, cin = x_nhwc.shape
    cout = w_hwio.shape[-1]
    m = n * h * w
    k = 9 * cin
    cout_p = _round_up(cout, LANE)          # lane-dense output / MXU N dim

    # bf16 operands for the MXU (cast before im2col so the big patches array
    # is materialized in bf16, halving its HBM traffic).
    patches = _im2col_3x3(x_nhwc.astype(jnp.bfloat16))            # (M, K) bf16
    w_mat = w_hwio.reshape(k, cout).astype(jnp.bfloat16)          # HWIO flatten
    w_mat = jnp.pad(w_mat, ((0, 0), (0, cout_p - cout)))          # (K, Cp)
    b2d = jnp.pad(b.astype(jnp.float32).reshape(1, cout),
                  ((0, 0), (0, cout_p - cout)))                   # (1, Cp)

    # Row tiling: TM multiple of 8 (or the full M if it is smaller).
    tm = tile_m if m > tile_m else m
    grid = (pl.cdiv(m, tm),)

    operands = [patches, w_mat, b2d]
    in_specs = [
        pl.BlockSpec((tm, k), lambda i: (i, 0)),        # streamed row tiles
        pl.BlockSpec((k, cout_p), lambda i: (0, 0)),    # resident weights
        pl.BlockSpec((1, cout_p), lambda i: (0, 0)),    # resident bias
    ]
    if mode == "residual":
        res = residual_nhwc.reshape(m, cout).astype(jnp.float32)
        res = jnp.pad(res, ((0, 0), (0, cout_p - cout)))          # zero lanes
        operands.append(res)
        in_specs.append(pl.BlockSpec((tm, cout_p), lambda i: (i, 0)))

    out = pl.pallas_call(
        functools.partial(_conv_mm_kernel, mode),
        out_shape=jax.ShapeDtypeStruct((m, cout_p), jnp.float32),
        grid=grid,
        in_specs=in_specs,
        out_specs=pl.BlockSpec((tm, cout_p), lambda i: (i, 0)),
        compiler_params=pltpu.CompilerParams(
            dimension_semantics=("parallel",),
            vmem_limit_bytes=32 * 1024 * 1024),
    )(*operands)

    # Padded lanes carry exact zeros (zero weights/bias/residual); slice them
    # off before handing the tensor back.
    return out[:, :cout].reshape(n, h, w, cout)


# --------------------------- parameter init -------------------------------- #
def init_rdb_params(key, num_feat, num_grow_ch):
    """Matches default_init_weights: kaiming_normal_ (fan_in, gain sqrt(2)),
    scaled by 0.1, zero bias.  Weights stored as HWIO (3,3,Cin,Cout)."""
    layer_defs = [
        (num_feat, num_grow_ch),
        (num_feat + 1 * num_grow_ch, num_grow_ch),
        (num_feat + 2 * num_grow_ch, num_grow_ch),
        (num_feat + 3 * num_grow_ch, num_grow_ch),
        (num_feat + 4 * num_grow_ch, num_feat),
    ]
    params = []
    for cin, cout in layer_defs:
        key, wk = jax.random.split(key)
        fan_in = cin * 9
        std = (2.0 / fan_in) ** 0.5 * 0.1
        w = jax.random.normal(wk, (3, 3, cin, cout), dtype=jnp.float32) * std
        b = jnp.zeros((cout,), dtype=jnp.float32)
        params.append((w, b))
    return params


# ------------------------- module forward (Pallas) -------------------------- #
def residual_dense_block(x_nchw, params):
    x = jnp.transpose(x_nchw, (0, 2, 3, 1))       # NCHW -> NHWC
    (w1, b1), (w2, b2), (w3, b3), (w4, b4), (w5, b5) = params
    x1 = conv3x3_pallas(x, w1, b1, "lrelu")
    x2 = conv3x3_pallas(jnp.concatenate([x, x1], -1), w2, b2, "lrelu")
    x3 = conv3x3_pallas(jnp.concatenate([x, x1, x2], -1), w3, b3, "lrelu")
    x4 = conv3x3_pallas(jnp.concatenate([x, x1, x2, x3], -1), w4, b4, "lrelu")
    x5 = conv3x3_pallas(jnp.concatenate([x, x1, x2, x3, x4], -1), w5, b5,
                        "residual", residual_nhwc=x)
    return jnp.transpose(x5, (0, 3, 1, 2))        # NHWC -> NCHW


# ----------------------------- pure-JAX reference --------------------------- #
def _ref_conv(x_nhwc, w_hwio, b):
    y = jax.lax.conv_general_dilated(
        x_nhwc, w_hwio, window_strides=(1, 1), padding="SAME",
        dimension_numbers=("NHWC", "HWIO", "NHWC"),
        precision=jax.lax.Precision.HIGHEST)
    return y + b


def ref_residual_dense_block(x_nchw, params):
    x = jnp.transpose(x_nchw, (0, 2, 3, 1))
    lrelu = lambda v: jnp.where(v >= 0.0, v, 0.2 * v)
    (w1, b1), (w2, b2), (w3, b3), (w4, b4), (w5, b5) = params
    x1 = lrelu(_ref_conv(x, w1, b1))
    x2 = lrelu(_ref_conv(jnp.concatenate([x, x1], -1), w2, b2))
    x3 = lrelu(_ref_conv(jnp.concatenate([x, x1, x2], -1), w3, b3))
    x4 = lrelu(_ref_conv(jnp.concatenate([x, x1, x2, x3], -1), w4, b4))
    x5 = _ref_conv(jnp.concatenate([x, x1, x2, x3, x4], -1), w5, b5)
    out = x5 * 0.2 + x
    return jnp.transpose(out, (0, 3, 1, 2))


# ---------------------------------- main ------------------------------------ #
if __name__ == "__main__":
    NUM_FEAT = 32
    NUM_GROW = 16
    N, H, W = 2, 16, 16          # M = N*H*W = 512 -> grid of 2 row-tiles

    key = jax.random.PRNGKey(0)
    kx, kp = jax.random.split(key)
    x = jax.random.normal(kx, (N, NUM_FEAT, H, W), dtype=jnp.float32)  # NCHW
    params = init_rdb_params(kp, NUM_FEAT, NUM_GROW)

    out = jax.jit(residual_dense_block)(x, params)
    out = jax.block_until_ready(out)

    ref = jax.block_until_ready(ref_residual_dense_block(x, params))
    assert out.shape == x.shape and out.dtype == jnp.float32
    assert bool(jnp.allclose(out, ref, atol=1e-2, rtol=1e-2)), "mismatch vs reference"

    print("KERNEL_OK")
</pallas_src>

<mosaic_0001>
module attributes {stable_mosaic.version = 11 : i64} {
  func.func @_conv_mm_kernel(%arg0: i32, %arg1: memref<256x288xbf16, #tpu.memory_space<vmem>>, %arg2: memref<288x128xbf16, #tpu.memory_space<vmem>>, %arg3: memref<1x128xf32, #tpu.memory_space<vmem>>, %arg4: memref<256x128xf32, #tpu.memory_space<vmem>>) attributes {dimension_semantics = [#tpu.dimension_semantics<parallel>], iteration_bounds = array<i64: 2>, scalar_prefetch = 0 : i64, scratch_operands = 0 : i64, tpu.core_type = #tpu.core_type<tc>, window_params = [{transform_indices = @transform_0, window_bounds = array<i64: 256, 288>}, {pipeline_mode = #tpu.pipeline_mode<synchronous>, transform_indices = @transform_1, window_bounds = array<i64: 288, 128>}, {pipeline_mode = #tpu.pipeline_mode<synchronous>, transform_indices = @transform_2, window_bounds = array<i64: 1, 128>}, {transform_indices = @transform_3, window_bounds = array<i64: 256, 128>}]} {
    %c0 = arith.constant 0 : index
    %c0_0 = arith.constant 0 : index
    %0 = vector.load %arg1[%c0, %c0_0] : memref<256x288xbf16, #tpu.memory_space<vmem>>, vector<256x288xbf16>
    %c0_1 = arith.constant 0 : index
    %c0_2 = arith.constant 0 : index
    %1 = vector.load %arg2[%c0_1, %c0_2] : memref<288x128xbf16, #tpu.memory_space<vmem>>, vector<288x128xbf16>
    %cst = arith.constant dense<0.000000e+00> : vector<256x128xf32>
    %2 = tpu.matmul %0, %1, %cst {dimension_numbers = #tpu.dot_dimension_numbers<[1], [0], [0], [1], [0, 0, 1, 1], [], []>} : vector<256x288xbf16>, vector<288x128xbf16>, vector<256x128xf32> -> vector<256x128xf32>
    %c0_3 = arith.constant 0 : index
    %c0_4 = arith.constant 0 : index
    %3 = vector.load %arg3[%c0_3, %c0_4] : memref<1x128xf32, #tpu.memory_space<vmem>>, vector<1x128xf32>
    %4 = vector.broadcast %3 : vector<1x128xf32> to vector<256x128xf32>
    %5 = arith.addf %2, %4 : vector<256x128xf32>
    %cst_5 = arith.constant 0.000000e+00 : f32
    %6 = vector.broadcast %cst_5 : f32 to vector<256x128xf32>
    %7 = arith.cmpf oge, %5, %6 : vector<256x128xf32>
    %cst_6 = arith.constant 2.000000e-01 : f32
    %8 = vector.broadcast %cst_6 : f32 to vector<256x128xf32>
    %9 = arith.mulf %8, %5 : vector<256x128xf32>
    %10 = arith.select %7, %5, %9 : vector<256x128xi1>, vector<256x128xf32>
    %c0_7 = arith.constant 0 : index
    %c0_8 = arith.constant 0 : index
    %11 = vector.load %arg4[%c0_7, %c0_8] : memref<256x128xf32, #tpu.memory_space<vmem>>, vector<256x128xf32>
    tpu.vector_store %arg4[%c0_7, %c0_8], %10 {strides = array<i32>} : memref<256x128xf32, #tpu.memory_space<vmem>>, vector<256x128xf32>,
    return
  }
  func.func @transform_0(%arg0: i32) -> (i32, i32) {
    %c0_i32 = arith.constant 0 : i32
    %c0_i32_0 = arith.constant 0 : i32
    return %arg0, %c0_i32 : i32, i32
  }
  func.func @transform_1(%arg0: i32) -> (i32, i32) {
    %c0_i32 = arith.constant 0 : i32
    %c0_i32_0 = arith.constant 0 : i32
    %c0_i32_1 = arith.constant 0 : i32
    return %c0_i32, %c0_i32_0 : i32, i32
  }
  func.func @transform_2(%arg0: i32) -> (i32, i32) {
    %c0_i32 = arith.constant 0 : i32
    %c0_i32_0 = arith.constant 0 : i32
    %c0_i32_1 = arith.constant 0 : i32
    return %c0_i32, %c0_i32_0 : i32, i32
  }
  func.func @transform_3(%arg0: i32) -> (i32, i32) {
    %c0_i32 = arith.constant 0 : i32
    %c0_i32_0 = arith.constant 0 : i32
    return %arg0, %c0_i32 : i32, i32
  }
}

module attributes {stable_mosaic.version = 11 : i64} {
  func.func @_conv_mm_kernel(%arg0: i32, %arg1: memref<256x432xbf16, #tpu.memory_space<vmem>>, %arg2: memref<432x128xbf16, #tpu.memory_space<vmem>>, %arg3: memref<1x128xf32, #tpu.memory_space<vmem>>, %arg4: memref<256x128xf32, #tpu.memory_space<vmem>>) attributes {dimension_semantics = [#tpu.dimension_semantics<parallel>], iteration_bounds = array<i64: 2>, scalar_prefetch = 0 : i64, scratch_operands = 0 : i64, tpu.core_type = #tpu.core_type<tc>, window_params = [{transform_indices = @transform_0, window_bounds = array<i64: 256, 432>}, {pipeline_mode = #tpu.pipeline_mode<synchronous>, transform_indices = @transform_1, window_bounds = array<i64: 432, 128>}, {pipeline_mode = #tpu.pipeline_mode<synchronous>, transform_indices = @transform_2, window_bounds = array<i64: 1, 128>}, {transform_indices = @transform_3, window_bounds = array<i64: 256, 128>}]} {
    %c0 = arith.constant 0 : index
    %c0_0 = arith.constant 0 : index
    %0 = vector.load %arg1[%c0, %c0_0] : memref<256x432xbf16, #tpu.memory_space<vmem>>, vector<256x432xbf16>
    %c0_1 = arith.constant 0 : index
    %c0_2 = arith.constant 0 : index
    %1 = vector.load %arg2[%c0_1, %c0_2] : memref<432x128xbf16, #tpu.memory_space<vmem>>, vector<432x128xbf16>
    %cst = arith.constant dense<0.000000e+00> : vector<256x128xf32>
    %2 = tpu.matmul %0, %1, %cst {dimension_numbers = #tpu.dot_dimension_numbers<[1], [0], [0], [1], [0, 0, 1, 1], [], []>} : vector<256x432xbf16>, vector<432x128xbf16>, vector<256x128xf32> -> vector<256x128xf32>
    %c0_3 = arith.constant 0 : index
    %c0_4 = arith.constant 0 : index
    %3 = vector.load %arg3[%c0_3, %c0_4] : memref<1x128xf32, #tpu.memory_space<vmem>>, vector<1x128xf32>
    %4 = vector.broadcast %3 : vector<1x128xf32> to vector<256x128xf32>
    %5 = arith.addf %2, %4 : vector<256x128xf32>
    %cst_5 = arith.constant 0.000000e+00 : f32
    %6 = vector.broadcast %cst_5 : f32 to vector<256x128xf32>
    %7 = arith.cmpf oge, %5, %6 : vector<256x128xf32>
    %cst_6 = arith.constant 2.000000e-01 : f32
    %8 = vector.broadcast %cst_6 : f32 to vector<256x128xf32>
    %9 = arith.mulf %8, %5 : vector<256x128xf32>
    %10 = arith.select %7, %5, %9 : vector<256x128xi1>, vector<256x128xf32>
    %c0_7 = arith.constant 0 : index
    %c0_8 = arith.constant 0 : index
    %11 = vector.load %arg4[%c0_7, %c0_8] : memref<256x128xf32, #tpu.memory_space<vmem>>, vector<256x128xf32>
    tpu.vector_store %arg4[%c0_7, %c0_8], %10 {strides = array<i32>} : memref<256x128xf32, #tpu.memory_space<vmem>>, vector<256x128xf32>,
    return
  }
  func.func @transform_0(%arg0: i32) -> (i32, i32) {
    %c0_i32 = arith.constant 0 : i32
    %c0_i32_0 = arith.constant 0 : i32
    return %arg0, %c0_i32 : i32, i32
  }
  func.func @transform_1(%arg0: i32) -> (i32, i32) {
    %c0_i32 = arith.constant 0 : i32
    %c0_i32_0 = arith.constant 0 : i32
    %c0_i32_1 = arith.constant 0 : i32
    return %c0_i32, %c0_i32_0 : i32, i32
  }
  func.func @transform_2(%arg0: i32) -> (i32, i32) {
    %c0_i32 = arith.constant 0 : i32
    %c0_i32_0 = arith.constant 0 : i32
    %c0_i32_1 = arith.constant 0 : i32
    return %c0_i32, %c0_i32_0 : i32, i32
  }
  func.func @transform_3(%arg0: i32) -> (i32, i32) {
    %c0_i32 = arith.constant 0 : i32
    %c0_i32_0 = arith.constant 0 : i32
    return %arg0, %c0_i32 : i32, i32
  }
}

module attributes {stable_mosaic.version = 11 : i64} {
  func.func @_conv_mm_kernel(%arg0: i32, %arg1: memref<256x576xbf16, #tpu.memory_space<vmem>>, %arg2: memref<576x128xbf16, #tpu.memory_space<vmem>>, %arg3: memref<1x128xf32, #tpu.memory_space<vmem>>, %arg4: memref<256x128xf32, #tpu.memory_space<vmem>>) attributes {dimension_semantics = [#tpu.dimension_semantics<parallel>], iteration_bounds = array<i64: 2>, scalar_prefetch = 0 : i64, scratch_operands = 0 : i64, tpu.core_type = #tpu.core_type<tc>, window_params = [{transform_indices = @transform_0, window_bounds = array<i64: 256, 576>}, {pipeline_mode = #tpu.pipeline_mode<synchronous>, transform_indices = @transform_1, window_bounds = array<i64: 576, 128>}, {pipeline_mode = #tpu.pipeline_mode<synchronous>, transform_indices = @transform_2, window_bounds = array<i64: 1, 128>}, {transform_indices = @transform_3, window_bounds = array<i64: 256, 128>}]} {
    %c0 = arith.constant 0 : index
    %c0_0 = arith.constant 0 : index
    %0 = vector.load %arg1[%c0, %c0_0] : memref<256x576xbf16, #tpu.memory_space<vmem>>, vector<256x576xbf16>
    %c0_1 = arith.constant 0 : index
    %c0_2 = arith.constant 0 : index
    %1 = vector.load %arg2[%c0_1, %c0_2] : memref<576x128xbf16, #tpu.memory_space<vmem>>, vector<576x128xbf16>
    %cst = arith.constant dense<0.000000e+00> : vector<256x128xf32>
    %2 = tpu.matmul %0, %1, %cst {dimension_numbers = #tpu.dot_dimension_numbers<[1], [0], [0], [1], [0, 0, 1, 1], [], []>} : vector<256x576xbf16>, vector<576x128xbf16>, vector<256x128xf32> -> vector<256x128xf32>
    %c0_3 = arith.constant 0 : index
    %c0_4 = arith.constant 0 : index
    %3 = vector.load %arg3[%c0_3, %c0_4] : memref<1x128xf32, #tpu.memory_space<vmem>>, vector<1x128xf32>
    %4 = vector.broadcast %3 : vector<1x128xf32> to vector<256x128xf32>
    %5 = arith.addf %2, %4 : vector<256x128xf32>
    %cst_5 = arith.constant 0.000000e+00 : f32
    %6 = vector.broadcast %cst_5 : f32 to vector<256x128xf32>
    %7 = arith.cmpf oge, %5, %6 : vector<256x128xf32>
    %cst_6 = arith.constant 2.000000e-01 : f32
    %8 = vector.broadcast %cst_6 : f32 to vector<256x128xf32>
    %9 = arith.mulf %8, %5 : vector<256x128xf32>
    %10 = arith.select %7, %5, %9 : vector<256x128xi1>, vector<256x128xf32>
    %c0_7 = arith.constant 0 : index
    %c0_8 = arith.constant 0 : index
    %11 = vector.load %arg4[%c0_7, %c0_8] : memref<256x128xf32, #tpu.memory_space<vmem>>, vector<256x128xf32>
    tpu.vector_store %arg4[%c0_7, %c0_8], %10 {strides = array<i32>} : memref<256x128xf32, #tpu.memory_space<vmem>>, vector<256x128xf32>,
    return
  }
  func.func @transform_0(%arg0: i32) -> (i32, i32) {
    %c0_i32 = arith.constant 0 : i32
    %c0_i32_0 = arith.constant 0 : i32
    return %arg0, %c0_i32 : i32, i32
  }
  func.func @transform_1(%arg0: i32) -> (i32, i32) {
    %c0_i32 = arith.constant 0 : i32
    %c0_i32_0 = arith.constant 0 : i32
    %c0_i32_1 = arith.constant 0 : i32
    return %c0_i32, %c0_i32_0 : i32, i32
  }
  func.func @transform_2(%arg0: i32) -> (i32, i32) {
    %c0_i32 = arith.constant 0 : i32
    %c0_i32_0 = arith.constant 0 : i32
    %c0_i32_1 = arith.constant 0 : i32
    return %c0_i32, %c0_i32_0 : i32, i32
  }
  func.func @transform_3(%arg0: i32) -> (i32, i32) {
    %c0_i32 = arith.constant 0 : i32
    %c0_i32_0 = arith.constant 0 : i32
    return %arg0, %c0_i32 : i32, i32
  }
}

module attributes {stable_mosaic.version = 11 : i64} {
  func.func @_conv_mm_kernel(%arg0: i32, %arg1: memref<256x720xbf16, #tpu.memory_space<vmem>>, %arg2: memref<720x128xbf16, #tpu.memory_space<vmem>>, %arg3: memref<1x128xf32, #tpu.memory_space<vmem>>, %arg4: memref<256x128xf32, #tpu.memory_space<vmem>>) attributes {dimension_semantics = [#tpu.dimension_semantics<parallel>], iteration_bounds = array<i64: 2>, scalar_prefetch = 0 : i64, scratch_operands = 0 : i64, tpu.core_type = #tpu.core_type<tc>, window_params = [{transform_indices = @transform_0, window_bounds = array<i64: 256, 720>}, {pipeline_mode = #tpu.pipeline_mode<synchronous>, transform_indices = @transform_1, window_bounds = array<i64: 720, 128>}, {pipeline_mode = #tpu.pipeline_mode<synchronous>, transform_indices = @transform_2, window_bounds = array<i64: 1, 128>}, {transform_indices = @transform_3, window_bounds = array<i64: 256, 128>}]} {
    %c0 = arith.constant 0 : index
    %c0_0 = arith.constant 0 : index
    %0 = vector.load %arg1[%c0, %c0_0] : memref<256x720xbf16, #tpu.memory_space<vmem>>, vector<256x720xbf16>
    %c0_1 = arith.constant 0 : index
    %c0_2 = arith.constant 0 : index
    %1 = vector.load %arg2[%c0_1, %c0_2] : memref<720x128xbf16, #tpu.memory_space<vmem>>, vector<720x128xbf16>
    %cst = arith.constant dense<0.000000e+00> : vector<256x128xf32>
    %2 = tpu.matmul %0, %1, %cst {dimension_numbers = #tpu.dot_dimension_numbers<[1], [0], [0], [1], [0, 0, 1, 1], [], []>} : vector<256x720xbf16>, vector<720x128xbf16>, vector<256x128xf32> -> vector<256x128xf32>
    %c0_3 = arith.constant 0 : index
    %c0_4 = arith.constant 0 : index
    %3 = vector.load %arg3[%c0_3, %c0_4] : memref<1x128xf32, #tpu.memory_space<vmem>>, vector<1x128xf32>
    %4 = vector.broadcast %3 : vector<1x128xf32> to vector<256x128xf32>
    %5 = arith.addf %2, %4 : vector<256x128xf32>
    %cst_5 = arith.constant 0.000000e+00 : f32
    %6 = vector.broadcast %cst_5 : f32 to vector<256x128xf32>
    %7 = arith.cmpf oge, %5, %6 : vector<256x128xf32>
    %cst_6 = arith.constant 2.000000e-01 : f32
    %8 = vector.broadcast %cst_6 : f32 to vector<256x128xf32>
    %9 = arith.mulf %8, %5 : vector<256x128xf32>
    %10 = arith.select %7, %5, %9 : vector<256x128xi1>, vector<256x128xf32>
    %c0_7 = arith.constant 0 : index
    %c0_8 = arith.constant 0 : index
    %11 = vector.load %arg4[%c0_7, %c0_8] : memref<256x128xf32, #tpu.memory_space<vmem>>, vector<256x128xf32>
    tpu.vector_store %arg4[%c0_7, %c0_8], %10 {strides = array<i32>} : memref<256x128xf32, #tpu.memory_space<vmem>>, vector<256x128xf32>,
    return
  }
  func.func @transform_0(%arg0: i32) -> (i32, i32) {
    %c0_i32 = arith.constant 0 : i32
    %c0_i32_0 = arith.constant 0 : i32
    return %arg0, %c0_i32 : i32, i32
  }
  func.func @transform_1(%arg0: i32) -> (i32, i32) {
    %c0_i32 = arith.constant 0 : i32
    %c0_i32_0 = arith.constant 0 : i32
    %c0_i32_1 = arith.constant 0 : i32
    return %c0_i32, %c0_i32_0 : i32, i32
  }
  func.func @transform_2(%arg0: i32) -> (i32, i32) {
    %c0_i32 = arith.constant 0 : i32
    %c0_i32_0 = arith.constant 0 : i32
    %c0_i32_1 = arith.constant 0 : i32
    return %c0_i32, %c0_i32_0 : i32, i32
  }
  func.func @transform_3(%arg0: i32) -> (i32, i32) {
    %c0_i32 = arith.constant 0 : i32
    %c0_i32_0 = arith.constant 0 : i32
    return %arg0, %c0_i32 : i32, i32
  }
}

module attributes {stable_mosaic.version = 11 : i64} {
  func.func @_conv_mm_kernel(%arg0: i32, %arg1: memref<256x864xbf16, #tpu.memory_space<vmem>>, %arg2: memref<864x128xbf16, #tpu.memory_space<vmem>>, %arg3: memref<1x128xf32, #tpu.memory_space<vmem>>, %arg4: memref<256x128xf32, #tpu.memory_space<vmem>>, %arg5: memref<256x128xf32, #tpu.memory_space<vmem>>) attributes {dimension_semantics = [#tpu.dimension_semantics<parallel>], iteration_bounds = array<i64: 2>, scalar_prefetch = 0 : i64, scratch_operands = 0 : i64, tpu.core_type = #tpu.core_type<tc>, window_params = [{transform_indices = @transform_0, window_bounds = array<i64: 256, 864>}, {pipeline_mode = #tpu.pipeline_mode<synchronous>, transform_indices = @transform_1, window_bounds = array<i64: 864, 128>}, {pipeline_mode = #tpu.pipeline_mode<synchronous>, transform_indices = @transform_2, window_bounds = array<i64: 1, 128>}, {transform_indices = @transform_3, window_bounds = array<i64: 256, 128>}, {transform_indices = @transform_4, window_bounds = array<i64: 256, 128>}]} {
    %c0 = arith.constant 0 : index
    %c0_0 = arith.constant 0 : index
    %0 = vector.load %arg1[%c0, %c0_0] : memref<256x864xbf16, #tpu.memory_space<vmem>>, vector<256x864xbf16>
    %c0_1 = arith.constant 0 : index
    %c0_2 = arith.constant 0 : index
    %1 = vector.load %arg2[%c0_1, %c0_2] : memref<864x128xbf16, #tpu.memory_space<vmem>>, vector<864x128xbf16>
    %cst = arith.constant dense<0.000000e+00> : vector<256x128xf32>
    %2 = tpu.matmul %0, %1, %cst {dimension_numbers = #tpu.dot_dimension_numbers<[1], [0], [0], [1], [0, 0, 1, 1], [], []>} : vector<256x864xbf16>, vector<864x128xbf16>, vector<256x128xf32> -> vector<256x128xf32>
    %c0_3 = arith.constant 0 : index
    %c0_4 = arith.constant 0 : index
    %3 = vector.load %arg3[%c0_3, %c0_4] : memref<1x128xf32, #tpu.memory_space<vmem>>, vector<1x128xf32>
    %4 = vector.broadcast %3 : vector<1x128xf32> to vector<256x128xf32>
    %5 = arith.addf %2, %4 : vector<256x128xf32>
    %cst_5 = arith.constant 2.000000e-01 : f32
    %6 = vector.broadcast %cst_5 : f32 to vector<256x128xf32>
    %7 = arith.mulf %5, %6 : vector<256x128xf32>
    %c0_6 = arith.constant 0 : index
    %c0_7 = arith.constant 0 : index
    %8 = vector.load %arg4[%c0_6, %c0_7] : memref<256x128xf32, #tpu.memory_space<vmem>>, vector<256x128xf32>
    %9 = arith.addf %7, %8 : vector<256x128xf32>
    %c0_8 = arith.constant 0 : index
    %c0_9 = arith.constant 0 : index
    %10 = vector.load %arg5[%c0_8, %c0_9] : memref<256x128xf32, #tpu.memory_space<vmem>>, vector<256x128xf32>
    tpu.vector_store %arg5[%c0_8, %c0_9], %9 {strides = array<i32>} : memref<256x128xf32, #tpu.memory_space<vmem>>, vector<256x128xf32>,
    return
  }
  func.func @transform_0(%arg0: i32) -> (i32, i32) {
    %c0_i32 = arith.constant 0 : i32
    %c0_i32_0 = arith.constant 0 : i32
    return %arg0, %c0_i32 : i32, i32
  }
  func.func @transform_1(%arg0: i32) -> (i32, i32) {
    %c0_i32 = arith.constant 0 : i32
    %c0_i32_0 = arith.constant 0 : i32
    %c0_i32_1 = arith.constant 0 : i32
    return %c0_i32, %c0_i32_0 : i32, i32
  }
  func.func @transform_2(%arg0: i32) -> (i32, i32) {
    %c0_i32 = arith.constant 0 : i32
    %c0_i32_0 = arith.constant 0 : i32
    %c0_i32_1 = arith.constant 0 : i32
    return %c0_i32, %c0_i32_0 : i32, i32
  }
  func.func @transform_3(%arg0: i32) -> (i32, i32) {
    %c0_i32 = arith.constant 0 : i32
    %c0_i32_0 = arith.constant 0 : i32
    return %arg0, %c0_i32 : i32, i32
  }
  func.func @transform_4(%arg0: i32) -> (i32, i32) {
    %c0_i32 = arith.constant 0 : i32
    %c0_i32_0 = arith.constant 0 : i32
    return %arg0, %c0_i32 : i32, i32
  }
}

</mosaic_0001>

<bundles_post_ra>
// kernel: residual_dense_block.5
= control target key start
LH: loop header
LB: loop body
LE: loop exit
PB: predicated region body
PF: predicated region fallthrough
CT: control target
= control target key end

     0   :  { %s1583_s12 = smov 0   ;;  %s1831_s0 = inlined_call_operand.vmem [shape: bf16[512,288], index: 0, kind: input, shape index: {}]   ;;  %s1832_s1 = inlined_call_operand.vmem [shape: bf16[288,128], index: 1, kind: input, shape index: {}]   ;;  %s1833_s2 = inlined_call_operand.vmem [shape: f32[1,128], index: 2, kind: input, shape index: {}]   ;;  %s1834_s3 = inlined_call_operand.vmem [shape: f32[512,128], index: 3, kind: output, shape index: {}]  }
   0x1 LB: > { %s1188_s13 = sadd.s32 4294967295, %s1561_s12   ;;  %p1192_p0 = scmp.ge.s32.totalorder %s1561_s12, 1  ;;  %s1561_s12 = sphi %s1583_s12, %s13_s12  }
   0x2   : > { %p139_p1 = scmp.lt.s32.totalorder %s1561_s12, 3 }
   0x4   : > { %p140_p2 = pnand %p1192_p0, %p139_p1 }
   0x5   : > { %v1473_v0 = vld [vmem:[%s1832_s1 + $0x40] sm:$0xff] (!%p140_p2)   ;;  %s1193_s16 = sshll.u32 (!%p140_p2), %s1188_s13, 5  ;;  %v1475_v2 = vld [vmem:[%s1832_s1 + $0x48] sm:$0xff] (!%p140_p2)   ;;  %v1477_v4 = vld [vmem:[%s1832_s1 + $0x50] sm:$0xff] (!%p140_p2)   ;;  %vm633_vm0 = vcmask (!%p140_p2), 261120  }
   0x6   : > { %143 = sbr.rel (%p140_p2) target bundleno = 351 (0x15f), region = 32  ;;  %v1474_v1 = vld [vmem:[%s1832_s1] sm:$0xff] (!%p140_p2)   ;;  %1282 = vmatprep.subr.bf16.mxu0 (!%p140_p2), %v1473_v0  ;;  %1448 = vmatprep.subr.bf16.mxu1 (!%p140_p2), %v1473_v0  ;;  %p165_p3 = scmp.lt.s32.totalorder (!%p140_p2), %s1193_s16, 63  ;;  %v1476_v3 = vld [vmem:[%s1832_s1 + $0x8] sm:$0xff] (!%p140_p2)   ;;  %v1478_v5 = vld [vmem:[%s1832_s1 + $0x10] sm:$0xff] (!%p140_p2)  }
   0x7   : > { %1283 = vmatpush3.bf16.msra.mxu0 (!%p140_p2), %v1474_v1  ;;  %1456 = vmatpush3.bf16.msra.mxu1 (!%p140_p2), %v1474_v1  ;;  %v1479_v6 = vld [vmem:[%s1832_s1 + $0x58] sm:$0xff] (!%p140_p2)   ;;  %v1481_v8 = vld [vmem:[%s1832_s1 + $0x60] sm:$0xff] (!%p140_p2)   ;;  %v1483_v10 = vld [vmem:[%s1832_s1 + $0x68] sm:$0xff] (!%p140_p2)  }
   0x8   : > { %1284 = vmatprep.subr.bf16.mxu0 (!%p140_p2), %v1475_v2  ;;  %1449 = vmatprep.subr.bf16.mxu1 (!%p140_p2), %v1475_v2  ;;  %v1480_v7 = vld [vmem:[%s1832_s1 + $0x18] sm:$0xff] (!%p140_p2)   ;;  %v1482_v9 = vld [vmem:[%s1832_s1 + $0x20] sm:$0xff] (!%p140_p2)   ;;  %v1484_v13 = vld [vmem:[%s1832_s1 + $0x28] sm:$0xff] (!%p140_p2)  }
   0x9   : > { %v1485_v14 = vld [vmem:[%s1832_s1 + $0x70] sm:$0xff] (!%p140_p2)   ;;  %v1487_v16 = vld [vmem:[%s1832_s1 + $0x78] sm:$0xff] (!%p140_p2)   ;;  %v1495_v18 = vld [vmem:[%s1832_s1 + $0x80] sm:$0xff] (!%p140_p2)  }
   0xa   : > { %v1486_v15 = vld [vmem:[%s1832_s1 + $0x30] sm:$0xff] (!%p140_p2)   ;;  %v1488_v17 = vld [vmem:[%s1832_s1 + $0x38] sm:$0xff] (!%p140_p2)   ;;  %v1508_v23 = vld [vmem:[%s1832_s1 + $0x88] sm:$0xff] (!%p140_p2)  }
   0xb   : > { %1285 = vmatpush3.bf16.msra.mxu0 (!%p140_p2), %v1476_v3  ;;  %1457 = vmatpush3.bf16.msra.mxu1 (!%p140_p2), %v1476_v3 }
   0xc   : > { %1286 = vmatprep.subr.bf16.mxu0 (!%p140_p2), %v1477_v4  ;;  %1450 = vmatprep.subr.bf16.mxu1 (!%p140_p2), %v1477_v4 }
   0xd   : > { %s1836_s16 = smov (!%p165_p3, %s1193_s16), 63 }
   0xe   : > { %s1464_s29 = smul.u32 12, %s1836_s16  ;;  %s1196_s5 = sshll.u32 %s1836_s16, 3 }
   0xf   : > { %1287 = vmatpush3.bf16.msra.mxu0 %v1478_v5  ;;  %1458 = vmatpush3.bf16.msra.mxu1 %v1478_v5  ;;  %s1750_s8 = scalar_lea.vmem %s1834_s3, %s1196_s5 }
  0x10   : > { %1288 = vmatprep.subr.bf16.mxu0 %v1479_v6  ;;  %1451 = vmatprep.subr.bf16.mxu1 %v1479_v6  ;;  %s1624_s9 = scalar_lea.vmem %s1831_s0, %s1464_s29 }
  0x11   : > { %v1491_v11 = vld [vmem:[%s1624_s9 + $0x4] ss:$12 sps:$4 sm:$0xff]   ;;  %v1489_v19 = vld [vmem:[%s1624_s9] ss:$12 sps:$4 sm:$0xff]   ;;  %v1496_v21 = vld [vmem:[%s1624_s9 + $0x1c] ss:$12 sps:$4 sm:$0xff]  }
  0x12   : > { %v1494_v12 = vld [vmem:[%s1624_s9 + $0x124] ss:$12 sps:$4 sm:$0xff]   ;;  %714 = vmatprep.mubr.bf16.mxu0 %v1491_v11  ;;  %v1492_v20 = vld [vmem:[%s1624_s9 + $0x120] ss:$12 sps:$4 sm:$0xff]   ;;  %v1498_v22 = vld [vmem:[%s1624_s9 + $0x13c] ss:$12 sps:$4 sm:$0xff]  }
  0x13   : > { %1289 = vmatpush3.bf16.msra.mxu0 %v1480_v7  ;;  %1459 = vmatpush3.bf16.msra.mxu1 %v1480_v7  ;;  %v1500_v24 = vld [vmem:[%s1624_s9 + $0x18] ss:$12 sps:$4 sm:$0xff]   ;;  %v1502_v26 = vld [vmem:[%s1624_s9 + $0x34] ss:$12 sps:$4 sm:$0xff]   ;;  %v1506_v28 = vld [vmem:[%s1624_s9 + $0x30] ss:$12 sps:$4 sm:$0xff]  }
  0x14   : > { %1290 = vmatprep.subr.bf16.mxu0 %v1481_v8  ;;  %1452 = vmatprep.subr.bf16.mxu1 %v1481_v8  ;;  %v1501_v25 = vld [vmem:[%s1624_s9 + $0x138] ss:$12 sps:$4 sm:$0xff]   ;;  %v1504_v27 = vld [vmem:[%s1624_s9 + $0x154] ss:$12 sps:$4 sm:$0xff]   ;;  %v1507_v29 = vld [vmem:[%s1624_s9 + $0x150] ss:$12 sps:$4 sm:$0xff]  }
  0x15   : > { %810 = vmatprep.mubr.bf16.mxu1 %v1494_v12  ;;  %v1509_v30 = vld [vmem:[%s1624_s9 + $0x4c] ss:$12 sps:$4 sm:$0xff]   ;;  %v1513_v32 = vld [vmem:[%s1624_s9 + $0x48] ss:$12 sps:$4 sm:$0xff]   ;;  %v1515_v34 = vld [vmem:[%s1624_s9 + $0x64] ss:$12 sps:$4 sm:$0xff]  }
  0x16   : > { %v1511_v31 = vld [vmem:[%s1624_s9 + $0x16c] ss:$12 sps:$4 sm:$0xff]   ;;  %v1514_v33 = vld [vmem:[%s1624_s9 + $0x168] ss:$12 sps:$4 sm:$0xff]   ;;  %v1524_v41 = vld [vmem:[%s1624_s9 + $0x50] ss:$12 sps:$4 sm:$0xff]  }
  0x17   : > { %1291 = vmatpush3.bf16.msra.mxu0 %v1482_v9  ;;  %1460 = vmatpush3.bf16.msra.mxu1 %v1482_v9  ;;  %v1517_v35 = vld [vmem:[%s1624_s9 + $0x8] ss:$12 sps:$4 sm:$0xff]   ;;  %v1518_v36 = vld [vmem:[%s1624_s9 + $0x60] ss:$12 sps:$4 sm:$0xff]   ;;  %v1522_v39 = vld [vmem:[%s1624_s9 + $0x38] ss:$12 sps:$4 sm:$0xff]  }
  0x18   : > { %1292 = vmatprep.subr.bf16.mxu0 %v1483_v10  ;;  %1453 = vmatprep.subr.bf16.mxu1 %v1483_v10  ;;  %v1519_v37 = vld [vmem:[%s1624_s9 + $0x20] ss:$12 sps:$4 sm:$0xff]   ;;  %v1520_v38 = vld [vmem:[%s1624_s9 + $0x7c] ss:$12 sps:$4 sm:$0xff]   ;;  %v1523_v40 = vld [vmem:[%s1624_s9 + $0x78] ss:$12 sps:$4 sm:$0xff]  }
  0x19   : > { %v1525_v42 = vld [vmem:[%s1624_s9 + $0x94] ss:$12 sps:$4 sm:$0xff]   ;;  %v1528_v44 = vld [vmem:[%s1624_s9 + $0x90] ss:$12 sps:$4 sm:$0xff]   ;;  %v1530_v46 = vld [vmem:[%s1624_s9 + $0xac] ss:$12 sps:$4 sm:$0xff]  }
  0x1a   : > { %v1527_v43 = vld [vmem:[%s1624_s9 + $0x68] ss:$12 sps:$4 sm:$0xff]   ;;  %v1529_v45 = vld [vmem:[%s1624_s9 + $0x80] ss:$12 sps:$4 sm:$0xff]   ;;  %v1532_v47 = vld [vmem:[%s1624_s9 + $0x98] ss:$12 sps:$4 sm:$0xff]  }
  0x1b   : > { %1293 = vmatpush3.bf16.msra.mxu0 %v1484_v13  ;;  %1461 = vmatpush3.bf16.msra.mxu1 %v1484_v13  ;;  %v1533_v48 = vld [vmem:[%s1624_s9 + $0xa8] ss:$12 sps:$4 sm:$0xff]   ;;  %v1534_v49 = vld [vmem:[%s1624_s9 + $0xb0] ss:$12 sps:$4 sm:$0xff]   ;;  %v1538_v52 = vld [vmem:[%s1624_s9 + $0xc0] ss:$12 sps:$4 sm:$0xff]  }
  0x1c   : > { %1294 = vmatprep.subr.bf16.mxu0 %v1485_v14  ;;  %1454 = vmatprep.subr.bf16.mxu1 %v1485_v14  ;;  %v1535_v50 = vld [vmem:[%s1624_s9 + $0xc4] ss:$12 sps:$4 sm:$0xff]   ;;  %v1537_v51 = vld [vmem:[%s1624_s9 + $0xc8] ss:$12 sps:$4 sm:$0xff]   ;;  %v1539_v53 = vld [vmem:[%s1624_s9 + $0xe0] ss:$12 sps:$4 sm:$0xff]  }
  0x1d   : > { %v1540_v54 = vld [vmem:[%s1624_s9 + $0xdc] ss:$12 sps:$4 sm:$0xff]   ;;  %v1542_v55 = vld [vmem:[%s1624_s9 + $0xf8] ss:$12 sps:$4 sm:$0xff]   ;;  %v1545_v58 = vld [vmem:[%s1624_s9 + $0xf4] ss:$12 sps:$4 sm:$0xff]  }
  0x1e   : > { %v1543_v56 = vld [vmem:[%s1624_s9 + $0xd8] ss:$12 sps:$4 sm:$0xff]   ;;  %v1544_v57 = vld [vmem:[%s1624_s9 + $0x110] ss:$12 sps:$4 sm:$0xff]   ;;  %v1547_v59 = vld [vmem:[%s1624_s9 + $0x128] ss:$12 sps:$4 sm:$0xff]  }
  0x1f   : > { %1295 = vmatpush3.bf16.msra.mxu0 %v1486_v15  ;;  %1462 = vmatpush3.bf16.msra.mxu1 %v1486_v15  ;;  %v1548_v60 = vld [vmem:[%s1624_s9 + $0xf0] ss:$12 sps:$4 sm:$0xff]   ;;  %v1549_v61 = vld [vmem:[%s1624_s9 + $0x140] ss:$12 sps:$4 sm:$0xff]   ;;  %v1552_v63 = vld [vmem:[%s1624_s9 + $0x158] ss:$12 sps:$4 sm:$0xff]  }
  0x20   : > { %1296 = vmatprep.subr.bf16.mxu0 %v1487_v16  ;;  %1455 = vmatprep.subr.bf16.mxu1 %v1487_v16  ;;  %v1550_v62 = vld [vmem:[%s1624_s9 + $0x10c] ss:$12 sps:$4 sm:$0xff]   ;;  %v1553_v0 = vld [vmem:[%s1624_s9 + $0x108] ss:$12 sps:$4 sm:$0xff]   ;;  %v1554_v1 = vld [vmem:[%s1624_s9 + $0x170] ss:$12 sps:$4 sm:$0xff]  }
  0x23   : > { %1297 = vmatpush3.bf16.msra.mxu0 %v1488_v17  ;;  %1463 = vmatpush3.bf16.msra.mxu1 %v1488_v17 }
  0x24   : > { %1412 = vmatprep.subr.bf16.mxu1 %v1495_v18 }
  0x26   : > { %715 = vmatmul.mubr.bf16.vlgmr.msra.gmra.mrb[0].mxu0 %v1489_v19  ;;  %811 = vmatmul.mubr.bf16.vlgmr.msra.gmra.mrb[0].mxu1 %v1492_v20 }
  0x27   : > { %1413 = vmatpush3.bf16.msra.mxu1 %v1495_v18  ;;  %722 = vmatprep.mubr.bf16.mxu0 %v1496_v21 }
  0x28   : > { %818 = vmatprep.mubr.bf16.mxu1 %v1498_v22  ;;  %1414 = vmatprep.subr.bf16.mxu1 %v1508_v23 }
  0x2b   : > { %1415 = vmatpush3.bf16.msra.mxu1 %v1508_v23 }
  0x2e   : > { %723 = vmatmul.mubr.bf16.gmra.mrb[4].mxu0 %v1500_v24  ;;  %819 = vmatmul.mubr.bf16.gmra.mrb[4].mxu1 %v1501_v25 }
  0x2f   : > { %730 = vmatprep.mubr.bf16.mxu0 %v1502_v26  ;;  %826 = vmatprep.mubr.bf16.mxu1 %v1504_v27 }
  0x36   : > { %731 = vmatmul.mubr.bf16.gmra.mrb[8].mxu0 %v1506_v28  ;;  %827 = vmatmul.mubr.bf16.gmra.mrb[8].mxu1 %v1507_v29 }
  0x37   : > { %738 = vmatprep.mubr.bf16.mxu0 %v1509_v30  ;;  %834 = vmatprep.mubr.bf16.mxu1 %v1511_v31 }
  0x3e   : > { %739 = vmatmul.mubr.bf16.gmra.mrb[12].mxu0 %v1513_v32  ;;  %835 = vmatmul.mubr.bf16.gmra.mrb[12].mxu1 %v1514_v33 }
  0x3f   : > { %746 = vmatprep.mubr.bf16.mxu0 %v1515_v34  ;;  %1416 = vmatprep.mubr.msk.bf16.mxu1 %vm633_vm0, %v1517_v35 }
  0x46   : > { %747 = vmatmul.mubr.bf16.gmra.mrb[16].mxu0 %v1518_v36  ;;  %1417 = vmatmul.mubr.msk.bf16.vlgmr.msra.gmra.mrb[16].mxu1 %vm633_vm0, %v1519_v37 }
  0x47   : > { %754 = vmatprep.mubr.bf16.mxu0 %v1520_v38  ;;  %1420 = vmatprep.mubr.msk.bf16.mxu1 %vm633_vm0, %v1522_v39 }
  0x4e   : > { %755 = vmatmul.mubr.bf16.gmra.mrb[20].mxu0 %v1523_v40  ;;  %1421 = vmatmul.mubr.msk.bf16.gmra.mrb[20].mxu1 %vm633_vm0, %v1524_v41 }
  0x4f   : > { %762 = vmatprep.mubr.bf16.mxu0 %v1525_v42  ;;  %1424 = vmatprep.mubr.msk.bf16.mxu1 %vm633_vm0, %v1527_v43 }
  0x56   : > { %763 = vmatmul.mubr.bf16.gmra.mrb[24].mxu0 %v1528_v44  ;;  %1425 = vmatmul.mubr.msk.bf16.gmra.mrb[24].mxu1 %vm633_vm0, %v1529_v45 }
  0x57   : > { %770 = vmatprep.mubr.bf16.mxu0 %v1530_v46  ;;  %1428 = vmatprep.mubr.msk.bf16.mxu1 %vm633_vm0, %v1532_v47 }
  0x5e   : > { %771 = vmatmul.mubr.bf16.gmra.mrb[28].mxu0 %v1533_v48  ;;  %1429 = vmatmul.mubr.msk.bf16.gmra.mrb[28].mxu1 %vm633_vm0, %v1534_v49 }
  0x5f   : > { %778 = vmatprep.mubr.bf16.mxu0 %v1535_v50  ;;  %1432 = vmatprep.mubr.msk.bf16.mxu1 %vm633_vm0, %v1537_v51  ;;  %v1738_v50 = vld [vmem:[%s1833_s2] ss:$0 sm:$0xff] }
  0x66   : > { %779 = vmatmul.mubr.bf16.gmra.mrb[32].mxu0 %v1538_v52  ;;  %1433 = vmatmul.mubr.msk.bf16.gmra.mrb[32].mxu1 %vm633_vm0, %v1539_v53 }
  0x67   : > { %786 = vmatprep.mubr.bf16.mxu0 %v1540_v54  ;;  %1436 = vmatprep.mubr.msk.bf16.mxu1 %vm633_vm0, %v1542_v55 }
  0x6e   : > { %787 = vmatmul.mubr.bf16.gmra.mrb[36].mxu0 %v1543_v56  ;;  %1437 = vmatmul.mubr.msk.bf16.gmra.mrb[36].mxu1 %vm633_vm0, %v1544_v57 }
  0x6f   : > { %794 = vmatprep.mubr.bf16.mxu0 %v1545_v58  ;;  %1440 = vmatprep.mubr.msk.bf16.mxu1 %vm633_vm0, %v1547_v59 }
  0x76   : > { %795 = vmatmul.mubr.bf16.gmra.mrb[40].mxu0 %v1548_v60  ;;  %1441 = vmatmul.mubr.msk.bf16.gmra.mrb[40].mxu1 %vm633_vm0, %v1549_v61 }
  0x77   : > { %802 = vmatprep.mubr.bf16.mxu0 %v1550_v62  ;;  %1444 = vmatprep.mubr.msk.bf16.mxu1 %vm633_vm0, %v1552_v63 }
  0x7e   : > { %803 = vmatmul.mubr.bf16.gmra.mrb[44].mxu0 %v1553_v0  ;;  %1445 = vmatmul.mubr.msk.bf16.gmra.mrb[44].mxu1 %vm633_vm0, %v1554_v1 }
  0xf9   : > { %v1298_v2 = vpop.f32.mrb[0].mxu0  ;;  %v1370_v3 = vpop.f32.mrb[0].mxu1 }
  0xfa   : > { %v1299_v4 = vpop.f32.mrb[1].mxu0  ;;  %v1371_v5 = vpop.f32.mrb[1].mxu1 }
  0xfb   : > { %v1300_v6 = vadd.f32 %v1299_v4, %v1298_v2  ;;  %v1301_v7 = vpop.f32.mrb[2].mxu0  ;;  %v1717_v8 = vadd.f32 %v1371_v5, %v1370_v3  ;;  %v1373_v9 = vpop.f32.mrb[2].mxu1 }
  0xfc   : > { %v1302_v10 = vpop.f32.mrb[3].mxu0  ;;  %v1374_v11 = vpop.f32.mrb[3].mxu1 }
  0xfd   : > { %v1303_v12 = vadd.f32 %v1302_v10, %v1301_v7  ;;  %v1719_v13 = vadd.f32 %v1374_v11, %v1373_v9  ;;  %v717_v54 = vadd.f32 %v1300_v6, %v1738_v50 }
  0xff   : > { %v720_v63 = vadd.f32 %v1303_v12, %v1738_v50 }
 0x101   : > { %v1304_v14 = vpop.f32.mrb[4].mxu0  ;;  %v1376_v15 = vpop.f32.mrb[4].mxu1 }
 0x102   : > { %v1305_v16 = vpop.f32.mrb[5].mxu0  ;;  %v1377_v17 = vpop.f32.mrb[5].mxu1 }
 0x103   : > { %v1306_v18 = vadd.f32 %v1305_v16, %v1304_v14  ;;  %v1307_v19 = vpop.f32.mrb[6].mxu0  ;;  %v1721_v20 = vadd.f32 %v1377_v17, %v1376_v15  ;;  %v1379_v21 = vpop.f32.mrb[6].mxu1 }
 0x104   : > { %v1308_v22 = vpop.f32.mrb[7].mxu0  ;;  %v1380_v23 = vpop.f32.mrb[7].mxu1 }
 0x105   : > { %v1309_v24 = vadd.f32 %v1308_v22, %v1307_v19  ;;  %v1723_v25 = vadd.f32 %v1380_v23, %v1379_v21  ;;  %v725_v51 = vadd.f32 %v1306_v18, %v1738_v50 }
 0x107   : > { %v728_v58 = vadd.f32 %v1309_v24, %v1738_v50 }
 0x109   : > { %v1310_v26 = vpop.f32.mrb[8].mxu0  ;;  %v1382_v27 = vpop.f32.mrb[8].mxu1 }
 0x10a   : > { %v1311_v28 = vpop.f32.mrb[9].mxu0  ;;  %v1383_v29 = vpop.f32.mrb[9].mxu1 }
 0x10b   : > { %v1312_v30 = vadd.f32 %v1311_v28, %v1310_v26  ;;  %v1313_v31 = vpop.f32.mrb[10].mxu0  ;;  %v1725_v32 = vadd.f32 %v1383_v29, %v1382_v27  ;;  %v1385_v33 = vpop.f32.mrb[10].mxu1 }
 0x10c   : > { %v1314_v34 = vpop.f32.mrb[11].mxu0  ;;  %v1386_v35 = vpop.f32.mrb[11].mxu1 }
 0x10d   : > { %v1727_v36 = vadd.f32 %v1314_v34, %v1313_v31  ;;  %v1729_v37 = vadd.f32 %v1386_v35, %v1385_v33  ;;  %v733_v18 = vadd.f32 %v1312_v30, %v1738_v50 }
 0x10f   : > { %v736_v29 = vadd.f32 %v1727_v36, %v1738_v50 }
 0x111   : > { %v1316_v38 = vpop.f32.mrb[12].mxu0  ;;  %v1388_v39 = vpop.f32.mrb[12].mxu1 }
 0x112   : > { %v1317_v40 = vpop.f32.mrb[13].mxu0  ;;  %v1389_v41 = vpop.f32.mrb[13].mxu1 }
 0x113   : > { %v1318_v42 = vadd.f32 %v1317_v40, %v1316_v38  ;;  %v1319_v43 = vpop.f32.mrb[14].mxu0  ;;  %v1731_v44 = vadd.f32 %v1389_v41, %v1388_v39  ;;  %v1391_v45 = vpop.f32.mrb[14].mxu1 }
 0x114   : > { %v1320_v46 = vpop.f32.mrb[15].mxu0  ;;  %v1392_v47 = vpop.f32.mrb[15].mxu1 }
 0x115   : > { %v1321_v48 = vadd.f32 %v1320_v46, %v1319_v43  ;;  %v1733_v49 = vadd.f32 %v1392_v47, %v1391_v45  ;;  %v741_v14 = vadd.f32 %v1318_v42, %v1738_v50 }
 0x117   : > { %v744_v23 = vadd.f32 %v1321_v48, %v1738_v50 }
 0x119   : > { %v1322_v52 = vpop.f32.mrb[16].mxu0  ;;  %v1418_v53 = vpop.f32.mrb[16].mxu1 }
 0x11a   : > { %v886_v55 = vadd.f32 %v1418_v53, %v725_v51  ;;  %v1323_v56 = vpop.f32.mrb[17].mxu0  ;;  %v877_v57 = vpop.f32.mrb[17].mxu1 }
 0x11b   : > { %v1744_v59 = vadd.f32 %v1323_v56, %v1322_v52  ;;  %v878_v60 = vadd.f32 %v877_v57, %v717_v54  ;;  %v1325_v61 = vpop.f32.mrb[18].mxu0  ;;  %v1419_v62 = vpop.f32.mrb[18].mxu1 }
 0x11c   : > { %vm1006_vm1 = vcmp.ge.f32.partialorder %v886_v55, 0.0  ;;  %v1038_v0 = vmul.f32 0.2, %v886_v55  ;;  %v889_v1 = vadd.f32 %v1419_v62, %v728_v58  ;;  %v1326_v2 = vpop.f32.mrb[19].mxu0  ;;  %v880_v3 = vpop.f32.mrb[19].mxu1 }
 0x11d   : > { %vm1004_vm2 = vcmp.ge.f32.partialorder %v878_v60, 0.0  ;;  %v1036_v4 = vmul.f32 0.2, %v878_v60  ;;  %v1327_v5 = vadd.f32 %v1326_v2, %v1325_v61  ;;  %v881_v6 = vadd.f32 %v880_v3, %v720_v63 }
 0x11e   : > { %v1070_v7 = vsel %vm1006_vm1, %v886_v55, %v1038_v0  ;;  %vm1007_vm3 = vcmp.ge.f32.partialorder %v889_v1, 0.0  ;;  %v1039_v9 = vmul.f32 0.2, %v889_v1  ;;  %v749_v51 = vadd.f32 %v1744_v59, %v1738_v50 }
 0x11f   : > { %1102 = vst [vmem:[%s1750_s8 + $0x10] sm:$0xff] %v1070_v7  ;;  %v1068_v10 = vsel %vm1004_vm2, %v878_v60, %v1036_v4  ;;  %vm1005_vm4 = vcmp.ge.f32.partialorder %v881_v6, 0.0  ;;  %v1037_v11 = vmul.f32 0.2, %v881_v6  ;;  %v752_v61 = vadd.f32 %v1327_v5, %v1738_v50 }
 0x120   : > { %1100 = vst [vmem:[%s1750_s8] sm:$0xff] %v1068_v10  ;;  %v1071_v12 = vsel %vm1007_vm3, %v889_v1, %v1039_v9 }
 0x121   : > { %1103 = vst [vmem:[%s1750_s8 + $0x18] sm:$0xff] %v1071_v12  ;;  %v1069_v15 = vsel %vm1005_vm4, %v881_v6, %v1037_v11  ;;  %v1328_v16 = vpop.f32.mrb[20].mxu0  ;;  %v1422_v17 = vpop.f32.mrb[20].mxu1 }
 0x122   : > { %1101 = vst [vmem:[%s1750_s8 + $0x8] sm:$0xff] %v1069_v15  ;;  %v902_v19 = vadd.f32 %v1422_v17, %v741_v14  ;;  %v1329_v21 = vpop.f32.mrb[21].mxu0  ;;  %v893_v22 = vpop.f32.mrb[21].mxu1 }
 0x123   : > { %v1330_v24 = vadd.f32 %v1329_v21, %v1328_v16  ;;  %v894_v26 = vadd.f32 %v893_v22, %v733_v18  ;;  %v1331_v27 = vpop.f32.mrb[22].mxu0  ;;  %v1423_v28 = vpop.f32.mrb[22].mxu1 }
 0x124   : > { %vm1010_vm5 = vcmp.ge.f32.partialorder %v902_v19, 0.0  ;;  %v1042_v31 = vmul.f32 0.2, %v902_v19  ;;  %v905_v33 = vadd.f32 %v1423_v28, %v744_v23  ;;  %v1332_v34 = vpop.f32.mrb[23].mxu0  ;;  %v896_v30 = vpop.f32.mrb[23].mxu1 }
 0x125   : > { %vm1008_vm6 = vcmp.ge.f32.partialorder %v894_v26, 0.0  ;;  %v1040_v35 = vmul.f32 0.2, %v894_v26  ;;  %v1333_v38 = vadd.f32 %v1332_v34, %v1331_v27  ;;  %v897_v39 = vadd.f32 %v896_v30, %v736_v29 }
 0x126   : > { %v1074_v40 = vsel %vm1010_vm5, %v902_v19, %v1042_v31  ;;  %vm1011_vm7 = vcmp.ge.f32.partialorder %v905_v33, 0.0  ;;  %v1043_v41 = vmul.f32 0.2, %v905_v33  ;;  %v757_v45 = vadd.f32 %v1330_v24, %v1738_v50 }
 0x127   : > { %1106 = vst [vmem:[%s1750_s8 + $0x30] sm:$0xff] %v1074_v40  ;;  %v1072_v42 = vsel %vm1008_vm6, %v894_v26, %v1040_v35  ;;  %vm1009_vm8 = vcmp.ge.f32.partialorder %v897_v39, 0.0  ;;  %v1041_v43 = vmul.f32 0.2, %v897_v39  ;;  %v760_v55 = vadd.f32 %v1333_v38, %v1738_v50 }
 0x128   : > { %1104 = vst [vmem:[%s1750_s8 + $0x20] sm:$0xff] %v1072_v42  ;;  %v1075_v36 = vsel %vm1011_vm7, %v905_v33, %v1043_v41 }
 0x129   : > { %1107 = vst [vmem:[%s1750_s8 + $0x38] sm:$0xff] %v1075_v36  ;;  %v1073_v46 = vsel %vm1009_vm8, %v897_v39, %v1041_v43  ;;  %v1334_v47 = vpop.f32.mrb[24].mxu0  ;;  %v1426_v48 = vpop.f32.mrb[24].mxu1 }
 0x12a   : > { %1105 = vst [vmem:[%s1750_s8 + $0x28] sm:$0xff] %v1073_v46  ;;  %v918_v52 = vadd.f32 %v1426_v48, %v757_v45  ;;  %v1335_v53 = vpop.f32.mrb[25].mxu0  ;;  %v909_v54 = vpop.f32.mrb[25].mxu1 }
 0x12b   : > { %v1336_v56 = vadd.f32 %v1335_v53, %v1334_v47  ;;  %v910_v57 = vadd.f32 %v909_v54, %v749_v51  ;;  %v1337_v58 = vpop.f32.mrb[26].mxu0  ;;  %v1427_v60 = vpop.f32.mrb[26].mxu1 }
 0x12c   : > { %vm1014_vm9 = vcmp.ge.f32.partialorder %v918_v52, 0.0  ;;  %v1046_v62 = vmul.f32 0.2, %v918_v52  ;;  %v921_v63 = vadd.f32 %v1427_v60, %v760_v55  ;;  %v1338_v0 = vpop.f32.mrb[27].mxu0  ;;  %v912_v59 = vpop.f32.mrb[27].mxu1 }
 0x12d   : > { %vm1012_vm10 = vcmp.ge.f32.partialorder %v910_v57, 0.0  ;;  %v1044_v1 = vmul.f32 0.2, %v910_v57  ;;  %v1339_v2 = vadd.f32 %v1338_v0, %v1337_v58  ;;  %v913_v3 = vadd.f32 %v912_v59, %v752_v61 }
 0x12e   : > { %v1078_v4 = vsel %vm1014_vm9, %v918_v52, %v1046_v62  ;;  %vm1015_vm11 = vcmp.ge.f32.partialorder %v921_v63, 0.0  ;;  %v1047_v6 = vmul.f32 0.2, %v921_v63  ;;  %v765_v14 = vadd.f32 %v1336_v56, %v1738_v50 }
 0x12f   : > { %1110 = vst [vmem:[%s1750_s8 + $0x50] sm:$0xff] %v1078_v4  ;;  %v1076_v7 = vsel %vm1012_vm10, %v910_v57, %v1044_v1  ;;  %vm1013_vm12 = vcmp.ge.f32.partialorder %v913_v3, 0.0  ;;  %v1045_v9 = vmul.f32 0.2, %v913_v3  ;;  %v768_v23 = vadd.f32 %v1339_v2, %v1738_v50 }
 0x130   : > { %1108 = vst [vmem:[%s1750_s8 + $0x40] sm:$0xff] %v1076_v7  ;;  %v1079_v5 = vsel %vm1015_vm11, %v921_v63, %v1047_v6 }
 0x131   : > { %1111 = vst [vmem:[%s1750_s8 + $0x58] sm:$0xff] %v1079_v5  ;;  %v1077_v10 = vsel %vm1013_vm12, %v913_v3, %v1045_v9  ;;  %v1340_v11 = vpop.f32.mrb[28].mxu0  ;;  %v1430_v12 = vpop.f32.mrb[28].mxu1 }
 0x132   : > { %1109 = vst [vmem:[%s1750_s8 + $0x48] sm:$0xff] %v1077_v10  ;;  %v1341_v15 = vpop.f32.mrb[29].mxu0  ;;  %v925_v16 = vpop.f32.mrb[29].mxu1 }
 0x133   : > { %v1342_v17 = vadd.f32 %v1341_v15, %v1340_v11  ;;  %v926_v18 = vadd.f32 %v925_v16, %v765_v14  ;;  %v1343_v19 = vpop.f32.mrb[30].mxu0  ;;  %v1431_v21 = vpop.f32.mrb[30].mxu1  ;;  %v821_v14 = vadd.f32 %v1721_v20, %v1738_v50 }
 0x134   : > { %v1344_v22 = vpop.f32.mrb[31].mxu0  ;;  %v928_v24 = vpop.f32.mrb[31].mxu1 }
 0x135   : > { %v773_v26 = vadd.f32 %v1342_v17, %v1738_v50  ;;  %vm1016_vm13 = vcmp.ge.f32.partialorder %v926_v18, 0.0  ;;  %v1048_v27 = vmul.f32 0.2, %v926_v18  ;;  %v1345_v28 = vadd.f32 %v1344_v22, %v1343_v19 }
 0x136   : > { %v929_v29 = vadd.f32 %v928_v24, %v768_v23  ;;  %v813_v22 = vadd.f32 %v1717_v8, %v1738_v50  ;;  %v824_v24 = vadd.f32 %v1723_v25, %v1738_v50 }
 0x137   : > { %v934_v31 = vadd.f32 %v1430_v12, %v773_v26  ;;  %v1080_v33 = vsel %vm1016_vm13, %v926_v18, %v1048_v27  ;;  %v776_v34 = vadd.f32 %v1345_v28, %v1738_v50  ;;  %v816_v26 = vadd.f32 %v1719_v13, %v1738_v50 }
 0x138   : > { %1112 = vst [vmem:[%s1750_s8 + $0x60] sm:$0xff] %v1080_v33  ;;  %vm1017_vm14 = vcmp.ge.f32.partialorder %v929_v29, 0.0  ;;  %v1049_v30 = vmul.f32 0.2, %v929_v29 }
 0x139   : > { %vm1018_vm15 = vcmp.ge.f32.partialorder %v934_v31, 0.0  ;;  %v1050_v35 = vmul.f32 0.2, %v934_v31  ;;  %v937_v38 = vadd.f32 %v1431_v21, %v776_v34  ;;  %v1346_v39 = vpop.f32.mrb[32].mxu0  ;;  %v1434_v40 = vpop.f32.mrb[32].mxu1 }
 0x13a   : > { %v1081_v41 = vsel %vm1017_vm14, %v929_v29, %v1049_v30  ;;  %v1347_v42 = vpop.f32.mrb[33].mxu0  ;;  %v941_v43 = vpop.f32.mrb[33].mxu1 }
 0x13b   : > { %v1082_v36 = vsel %vm1018_vm15, %v934_v31, %v1050_v35  ;;  %vm1019_vm0 = vcmp.ge.f32.partialorder %v937_v38, 0.0  ;;  %v1051_v45 = vmul.f32 0.2, %v937_v38  ;;  %1113 = vst [vmem:[%s1750_s8 + $0x68] sm:$0xff] %v1081_v41  ;;  %v1348_v46 = vadd.f32 %v1347_v42, %v1346_v39  ;;  %v1349_v47 = vpop.f32.mrb[34].mxu0  ;;  %v1435_v48 = vpop.f32.mrb[34].mxu1 }
 0x13c   : > { %1114 = vst [vmem:[%s1750_s8 + $0x70] sm:$0xff] %v1082_v36  ;;  %v1350_v51 = vpop.f32.mrb[35].mxu0  ;;  %v944_v52 = vpop.f32.mrb[35].mxu1 }
 0x13d   : > { %v1083_v53 = vsel %vm1019_vm0, %v937_v38, %v1051_v45  ;;  %v781_v54 = vadd.f32 %v1348_v46, %v1738_v50  ;;  %v1351_v55 = vadd.f32 %v1350_v51, %v1349_v47  ;;  %v837_v47 = vadd.f32 %v1731_v44, %v1738_v50 }
 0x13e   : > { %1115 = vst [vmem:[%s1750_s8 + $0x78] sm:$0xff] %v1083_v53  ;;  %v840_v44 = vadd.f32 %v1733_v49, %v1738_v50 }
 0x13f   : > { %v942_v56 = vadd.f32 %v941_v43, %v781_v54  ;;  %v784_v57 = vadd.f32 %v1351_v55, %v1738_v50 }
 0x141   : > { %vm1020_vm1 = vcmp.ge.f32.partialorder %v942_v56, 0.0  ;;  %v1052_v58 = vmul.f32 0.2, %v942_v56  ;;  %v945_v60 = vadd.f32 %v944_v52, %v784_v57  ;;  %v1352_v61 = vpop.f32.mrb[36].mxu0  ;;  %v1784_v62 = vpop.f32.mrb[36].mxu1 }
 0x142   : > { %v1353_v63 = vpop.f32.mrb[37].mxu0  ;;  %v957_v0 = vpop.f32.mrb[37].mxu1 }
 0x143   : > { %v1084_v59 = vsel %vm1020_vm1, %v942_v56, %v1052_v58  ;;  %vm1021_vm2 = vcmp.ge.f32.partialorder %v945_v60, 0.0  ;;  %v1053_v1 = vmul.f32 0.2, %v945_v60  ;;  %v1354_v2 = vadd.f32 %v1353_v63, %v1352_v61  ;;  %v1355_v3 = vpop.f32.mrb[38].mxu0  ;;  %v1786_v4 = vpop.f32.mrb[38].mxu1 }
 0x144   : > { %1116 = vst [vmem:[%s1750_s8 + $0x80] sm:$0xff] %v1084_v59  ;;  %v1356_v6 = vpop.f32.mrb[39].mxu0  ;;  %v960_v7 = vpop.f32.mrb[39].mxu1 }
 0x145   : > { %v1085_v9 = vsel %vm1021_vm2, %v945_v60, %v1053_v1  ;;  %v789_v5 = vadd.f32 %v1354_v2, %v1738_v50  ;;  %v1357_v10 = vadd.f32 %v1356_v6, %v1355_v3 }
 0x146   : > { %1117 = vst [vmem:[%s1750_s8 + $0x88] sm:$0xff] %v1085_v9 }
 0x147   : > { %v950_v11 = vadd.f32 %v1434_v40, %v789_v5  ;;  %v792_v12 = vadd.f32 %v1357_v10, %v1738_v50 }
 0x149   : > { %vm1022_vm3 = vcmp.ge.f32.partialorder %v950_v11, 0.0  ;;  %v1054_v15 = vmul.f32 0.2, %v950_v11  ;;  %v953_v16 = vadd.f32 %v1435_v48, %v792_v12  ;;  %v1358_v17 = vpop.f32.mrb[40].mxu0  ;;  %v1442_v18 = vpop.f32.mrb[40].mxu1  ;;  %v829_v48 = vadd.f32 %v1725_v32, %v1738_v50 }
 0x14a   : > { %v982_v19 = vadd.f32 %v1442_v18, %v821_v14  ;;  %v1359_v21 = vpop.f32.mrb[41].mxu0  ;;  %v973_v23 = vpop.f32.mrb[41].mxu1  ;;  %v832_v32 = vadd.f32 %v1729_v37, %v1738_v50 }
 0x14b   : > { %v1086_v27 = vsel %vm1022_vm3, %v950_v11, %v1054_v15  ;;  %vm1023_vm4 = vcmp.ge.f32.partialorder %v953_v16, 0.0  ;;  %v1055_v20 = vmul.f32 0.2, %v953_v16  ;;  %v1360_v28 = vadd.f32 %v1359_v21, %v1358_v17  ;;  %v1361_v29 = vpop.f32.mrb[42].mxu0  ;;  %v1443_v31 = vpop.f32.mrb[42].mxu1 }
 0x14c   : > { %1118 = vst [vmem:[%s1750_s8 + $0x90] sm:$0xff] %v1086_v27  ;;  %vm1030_vm5 = vcmp.ge.f32.partialorder %v982_v19, 0.0  ;;  %v1062_v33 = vmul.f32 0.2, %v982_v19  ;;  %v974_v34 = vadd.f32 %v973_v23, %v813_v22  ;;  %v985_v8 = vadd.f32 %v1443_v31, %v824_v24  ;;  %v1362_v30 = vpop.f32.mrb[43].mxu0  ;;  %v976_v35 = vpop.f32.mrb[43].mxu1 }
 0x14d   : > { %v1087_v38 = vsel %vm1023_vm4, %v953_v16, %v1055_v20  ;;  %v797_v25 = vadd.f32 %v1360_v28, %v1738_v50  ;;  %v1363_v39 = vadd.f32 %v1362_v30, %v1361_v29  ;;  %v977_v13 = vadd.f32 %v976_v35, %v816_v26 }
 0x14e   : > { %1119 = vst [vmem:[%s1750_s8 + $0x98] sm:$0xff] %v1087_v38  ;;  %v1094_v40 = vsel %vm1030_vm5, %v982_v19, %v1062_v33  ;;  %vm1028_vm6 = vcmp.ge.f32.partialorder %v974_v34, 0.0  ;;  %v1060_v41 = vmul.f32 0.2, %v974_v34  ;;  %vm1031_vm7 = vcmp.ge.f32.partialorder %v985_v8, 0.0 }
 0x14f   : > { %1126 = vst [vmem:[%s1750_s8 + $0xd0] sm:$0xff] %v1094_v40  ;;  %v958_v42 = vadd.f32 %v957_v0, %v797_v25  ;;  %v1063_v43 = vmul.f32 0.2, %v985_v8  ;;  %v800_v36 = vadd.f32 %v1363_v39, %v1738_v50  ;;  %vm1029_vm8 = vcmp.ge.f32.partialorder %v977_v13, 0.0 }
 0x150   : > { %v1092_v45 = vsel %vm1028_vm6, %v974_v34, %v1060_v41  ;;  %v1061_v46 = vmul.f32 0.2, %v977_v13 }
 0x151   : > { %vm1024_vm9 = vcmp.ge.f32.partialorder %v958_v42, 0.0  ;;  %v1056_v51 = vmul.f32 0.2, %v958_v42  ;;  %1124 = vst [vmem:[%s1750_s8 + $0xc0] sm:$0xff] %v1092_v45  ;;  %v1095_v52 = vsel %vm1031_vm7, %v985_v8, %v1063_v43  ;;  %v961_v53 = vadd.f32 %v960_v7, %v800_v36  ;;  %v1364_v54 = vpop.f32.mrb[44].mxu0  ;;  %v1446_v55 = vpop.f32.mrb[44].mxu1 }
 0x152   : > { %1127 = vst [vmem:[%s1750_s8 + $0xd8] sm:$0xff] %v1095_v52  ;;  %v1093_v56 = vsel %vm1029_vm8, %v977_v13, %v1061_v46  ;;  %v998_v57 = vadd.f32 %v1446_v55, %v837_v47  ;;  %v1365_v58 = vpop.f32.mrb[45].mxu0  ;;  %v989_v60 = vpop.f32.mrb[45].mxu1 }
 0x153   : > { %v1088_v61 = vsel %vm1024_vm9, %v958_v42, %v1056_v51  ;;  %vm1025_vm10 = vcmp.ge.f32.partialorder %v961_v53, 0.0  ;;  %v1057_v63 = vmul.f32 0.2, %v961_v53  ;;  %1125 = vst [vmem:[%s1750_s8 + $0xc8] sm:$0xff] %v1093_v56  ;;  %v1366_v0 = vadd.f32 %v1365_v58, %v1364_v54  ;;  %v1367_v59 = vpop.f32.mrb[46].mxu0  ;;  %v1447_v1 = vpop.f32.mrb[46].mxu1 }
 0x154   : > { %1120 = vst [vmem:[%s1750_s8 + $0xa0] sm:$0xff] %v1088_v61  ;;  %vm1034_vm11 = vcmp.ge.f32.partialorder %v998_v57, 0.0  ;;  %v1066_v2 = vmul.f32 0.2, %v998_v57  ;;  %v990_v3 = vadd.f32 %v989_v60, %v829_v48  ;;  %v1001_v6 = vadd.f32 %v1447_v1, %v840_v44  ;;  %v1368_v7 = vpop.f32.mrb[47].mxu0  ;;  %v992_v9 = vpop.f32.mrb[47].mxu1 }
 0x155   : > { %v1089_v49 = vsel %vm1025_vm10, %v961_v53, %v1057_v63  ;;  %v805_v5 = vadd.f32 %v1366_v0, %v1738_v50  ;;  %v1369_v37 = vadd.f32 %v1368_v7, %v1367_v59  ;;  %v993_v10 = vadd.f32 %v992_v9, %v832_v32 }
 0x156   : > { %1121 = vst [vmem:[%s1750_s8 + $0xa8] sm:$0xff] %v1089_v49  ;;  %v1098_v11 = vsel %vm1034_vm11, %v998_v57, %v1066_v2  ;;  %vm1032_vm12 = vcmp.ge.f32.partialorder %v990_v3, 0.0  ;;  %v1064_v12 = vmul.f32 0.2, %v990_v3  ;;  %vm1035_vm13 = vcmp.ge.f32.partialorder %v1001_v6, 0.0 }
 0x157   : > { %1130 = vst [vmem:[%s1750_s8 + $0xf0] sm:$0xff] %v1098_v11  ;;  %v966_v14 = vadd.f32 %v1784_v62, %v805_v5  ;;  %v1067_v15 = vmul.f32 0.2, %v1001_v6  ;;  %v808_v16 = vadd.f32 %v1369_v37, %v1738_v50  ;;  %vm1033_vm14 = vcmp.ge.f32.partialorder %v993_v10, 0.0 }
 0x158   : > { %v1096_v17 = vsel %vm1032_vm12, %v990_v3, %v1064_v12  ;;  %v1065_v18 = vmul.f32 0.2, %v993_v10 }
 0x159   : > { %vm1026_vm15 = vcmp.ge.f32.partialorder %v966_v14, 0.0  ;;  %v1058_v19 = vmul.f32 0.2, %v966_v14  ;;  %1128 = vst [vmem:[%s1750_s8 + $0xe0] sm:$0xff] %v1096_v17  ;;  %v1099_v21 = vsel %vm1035_vm13, %v1001_v6, %v1067_v15  ;;  %v969_v22 = vadd.f32 %v1786_v4, %v808_v16 }
 0x15a   : > { %1131 = vst [vmem:[%s1750_s8 + $0xf8] sm:$0xff] %v1099_v21  ;;  %v1097_v23 = vsel %vm1033_vm14, %v993_v10, %v1065_v18 }
 0x15b   : > { %v1090_v24 = vsel %vm1026_vm15, %v966_v14, %v1058_v19  ;;  %vm1027_vm0 = vcmp.ge.f32.partialorder %v969_v22, 0.0  ;;  %v1059_v62 = vmul.f32 0.2, %v969_v22  ;;  %1129 = vst [vmem:[%s1750_s8 + $0xe8] sm:$0xff] %v1097_v23 }
 0x15c   : > { %1122 = vst [vmem:[%s1750_s8 + $0xb0] sm:$0xff] %v1090_v24 }
 0x15d   : > { %v1091_v26 = vsel %vm1027_vm0, %v969_v22, %v1059_v62 }
 0x15e   : > { %1123 = vst [vmem:[%s1750_s8 + $0xb8] sm:$0xff] %v1091_v26 }
 0x15f PF: > { %s13_s12 = sadd.s32 1, %s1561_s12  }
 0x160   : > { %p10_p4 = scmp.ge.s32.totalorder %s13_s12, 4  }
 0x162   :  { %12 = sbr.rel (!%p10_p4) target bundleno = 1 (0x1), region = 62 }

// kernel: residual_dense_block.6
= control target key start
LH: loop header
LB: loop body
LE: loop exit
PB: predicated region body
PF: predicated region fallthrough
CT: control target
= control target key end

     0   :  { %s1718_s12 = smov 0   ;;  %s1984_s0 = inlined_call_operand.vmem [shape: bf16[512,432], index: 0, kind: input, shape index: {}]   ;;  %s1985_s1 = inlined_call_operand.vmem [shape: bf16[432,128], index: 1, kind: input, shape index: {}]   ;;  %s1986_s2 = inlined_call_operand.vmem [shape: f32[1,128], index: 2, kind: input, shape index: {}]   ;;  %s1987_s3 = inlined_call_operand.vmem [shape: f32[512,128], index: 3, kind: output, shape index: {}]  }
   0x1 LB: > { %s1324_s13 = sadd.s32 4294967295, %s1695_s12   ;;  %p1328_p0 = scmp.ge.s32.totalorder %s1695_s12, 1  ;;  %s1695_s12 = sphi %s1718_s12, %s13_s12  }
   0x2   : > { %p139_p1 = scmp.lt.s32.totalorder %s1695_s12, 3 }
   0x4   : > { %p140_p2 = pnand %p1328_p0, %p139_p1 }
   0x5   : > { %v1566_v0 = vld [vmem:[%s1985_s1 + $0x80] sm:$0xff] (!%p140_p2)   ;;  %v1697_v1 = vmov (!%p140_p2), 0   ;;  %v1569_v4 = vld [vmem:[%s1985_s1 + $0x88] sm:$0xff] (!%p140_p2)   ;;  %v1572_v7 = vld [vmem:[%s1985_s1 + $0x90] sm:$0xff] (!%p140_p2)   ;;  %s1329_s7 = sshll.u32 (!%p140_p2), %s1324_s13, 5  ;;  %vm769_vm0 = vcmask (!%p140_p2), 392192  }
   0x6   : > { %143 = sbr.rel (%p140_p2) target bundleno = 390 (0x186), region = 32  ;;  %979 = vmatprep.subr.bf16.mxu1 (!%p140_p2), %v1697_v1  ;;  %v1567_v2 = vld [vmem:[%s1985_s1 + $0x40] sm:$0xff] (!%p140_p2)   ;;  %v1570_v5 = vld [vmem:[%s1985_s1 + $0x48] sm:$0xff] (!%p140_p2)   ;;  %v1573_v8 = vld [vmem:[%s1985_s1 + $0x50] sm:$0xff] (!%p140_p2)   ;;  %p165_p3 = scmp.lt.s32.totalorder (!%p140_p2), %s1329_s7, 63 }
   0x7   : > { %980 = vmatpush1.bf16.msra.mxu1 (!%p140_p2), %v1566_v0  ;;  %v1568_v3 = vld [vmem:[%s1985_s1] sm:$0xff] (!%p140_p2)   ;;  %1445 = vmatprep.subr.bf16.mxu0 (!%p140_p2), %v1567_v2  ;;  %v1571_v6 = vld [vmem:[%s1985_s1 + $0x8] sm:$0xff] (!%p140_p2)   ;;  %v1574_v9 = vld [vmem:[%s1985_s1 + $0x10] sm:$0xff] (!%p140_p2)  }
   0x8   : > { %981 = vmatprep.subr.bf16.mxu1 (!%p140_p2), %v1697_v1  ;;  %1446 = vmatpush3.bf16.msra.mxu0 (!%p140_p2), %v1568_v3  ;;  %v1575_v10 = vld [vmem:[%s1985_s1 + $0x98] sm:$0xff] (!%p140_p2)   ;;  %v1579_v13 = vld [vmem:[%s1985_s1 + $0x60] sm:$0xff] (!%p140_p2)   ;;  %v1582_v16 = vld [vmem:[%s1985_s1 + $0x68] sm:$0xff] (!%p140_p2)  }
   0x9   : > { %1447 = vmatprep.subr.bf16.mxu0 (!%p140_p2), %v1570_v5  ;;  %v1576_v11 = vld [vmem:[%s1985_s1 + $0x58] sm:$0xff] (!%p140_p2)   ;;  %v1578_v14 = vld [vmem:[%s1985_s1 + $0xa0] sm:$0xff] (!%p140_p2)   ;;  %v1581_v17 = vld [vmem:[%s1985_s1 + $0xa8] sm:$0xff] (!%p140_p2)  }
   0xa   : > { %v1577_v12 = vld [vmem:[%s1985_s1 + $0x18] sm:$0xff] (!%p140_p2)   ;;  %v1580_v15 = vld [vmem:[%s1985_s1 + $0x20] sm:$0xff] (!%p140_p2)   ;;  %v1583_v18 = vld [vmem:[%s1985_s1 + $0x28] sm:$0xff] (!%p140_p2)  }
   0xb   : > { %982 = vmatpush1.bf16.msra.mxu1 (!%p140_p2), %v1569_v4  ;;  %v1585_v19 = vld [vmem:[%s1985_s1 + $0x70] sm:$0xff] (!%p140_p2)   ;;  %v1587_v22 = vld [vmem:[%s1985_s1 + $0xb8] sm:$0xff] (!%p140_p2)   ;;  %v1590_v26 = vld [vmem:[%s1985_s1 + $0xc0] sm:$0xff] (!%p140_p2)  }
   0xc   : > { %983 = vmatprep.subr.bf16.mxu1 (!%p140_p2), %v1697_v1  ;;  %1448 = vmatpush3.bf16.msra.mxu0 (!%p140_p2), %v1571_v6  ;;  %v1584_v20 = vld [vmem:[%s1985_s1 + $0xb0] sm:$0xff] (!%p140_p2)   ;;  %v1588_v23 = vld [vmem:[%s1985_s1 + $0x78] sm:$0xff] (!%p140_p2)   ;;  %v1594_v30 = vld [vmem:[%s1985_s1 + $0xc8] sm:$0xff] (!%p140_p2)  }
   0xd   : > { %1449 = vmatprep.subr.bf16.mxu0 %v1573_v8  ;;  %s1989_s7 = smov (!%p165_p3, %s1329_s7), 63  ;;  %v1586_v21 = vld [vmem:[%s1985_s1 + $0x30] sm:$0xff]   ;;  %v1589_v25 = vld [vmem:[%s1985_s1 + $0x38] sm:$0xff]  }
   0xe   : > { %s1444_s25 = sshll.u32 %s1989_s7, 4  ;;  %v1595_v31 = vld [vmem:[%s1985_s1 + $0xd0] sm:$0xff]   ;;  %s1333_s24 = sshll.u32 %s1989_s7, 3 }
   0xf   : > { %984 = vmatpush1.bf16.msra.mxu1 %v1572_v7  ;;  %s1802_s8 = scalar_lea.vmem %s1984_s0, %s1444_s25  ;;  %s1917_s27 = scalar_lea.vmem %s1987_s3, %s1333_s24 }
  0x10   : > { %985 = vmatprep.subr.bf16.mxu1 %v1697_v1  ;;  %1450 = vmatpush3.bf16.msra.mxu0 %v1574_v9  ;;  %v1593_v24 = vld [vmem:[%s1802_s8 + $0x4] ss:$16 sps:$4 sm:$0xff]   ;;  %v1600_v27 = vld [vmem:[%s1802_s8 + $0xc] ss:$16 sps:$4 sm:$0xff]   ;;  %v1591_v28 = vld [vmem:[%s1802_s8] ss:$16 sps:$4 sm:$0xff]  }
  0x11   : > { %1451 = vmatprep.subr.bf16.mxu0 %v1576_v11  ;;  %850 = vmatprep.mubr.bf16.mxu0 %v1593_v24  ;;  %v1596_v29 = vld [vmem:[%s1802_s8 + $0x24] ss:$16 sps:$4 sm:$0xff]   ;;  %v1601_v32 = vld [vmem:[%s1802_s8 + $0x20] ss:$16 sps:$4 sm:$0xff]   ;;  %v1598_v34 = vld [vmem:[%s1802_s8 + $0x8] ss:$16 sps:$4 sm:$0xff]  }
  0x12   : > { %1426 = vmatprep.mubr.msk.bf16.mxu1 %vm769_vm0, %v1600_v27  ;;  %v1602_v33 = vld [vmem:[%s1802_s8 + $0x44] ss:$16 sps:$4 sm:$0xff]   ;;  %v1604_v35 = vld [vmem:[%s1802_s8 + $0x2c] ss:$16 sps:$4 sm:$0xff]   ;;  %v1606_v36 = vld [vmem:[%s1802_s8 + $0x40] ss:$16 sps:$4 sm:$0xff]  }
  0x13   : > { %986 = vmatpush1.bf16.msra.mxu1 %v1575_v10  ;;  %v1608_v37 = vld [vmem:[%s1802_s8 + $0x64] ss:$16 sps:$4 sm:$0xff]   ;;  %v1607_v38 = vld [vmem:[%s1802_s8 + $0x28] ss:$16 sps:$4 sm:$0xff]   ;;  %v1610_v39 = vld [vmem:[%s1802_s8 + $0x4c] ss:$16 sps:$4 sm:$0xff]  }
  0x14   : > { %987 = vmatprep.subr.bf16.mxu1 %v1697_v1  ;;  %1452 = vmatpush3.bf16.msra.mxu0 %v1577_v12  ;;  %v1612_v40 = vld [vmem:[%s1802_s8 + $0x60] ss:$16 sps:$4 sm:$0xff]   ;;  %v1614_v41 = vld [vmem:[%s1802_s8 + $0x84] ss:$16 sps:$4 sm:$0xff]   ;;  %v1613_v42 = vld [vmem:[%s1802_s8 + $0x48] ss:$16 sps:$4 sm:$0xff]  }
  0x15   : > { %1453 = vmatprep.subr.bf16.mxu0 %v1579_v13  ;;  %v1616_v43 = vld [vmem:[%s1802_s8 + $0x6c] ss:$16 sps:$4 sm:$0xff]   ;;  %v1618_v44 = vld [vmem:[%s1802_s8 + $0x80] ss:$16 sps:$4 sm:$0xff]   ;;  %v1620_v45 = vld [vmem:[%s1802_s8 + $0xa4] ss:$16 sps:$4 sm:$0xff]  }
  0x16   : > { %v1619_v46 = vld [vmem:[%s1802_s8 + $0x68] ss:$16 sps:$4 sm:$0xff]   ;;  %v1622_v47 = vld [vmem:[%s1802_s8 + $0x8c] ss:$16 sps:$4 sm:$0xff]   ;;  %v1624_v48 = vld [vmem:[%s1802_s8 + $0xa0] ss:$16 sps:$4 sm:$0xff]  }
  0x17   : > { %988 = vmatpush1.bf16.msra.mxu1 %v1578_v14  ;;  %v1626_v49 = vld [vmem:[%s1802_s8 + $0xc4] ss:$16 sps:$4 sm:$0xff]   ;;  %v1625_v50 = vld [vmem:[%s1802_s8 + $0x88] ss:$16 sps:$4 sm:$0xff]   ;;  %v1628_v51 = vld [vmem:[%s1802_s8 + $0xac] ss:$16 sps:$4 sm:$0xff]  }
  0x18   : > { %989 = vmatprep.subr.bf16.mxu1 %v1697_v1  ;;  %1454 = vmatpush3.bf16.msra.mxu0 %v1580_v15  ;;  %v1630_v52 = vld [vmem:[%s1802_s8 + $0xc0] ss:$16 sps:$4 sm:$0xff]   ;;  %v1632_v53 = vld [vmem:[%s1802_s8 + $0xe4] ss:$16 sps:$4 sm:$0xff]   ;;  %v1631_v54 = vld [vmem:[%s1802_s8 + $0xa8] ss:$16 sps:$4 sm:$0xff]  }
  0x19   : > { %1455 = vmatprep.subr.bf16.mxu0 %v1582_v16  ;;  %v1634_v55 = vld [vmem:[%s1802_s8 + $0xcc] ss:$16 sps:$4 sm:$0xff]   ;;  %v1636_v56 = vld [vmem:[%s1802_s8 + $0xe0] ss:$16 sps:$4 sm:$0xff]   ;;  %v1638_v57 = vld [vmem:[%s1802_s8 + $0x104] ss:$16 sps:$4 sm:$0xff]  }
  0x1a   : > { %v1637_v58 = vld [vmem:[%s1802_s8 + $0xc8] ss:$16 sps:$4 sm:$0xff]   ;;  %v1640_v59 = vld [vmem:[%s1802_s8 + $0xec] ss:$16 sps:$4 sm:$0xff]   ;;  %v1642_v60 = vld [vmem:[%s1802_s8 + $0x100] ss:$16 sps:$4 sm:$0xff]  }
  0x1b   : > { %990 = vmatpush1.bf16.msra.mxu1 %v1581_v17  ;;  %v1644_v61 = vld [vmem:[%s1802_s8 + $0x124] ss:$16 sps:$4 sm:$0xff]   ;;  %v1643_v62 = vld [vmem:[%s1802_s8 + $0xe8] ss:$16 sps:$4 sm:$0xff]   ;;  %v1646_v63 = vld [vmem:[%s1802_s8 + $0x10c] ss:$16 sps:$4 sm:$0xff]  }
  0x1c   : > { %991 = vmatprep.subr.bf16.mxu1 %v1697_v1  ;;  %1456 = vmatpush3.bf16.msra.mxu0 %v1583_v18  ;;  %v1648_v0 = vld [vmem:[%s1802_s8 + $0x120] ss:$16 sps:$4 sm:$0xff]   ;;  %v1649_v2 = vld [vmem:[%s1802_s8 + $0x108] ss:$16 sps:$4 sm:$0xff]   ;;  %v1652_v3 = vld [vmem:[%s1802_s8 + $0x12c] ss:$16 sps:$4 sm:$0xff]  }
  0x1d   : > { %1457 = vmatprep.subr.bf16.mxu0 %v1585_v19  ;;  %v1654_v4 = vld [vmem:[%s1802_s8 + $0x140] ss:$16 sps:$4 sm:$0xff]   ;;  %v1656_v5 = vld [vmem:[%s1802_s8 + $0x164] ss:$16 sps:$4 sm:$0xff]   ;;  %v1655_v6 = vld [vmem:[%s1802_s8 + $0x128] ss:$16 sps:$4 sm:$0xff]  }
  0x1e   : > { %v1658_v7 = vld [vmem:[%s1802_s8 + $0x14c] ss:$16 sps:$4 sm:$0xff]   ;;  %v1660_v8 = vld [vmem:[%s1802_s8 + $0x160] ss:$16 sps:$4 sm:$0xff]   ;;  %v1662_v9 = vld [vmem:[%s1802_s8 + $0x184] ss:$16 sps:$4 sm:$0xff]  }
  0x1f   : > { %992 = vmatpush1.bf16.msra.mxu1 %v1584_v20  ;;  %v1661_v10 = vld [vmem:[%s1802_s8 + $0x148] ss:$16 sps:$4 sm:$0xff]   ;;  %v1664_v11 = vld [vmem:[%s1802_s8 + $0x16c] ss:$16 sps:$4 sm:$0xff]   ;;  %v1666_v12 = vld [vmem:[%s1802_s8 + $0x180] ss:$16 sps:$4 sm:$0xff]  }
  0x20   : > { %993 = vmatprep.subr.bf16.mxu1 %v1697_v1  ;;  %1458 = vmatpush3.bf16.msra.mxu0 %v1586_v21  ;;  %v1668_v13 = vld [vmem:[%s1802_s8 + $0x1a4] ss:$16 sps:$4 sm:$0xff]   ;;  %v1667_v14 = vld [vmem:[%s1802_s8 + $0x168] ss:$16 sps:$4 sm:$0xff]   ;;  %v1670_v15 = vld [vmem:[%s1802_s8 + $0x18c] ss:$16 sps:$4 sm:$0xff]  }
  0x21   : > { %1459 = vmatprep.subr.bf16.mxu0 %v1588_v23  ;;  %v1672_v16 = vld [vmem:[%s1802_s8 + $0x1a0] ss:$16 sps:$4 sm:$0xff]   ;;  %v1674_v17 = vld [vmem:[%s1802_s8 + $0x1c4] ss:$16 sps:$4 sm:$0xff]   ;;  %v1673_v18 = vld [vmem:[%s1802_s8 + $0x188] ss:$16 sps:$4 sm:$0xff]  }
  0x22   : > { %v1676_v19 = vld [vmem:[%s1802_s8 + $0x1ac] ss:$16 sps:$4 sm:$0xff]   ;;  %v1678_v20 = vld [vmem:[%s1802_s8 + $0x1c0] ss:$16 sps:$4 sm:$0xff]   ;;  %v1680_v21 = vld [vmem:[%s1802_s8 + $0x1e4] ss:$16 sps:$4 sm:$0xff]  }
  0x23   : > { %994 = vmatpush1.bf16.msra.mxu1 %v1587_v22  ;;  %v1679_v22 = vld [vmem:[%s1802_s8 + $0x1a8] ss:$16 sps:$4 sm:$0xff]   ;;  %v1682_v23 = vld [vmem:[%s1802_s8 + $0x1cc] ss:$16 sps:$4 sm:$0xff]   ;;  %v1684_v24 = vld [vmem:[%s1802_s8 + $0x1e0] ss:$16 sps:$4 sm:$0xff]  }
  0x24   : > { %995 = vmatprep.subr.bf16.mxu1 %v1697_v1  ;;  %1460 = vmatpush3.bf16.msra.mxu0 %v1589_v25  ;;  %v1685_v25 = vld [vmem:[%s1802_s8 + $0x1c8] ss:$16 sps:$4 sm:$0xff]  }
  0x25   : > { %v1688_v27 = vld [vmem:[%s1802_s8 + $0x1e8] ss:$16 sps:$4 sm:$0xff]  }
  0x27   : > { %996 = vmatpush1.bf16.msra.mxu1 %v1590_v26  ;;  %851 = vmatmul.mubr.bf16.vlgmr.msra.gmra.mrb[0].mxu0 %v1591_v28  ;;  %v1686_v26 = vld [vmem:[%s1802_s8 + $0x1ec] ss:$16 sps:$4 sm:$0xff]  }
  0x28   : > { %997 = vmatprep.subr.bf16.mxu1 %v1697_v1  ;;  %858 = vmatprep.mubr.bf16.mxu0 %v1596_v29 }
  0x2b   : > { %998 = vmatpush1.bf16.msra.mxu1 %v1594_v30 }
  0x2c   : > { %999 = vmatprep.subr.bf16.mxu1 %v1697_v1  ;;  %v1650_v1 = vld [vmem:[%s1802_s8 + $0x144] ss:$16 sps:$4 sm:$0xff]  }
  0x2f   : > { %1000 = vmatpush1.bf16.msra.mxu1 %v1595_v31  ;;  %859 = vmatmul.mubr.bf16.gmra.mrb[4].mxu0 %v1601_v32 }
  0x30   : > { %866 = vmatprep.mubr.bf16.mxu0 %v1602_v33 }
  0x32   : > { %1012 = vmatmul.mubr.bf16.vlgmr.msra.gmra.mrb[0].mxu1 %v1598_v34  ;;  %v1909_v34 = vld [vmem:[%s1986_s2] ss:$0 sm:$0xff] }
  0x33   : > { %1427 = vmatprep.mubr.msk.bf16.mxu1 %vm769_vm0, %v1604_v35 }
  0x37   : > { %867 = vmatmul.mubr.bf16.gmra.mrb[8].mxu0 %v1606_v36 }
  0x38   : > { %874 = vmatprep.mubr.bf16.mxu0 %v1608_v37 }
  0x3a   : > { %1020 = vmatmul.mubr.bf16.gmra.mrb[4].mxu1 %v1607_v38 }
  0x3b   : > { %1428 = vmatprep.mubr.msk.bf16.mxu1 %vm769_vm0, %v1610_v39 }
  0x3f   : > { %875 = vmatmul.mubr.bf16.gmra.mrb[12].mxu0 %v1612_v40 }
  0x40   : > { %882 = vmatprep.mubr.bf16.mxu0 %v1614_v41 }
  0x42   : > { %1028 = vmatmul.mubr.bf16.gmra.mrb[8].mxu1 %v1613_v42 }
  0x43   : > { %1429 = vmatprep.mubr.msk.bf16.mxu1 %vm769_vm0, %v1616_v43 }
  0x47   : > { %883 = vmatmul.mubr.bf16.gmra.mrb[16].mxu0 %v1618_v44 }
  0x48   : > { %890 = vmatprep.mubr.bf16.mxu0 %v1620_v45 }
  0x4a   : > { %1036 = vmatmul.mubr.bf16.gmra.mrb[12].mxu1 %v1619_v46 }
  0x4b   : > { %1430 = vmatprep.mubr.msk.bf16.mxu1 %vm769_vm0, %v1622_v47 }
  0x4f   : > { %891 = vmatmul.mubr.bf16.gmra.mrb[20].mxu0 %v1624_v48 }
  0x50   : > { %898 = vmatprep.mubr.bf16.mxu0 %v1626_v49 }
  0x52   : > { %1044 = vmatmul.mubr.bf16.gmra.mrb[16].mxu1 %v1625_v50 }
  0x53   : > { %1431 = vmatprep.mubr.msk.bf16.mxu1 %vm769_vm0, %v1628_v51 }
  0x57   : > { %899 = vmatmul.mubr.bf16.gmra.mrb[24].mxu0 %v1630_v52 }
  0x58   : > { %906 = vmatprep.mubr.bf16.mxu0 %v1632_v53 }
  0x5a   : > { %1052 = vmatmul.mubr.bf16.gmra.mrb[20].mxu1 %v1631_v54 }
  0x5b   : > { %1432 = vmatprep.mubr.msk.bf16.mxu1 %vm769_vm0, %v1634_v55 }
  0x5f   : > { %907 = vmatmul.mubr.bf16.gmra.mrb[28].mxu0 %v1636_v56 }
  0x60   : > { %914 = vmatprep.mubr.bf16.mxu0 %v1638_v57 }
  0x62   : > { %1060 = vmatmul.mubr.bf16.gmra.mrb[24].mxu1 %v1637_v58 }
  0x63   : > { %1433 = vmatprep.mubr.msk.bf16.mxu1 %vm769_vm0, %v1640_v59 }
  0x67   : > { %915 = vmatmul.mubr.bf16.gmra.mrb[32].mxu0 %v1642_v60 }
  0x68   : > { %922 = vmatprep.mubr.bf16.mxu0 %v1644_v61 }
  0x6a   : > { %1068 = vmatmul.mubr.bf16.gmra.mrb[28].mxu1 %v1643_v62 }
  0x6b   : > { %1434 = vmatprep.mubr.msk.bf16.mxu1 %vm769_vm0, %v1646_v63 }
  0x6f   : > { %923 = vmatmul.mubr.bf16.gmra.mrb[36].mxu0 %v1648_v0 }
  0x70   : > { %930 = vmatprep.mubr.bf16.mxu0 %v1650_v1 }
  0x72   : > { %1076 = vmatmul.mubr.bf16.gmra.mrb[32].mxu1 %v1649_v2 }
  0x73   : > { %1435 = vmatprep.mubr.msk.bf16.mxu1 %vm769_vm0, %v1652_v3 }
  0x77   : > { %931 = vmatmul.mubr.bf16.gmra.mrb[40].mxu0 %v1654_v4 }
  0x78   : > { %938 = vmatprep.mubr.bf16.mxu0 %v1656_v5 }
  0x7a   : > { %1084 = vmatmul.mubr.bf16.gmra.mrb[36].mxu1 %v1655_v6 }
  0x7b   : > { %1436 = vmatprep.mubr.msk.bf16.mxu1 %vm769_vm0, %v1658_v7 }
  0x7f   : > { %939 = vmatmul.mubr.bf16.gmra.mrb[44].mxu0 %v1660_v8 }
  0x80   : > { %946 = vmatprep.mubr.bf16.mxu0 %v1662_v9 }
  0x82   : > { %1092 = vmatmul.mubr.bf16.gmra.mrb[40].mxu1 %v1661_v10 }
  0x83   : > { %1437 = vmatprep.mubr.msk.bf16.mxu1 %vm769_vm0, %v1664_v11 }
  0x87   : > { %947 = vmatmul.mubr.bf16.gmra.mrb[48].mxu0 %v1666_v12 }
  0x88   : > { %954 = vmatprep.mubr.bf16.mxu0 %v1668_v13 }
  0x8a   : > { %1100 = vmatmul.mubr.bf16.gmra.mrb[44].mxu1 %v1667_v14 }
  0x8b   : > { %1438 = vmatprep.mubr.msk.bf16.mxu1 %vm769_vm0, %v1670_v15 }
  0x8f   : > { %955 = vmatmul.mubr.bf16.gmra.mrb[52].mxu0 %v1672_v16 }
  0x90   : > { %962 = vmatprep.mubr.bf16.mxu0 %v1674_v17 }
  0x92   : > { %1108 = vmatmul.mubr.bf16.gmra.mrb[48].mxu1 %v1673_v18 }
  0x93   : > { %1439 = vmatprep.mubr.msk.bf16.mxu1 %vm769_vm0, %v1676_v19 }
  0x97   : > { %963 = vmatmul.mubr.bf16.gmra.mrb[56].mxu0 %v1678_v20 }
  0x98   : > { %970 = vmatprep.mubr.bf16.mxu0 %v1680_v21 }
  0x9a   : > { %1116 = vmatmul.mubr.bf16.gmra.mrb[52].mxu1 %v1679_v22 }
  0x9b   : > { %1440 = vmatprep.mubr.msk.bf16.mxu1 %vm769_vm0, %v1682_v23 }
  0x9f   : > { %971 = vmatmul.mubr.bf16.gmra.mrb[60].mxu0 %v1684_v24 }
  0xa2   : > { %1124 = vmatmul.mubr.bf16.gmra.mrb[56].mxu1 %v1685_v25 }
  0xa3   : > { %1441 = vmatprep.mubr.msk.bf16.mxu1 %vm769_vm0, %v1686_v26 }
  0xaa   : > { %1132 = vmatmul.mubr.bf16.gmra.mrb[60].mxu1 %v1688_v27 }
  0xfa   : > { %v1461_v28 = vpop.f32.mrb[0].mxu0 }
  0xfb   : > { %v1462_v29 = vpop.f32.mrb[1].mxu0 }
  0xfc   : > { %v1463_v30 = vadd.f32 %v1462_v29, %v1461_v28  ;;  %v1464_v31 = vpop.f32.mrb[2].mxu0 }
  0xfd   : > { %v1465_v32 = vpop.f32.mrb[3].mxu0 }
  0xfe   : > { %v1466_v33 = vadd.f32 %v1465_v32, %v1464_v31  ;;  %v853_v35 = vadd.f32 %v1463_v30, %v1909_v34 }
 0x100   : > { %v856_v43 = vadd.f32 %v1466_v33, %v1909_v34 }
 0x102   : > { %v1467_v36 = vpop.f32.mrb[4].mxu0 }
 0x103   : > { %v1468_v37 = vpop.f32.mrb[5].mxu0 }
 0x104   : > { %v1469_v39 = vadd.f32 %v1468_v37, %v1467_v36  ;;  %v1470_v40 = vpop.f32.mrb[6].mxu0 }
 0x105   : > { %v1013_v38 = vpop.f32.mrb[0].mxu1  ;;  %v1471_v44 = vpop.f32.mrb[7].mxu0 }
 0x106   : > { %v1014_v41 = vadd.f32 %v1013_v38, %v853_v35  ;;  %v1015_v42 = vpop.f32.mrb[1].mxu1  ;;  %v1472_v46 = vadd.f32 %v1471_v44, %v1470_v40  ;;  %v861_v52 = vadd.f32 %v1469_v39, %v1909_v34 }
 0x107   : > { %v1016_v45 = vpop.f32.mrb[2].mxu1 }
 0x108   : > { %vm1140_vm1 = vcmp.ge.f32.partialorder %v1014_v41, 0.0  ;;  %v1172_v47 = vmul.f32 0.2, %v1014_v41  ;;  %v1017_v48 = vadd.f32 %v1016_v45, %v856_v43  ;;  %v1018_v49 = vpop.f32.mrb[3].mxu1  ;;  %v864_v61 = vadd.f32 %v1472_v46, %v1909_v34 }
 0x10a   : > { %v1204_v50 = vsel %vm1140_vm1, %v1014_v41, %v1172_v47  ;;  %vm1141_vm2 = vcmp.ge.f32.partialorder %v1017_v48, 0.0  ;;  %v1173_v51 = vmul.f32 0.2, %v1017_v48  ;;  %v1473_v53 = vpop.f32.mrb[8].mxu0 }
 0x10b   : > { %1236 = vst [vmem:[%s1917_s27] sm:$0xff] %v1204_v50  ;;  %v1474_v55 = vpop.f32.mrb[9].mxu0 }
 0x10c   : > { %v1205_v54 = vsel %vm1141_vm2, %v1017_v48, %v1173_v51  ;;  %v1475_v57 = vadd.f32 %v1474_v55, %v1473_v53  ;;  %v1476_v58 = vpop.f32.mrb[10].mxu0 }
 0x10d   : > { %1237 = vst [vmem:[%s1917_s27 + $0x8] sm:$0xff] %v1205_v54  ;;  %v1021_v56 = vpop.f32.mrb[4].mxu1  ;;  %v1477_v62 = vpop.f32.mrb[11].mxu0 }
 0x10e   : > { %v1022_v59 = vadd.f32 %v1021_v56, %v861_v52  ;;  %v1023_v60 = vpop.f32.mrb[5].mxu1  ;;  %v1478_v0 = vadd.f32 %v1477_v62, %v1476_v58  ;;  %v869_v6 = vadd.f32 %v1475_v57, %v1909_v34 }
 0x10f   : > { %v1024_v63 = vpop.f32.mrb[6].mxu1 }
 0x110   : > { %vm1142_vm3 = vcmp.ge.f32.partialorder %v1022_v59, 0.0  ;;  %v1174_v1 = vmul.f32 0.2, %v1022_v59  ;;  %v1025_v2 = vadd.f32 %v1024_v63, %v864_v61  ;;  %v1026_v3 = vpop.f32.mrb[7].mxu1  ;;  %v872_v15 = vadd.f32 %v1478_v0, %v1909_v34 }
 0x112   : > { %v1206_v4 = vsel %vm1142_vm3, %v1022_v59, %v1174_v1  ;;  %vm1143_vm4 = vcmp.ge.f32.partialorder %v1025_v2, 0.0  ;;  %v1175_v5 = vmul.f32 0.2, %v1025_v2  ;;  %v1479_v7 = vpop.f32.mrb[12].mxu0 }
 0x113   : > { %1238 = vst [vmem:[%s1917_s27 + $0x10] sm:$0xff] %v1206_v4  ;;  %v1480_v9 = vpop.f32.mrb[13].mxu0 }
 0x114   : > { %v1207_v8 = vsel %vm1143_vm4, %v1025_v2, %v1175_v5  ;;  %v1481_v11 = vadd.f32 %v1480_v9, %v1479_v7  ;;  %v1482_v12 = vpop.f32.mrb[14].mxu0 }
 0x115   : > { %1239 = vst [vmem:[%s1917_s27 + $0x18] sm:$0xff] %v1207_v8  ;;  %v1029_v10 = vpop.f32.mrb[8].mxu1  ;;  %v1483_v16 = vpop.f32.mrb[15].mxu0 }
 0x116   : > { %v1030_v13 = vadd.f32 %v1029_v10, %v869_v6  ;;  %v1031_v14 = vpop.f32.mrb[9].mxu1  ;;  %v1484_v18 = vadd.f32 %v1483_v16, %v1482_v12  ;;  %v877_v24 = vadd.f32 %v1481_v11, %v1909_v34 }
 0x117   : > { %v1032_v17 = vpop.f32.mrb[10].mxu1 }
 0x118   : > { %vm1144_vm5 = vcmp.ge.f32.partialorder %v1030_v13, 0.0  ;;  %v1176_v19 = vmul.f32 0.2, %v1030_v13  ;;  %v1033_v20 = vadd.f32 %v1032_v17, %v872_v15  ;;  %v1034_v21 = vpop.f32.mrb[11].mxu1  ;;  %v880_v33 = vadd.f32 %v1484_v18, %v1909_v34 }
 0x11a   : > { %v1208_v22 = vsel %vm1144_vm5, %v1030_v13, %v1176_v19  ;;  %vm1145_vm6 = vcmp.ge.f32.partialorder %v1033_v20, 0.0  ;;  %v1177_v23 = vmul.f32 0.2, %v1033_v20  ;;  %v1485_v25 = vpop.f32.mrb[16].mxu0 }
 0x11b   : > { %1240 = vst [vmem:[%s1917_s27 + $0x20] sm:$0xff] %v1208_v22  ;;  %v1486_v27 = vpop.f32.mrb[17].mxu0 }
 0x11c   : > { %v1209_v26 = vsel %vm1145_vm6, %v1033_v20, %v1177_v23  ;;  %v1487_v29 = vadd.f32 %v1486_v27, %v1485_v25  ;;  %v1488_v30 = vpop.f32.mrb[18].mxu0 }
 0x11d   : > { %1241 = vst [vmem:[%s1917_s27 + $0x28] sm:$0xff] %v1209_v26  ;;  %v1037_v28 = vpop.f32.mrb[12].mxu1  ;;  %v1489_v35 = vpop.f32.mrb[19].mxu0 }
 0x11e   : > { %v1038_v31 = vadd.f32 %v1037_v28, %v877_v24  ;;  %v1039_v32 = vpop.f32.mrb[13].mxu1  ;;  %v1490_v37 = vadd.f32 %v1489_v35, %v1488_v30  ;;  %v885_v43 = vadd.f32 %v1487_v29, %v1909_v34 }
 0x11f   : > { %v1040_v36 = vpop.f32.mrb[14].mxu1 }
 0x120   : > { %vm1146_vm7 = vcmp.ge.f32.partialorder %v1038_v31, 0.0  ;;  %v1178_v38 = vmul.f32 0.2, %v1038_v31  ;;  %v1041_v39 = vadd.f32 %v1040_v36, %v880_v33  ;;  %v1042_v40 = vpop.f32.mrb[15].mxu1  ;;  %v888_v52 = vadd.f32 %v1490_v37, %v1909_v34 }
 0x122   : > { %v1210_v41 = vsel %vm1146_vm7, %v1038_v31, %v1178_v38  ;;  %vm1147_vm8 = vcmp.ge.f32.partialorder %v1041_v39, 0.0  ;;  %v1179_v42 = vmul.f32 0.2, %v1041_v39  ;;  %v1491_v44 = vpop.f32.mrb[20].mxu0 }
 0x123   : > { %1242 = vst [vmem:[%s1917_s27 + $0x30] sm:$0xff] %v1210_v41  ;;  %v1492_v46 = vpop.f32.mrb[21].mxu0 }
 0x124   : > { %v1211_v45 = vsel %vm1147_vm8, %v1041_v39, %v1179_v42  ;;  %v1493_v48 = vadd.f32 %v1492_v46, %v1491_v44  ;;  %v1494_v49 = vpop.f32.mrb[22].mxu0 }
 0x125   : > { %1243 = vst [vmem:[%s1917_s27 + $0x38] sm:$0xff] %v1211_v45  ;;  %v1045_v47 = vpop.f32.mrb[16].mxu1  ;;  %v1495_v53 = vpop.f32.mrb[23].mxu0 }
 0x126   : > { %v1046_v50 = vadd.f32 %v1045_v47, %v885_v43  ;;  %v1047_v51 = vpop.f32.mrb[17].mxu1  ;;  %v1496_v55 = vadd.f32 %v1495_v53, %v1494_v49  ;;  %v893_v61 = vadd.f32 %v1493_v48, %v1909_v34 }
 0x127   : > { %v1048_v54 = vpop.f32.mrb[18].mxu1 }
 0x128   : > { %vm1148_vm9 = vcmp.ge.f32.partialorder %v1046_v50, 0.0  ;;  %v1180_v56 = vmul.f32 0.2, %v1046_v50  ;;  %v1049_v57 = vadd.f32 %v1048_v54, %v888_v52  ;;  %v1050_v58 = vpop.f32.mrb[19].mxu1  ;;  %v896_v6 = vadd.f32 %v1496_v55, %v1909_v34 }
 0x12a   : > { %v1212_v59 = vsel %vm1148_vm9, %v1046_v50, %v1180_v56  ;;  %vm1149_vm10 = vcmp.ge.f32.partialorder %v1049_v57, 0.0  ;;  %v1181_v60 = vmul.f32 0.2, %v1049_v57  ;;  %v1497_v62 = vpop.f32.mrb[24].mxu0 }
 0x12b   : > { %1244 = vst [vmem:[%s1917_s27 + $0x40] sm:$0xff] %v1212_v59  ;;  %v1498_v0 = vpop.f32.mrb[25].mxu0 }
 0x12c   : > { %v1213_v63 = vsel %vm1149_vm10, %v1049_v57, %v1181_v60  ;;  %v1499_v2 = vadd.f32 %v1498_v0, %v1497_v62  ;;  %v1500_v3 = vpop.f32.mrb[26].mxu0 }
 0x12d   : > { %1245 = vst [vmem:[%s1917_s27 + $0x48] sm:$0xff] %v1213_v63  ;;  %v1053_v1 = vpop.f32.mrb[20].mxu1  ;;  %v1501_v7 = vpop.f32.mrb[27].mxu0 }
 0x12e   : > { %v1054_v4 = vadd.f32 %v1053_v1, %v893_v61  ;;  %v1055_v5 = vpop.f32.mrb[21].mxu1  ;;  %v1502_v9 = vadd.f32 %v1501_v7, %v1500_v3  ;;  %v901_v15 = vadd.f32 %v1499_v2, %v1909_v34 }
 0x12f   : > { %v1056_v8 = vpop.f32.mrb[22].mxu1 }
 0x130   : > { %vm1150_vm11 = vcmp.ge.f32.partialorder %v1054_v4, 0.0  ;;  %v1182_v10 = vmul.f32 0.2, %v1054_v4  ;;  %v1057_v11 = vadd.f32 %v1056_v8, %v896_v6  ;;  %v1058_v12 = vpop.f32.mrb[23].mxu1  ;;  %v904_v24 = vadd.f32 %v1502_v9, %v1909_v34 }
 0x132   : > { %v1214_v13 = vsel %vm1150_vm11, %v1054_v4, %v1182_v10  ;;  %vm1151_vm12 = vcmp.ge.f32.partialorder %v1057_v11, 0.0  ;;  %v1183_v14 = vmul.f32 0.2, %v1057_v11  ;;  %v1503_v16 = vpop.f32.mrb[28].mxu0 }
 0x133   : > { %1246 = vst [vmem:[%s1917_s27 + $0x50] sm:$0xff] %v1214_v13  ;;  %v1504_v18 = vpop.f32.mrb[29].mxu0 }
 0x134   : > { %v1215_v17 = vsel %vm1151_vm12, %v1057_v11, %v1183_v14  ;;  %v1505_v20 = vadd.f32 %v1504_v18, %v1503_v16  ;;  %v1506_v21 = vpop.f32.mrb[30].mxu0 }
 0x135   : > { %1247 = vst [vmem:[%s1917_s27 + $0x58] sm:$0xff] %v1215_v17  ;;  %v1061_v19 = vpop.f32.mrb[24].mxu1  ;;  %v1507_v25 = vpop.f32.mrb[31].mxu0 }
 0x136   : > { %v1062_v22 = vadd.f32 %v1061_v19, %v901_v15  ;;  %v1063_v23 = vpop.f32.mrb[25].mxu1  ;;  %v1508_v27 = vadd.f32 %v1507_v25, %v1506_v21  ;;  %v909_v33 = vadd.f32 %v1505_v20, %v1909_v34 }
 0x137   : > { %v1064_v26 = vpop.f32.mrb[26].mxu1 }
 0x138   : > { %vm1152_vm13 = vcmp.ge.f32.partialorder %v1062_v22, 0.0  ;;  %v1184_v28 = vmul.f32 0.2, %v1062_v22  ;;  %v1065_v29 = vadd.f32 %v1064_v26, %v904_v24  ;;  %v1066_v30 = vpop.f32.mrb[27].mxu1  ;;  %v912_v43 = vadd.f32 %v1508_v27, %v1909_v34 }
 0x13a   : > { %v1216_v31 = vsel %vm1152_vm13, %v1062_v22, %v1184_v28  ;;  %vm1153_vm14 = vcmp.ge.f32.partialorder %v1065_v29, 0.0  ;;  %v1185_v32 = vmul.f32 0.2, %v1065_v29  ;;  %v1509_v35 = vpop.f32.mrb[32].mxu0 }
 0x13b   : > { %1248 = vst [vmem:[%s1917_s27 + $0x60] sm:$0xff] %v1216_v31  ;;  %v1510_v37 = vpop.f32.mrb[33].mxu0 }
 0x13c   : > { %v1217_v36 = vsel %vm1153_vm14, %v1065_v29, %v1185_v32  ;;  %v1511_v39 = vadd.f32 %v1510_v37, %v1509_v35  ;;  %v1512_v40 = vpop.f32.mrb[34].mxu0 }
 0x13d   : > { %1249 = vst [vmem:[%s1917_s27 + $0x68] sm:$0xff] %v1217_v36  ;;  %v1069_v38 = vpop.f32.mrb[28].mxu1  ;;  %v1513_v44 = vpop.f32.mrb[35].mxu0 }
 0x13e   : > { %v1070_v41 = vadd.f32 %v1069_v38, %v909_v33  ;;  %v1071_v42 = vpop.f32.mrb[29].mxu1  ;;  %v1514_v46 = vadd.f32 %v1513_v44, %v1512_v40  ;;  %v917_v52 = vadd.f32 %v1511_v39, %v1909_v34 }
 0x13f   : > { %v1072_v45 = vpop.f32.mrb[30].mxu1 }
 0x140   : > { %vm1154_vm15 = vcmp.ge.f32.partialorder %v1070_v41, 0.0  ;;  %v1186_v47 = vmul.f32 0.2, %v1070_v41  ;;  %v1073_v48 = vadd.f32 %v1072_v45, %v912_v43  ;;  %v1074_v49 = vpop.f32.mrb[31].mxu1  ;;  %v920_v61 = vadd.f32 %v1514_v46, %v1909_v34 }
 0x142   : > { %v1218_v50 = vsel %vm1154_vm15, %v1070_v41, %v1186_v47  ;;  %vm1155_vm0 = vcmp.ge.f32.partialorder %v1073_v48, 0.0  ;;  %v1187_v51 = vmul.f32 0.2, %v1073_v48  ;;  %v1515_v53 = vpop.f32.mrb[36].mxu0 }
 0x143   : > { %1250 = vst [vmem:[%s1917_s27 + $0x70] sm:$0xff] %v1218_v50  ;;  %v1516_v55 = vpop.f32.mrb[37].mxu0 }
 0x144   : > { %v1219_v54 = vsel %vm1155_vm0, %v1073_v48, %v1187_v51  ;;  %v1517_v57 = vadd.f32 %v1516_v55, %v1515_v53  ;;  %v1518_v58 = vpop.f32.mrb[38].mxu0 }
 0x145   : > { %1251 = vst [vmem:[%s1917_s27 + $0x78] sm:$0xff] %v1219_v54  ;;  %v1077_v56 = vpop.f32.mrb[32].mxu1  ;;  %v1519_v62 = vpop.f32.mrb[39].mxu0 }
 0x146   : > { %v1078_v59 = vadd.f32 %v1077_v56, %v917_v52  ;;  %v1079_v60 = vpop.f32.mrb[33].mxu1  ;;  %v1520_v0 = vadd.f32 %v1519_v62, %v1518_v58  ;;  %v925_v6 = vadd.f32 %v1517_v57, %v1909_v34 }
 0x147   : > { %v1080_v63 = vpop.f32.mrb[34].mxu1 }
 0x148   : > { %vm1156_vm1 = vcmp.ge.f32.partialorder %v1078_v59, 0.0  ;;  %v1188_v1 = vmul.f32 0.2, %v1078_v59  ;;  %v1081_v2 = vadd.f32 %v1080_v63, %v920_v61  ;;  %v1082_v3 = vpop.f32.mrb[35].mxu1  ;;  %v928_v15 = vadd.f32 %v1520_v0, %v1909_v34 }
 0x14a   : > { %v1220_v4 = vsel %vm1156_vm1, %v1078_v59, %v1188_v1  ;;  %vm1157_vm2 = vcmp.ge.f32.partialorder %v1081_v2, 0.0  ;;  %v1189_v5 = vmul.f32 0.2, %v1081_v2  ;;  %v1521_v7 = vpop.f32.mrb[40].mxu0 }
 0x14b   : > { %1252 = vst [vmem:[%s1917_s27 + $0x80] sm:$0xff] %v1220_v4  ;;  %v1522_v9 = vpop.f32.mrb[41].mxu0 }
 0x14c   : > { %v1221_v8 = vsel %vm1157_vm2, %v1081_v2, %v1189_v5  ;;  %v1523_v11 = vadd.f32 %v1522_v9, %v1521_v7  ;;  %v1524_v12 = vpop.f32.mrb[42].mxu0 }
 0x14d   : > { %1253 = vst [vmem:[%s1917_s27 + $0x88] sm:$0xff] %v1221_v8  ;;  %v1085_v10 = vpop.f32.mrb[36].mxu1  ;;  %v1525_v16 = vpop.f32.mrb[43].mxu0 }
 0x14e   : > { %v1086_v13 = vadd.f32 %v1085_v10, %v925_v6  ;;  %v1087_v14 = vpop.f32.mrb[37].mxu1  ;;  %v1526_v18 = vadd.f32 %v1525_v16, %v1524_v12  ;;  %v933_v24 = vadd.f32 %v1523_v11, %v1909_v34 }
 0x14f   : > { %v1088_v17 = vpop.f32.mrb[38].mxu1 }
 0x150   : > { %vm1158_vm3 = vcmp.ge.f32.partialorder %v1086_v13, 0.0  ;;  %v1190_v19 = vmul.f32 0.2, %v1086_v13  ;;  %v1089_v20 = vadd.f32 %v1088_v17, %v928_v15  ;;  %v1090_v21 = vpop.f32.mrb[39].mxu1  ;;  %v936_v33 = vadd.f32 %v1526_v18, %v1909_v34 }
 0x152   : > { %v1222_v22 = vsel %vm1158_vm3, %v1086_v13, %v1190_v19  ;;  %vm1159_vm4 = vcmp.ge.f32.partialorder %v1089_v20, 0.0  ;;  %v1191_v23 = vmul.f32 0.2, %v1089_v20  ;;  %v1527_v25 = vpop.f32.mrb[44].mxu0 }
 0x153   : > { %1254 = vst [vmem:[%s1917_s27 + $0x90] sm:$0xff] %v1222_v22  ;;  %v1528_v27 = vpop.f32.mrb[45].mxu0 }
 0x154   : > { %v1223_v26 = vsel %vm1159_vm4, %v1089_v20, %v1191_v23  ;;  %v1529_v29 = vadd.f32 %v1528_v27, %v1527_v25  ;;  %v1530_v30 = vpop.f32.mrb[46].mxu0 }
 0x155   : > { %1255 = vst [vmem:[%s1917_s27 + $0x98] sm:$0xff] %v1223_v26  ;;  %v1093_v28 = vpop.f32.mrb[40].mxu1  ;;  %v1531_v35 = vpop.f32.mrb[47].mxu0 }
 0x156   : > { %v1094_v31 = vadd.f32 %v1093_v28, %v933_v24  ;;  %v1095_v32 = vpop.f32.mrb[41].mxu1  ;;  %v1532_v37 = vadd.f32 %v1531_v35, %v1530_v30  ;;  %v941_v43 = vadd.f32 %v1529_v29, %v1909_v34 }
 0x157   : > { %v1096_v36 = vpop.f32.mrb[42].mxu1 }
 0x158   : > { %vm1160_vm5 = vcmp.ge.f32.partialorder %v1094_v31, 0.0  ;;  %v1192_v38 = vmul.f32 0.2, %v1094_v31  ;;  %v1097_v39 = vadd.f32 %v1096_v36, %v936_v33  ;;  %v1098_v40 = vpop.f32.mrb[43].mxu1  ;;  %v944_v52 = vadd.f32 %v1532_v37, %v1909_v34 }
 0x15a   : > { %v1224_v41 = vsel %vm1160_vm5, %v1094_v31, %v1192_v38  ;;  %vm1161_vm6 = vcmp.ge.f32.partialorder %v1097_v39, 0.0  ;;  %v1193_v42 = vmul.f32 0.2, %v1097_v39  ;;  %v1533_v44 = vpop.f32.mrb[48].mxu0 }
 0x15b   : > { %1256 = vst [vmem:[%s1917_s27 + $0xa0] sm:$0xff] %v1224_v41  ;;  %v1534_v46 = vpop.f32.mrb[49].mxu0 }
 0x15c   : > { %v1225_v45 = vsel %vm1161_vm6, %v1097_v39, %v1193_v42  ;;  %v1535_v48 = vadd.f32 %v1534_v46, %v1533_v44  ;;  %v1536_v49 = vpop.f32.mrb[50].mxu0 }
 0x15d   : > { %1257 = vst [vmem:[%s1917_s27 + $0xa8] sm:$0xff] %v1225_v45  ;;  %v1101_v47 = vpop.f32.mrb[44].mxu1  ;;  %v1537_v53 = vpop.f32.mrb[51].mxu0 }
 0x15e   : > { %v1102_v50 = vadd.f32 %v1101_v47, %v941_v43  ;;  %v1103_v51 = vpop.f32.mrb[45].mxu1  ;;  %v1538_v55 = vadd.f32 %v1537_v53, %v1536_v49  ;;  %v949_v61 = vadd.f32 %v1535_v48, %v1909_v34 }
 0x15f   : > { %v1104_v54 = vpop.f32.mrb[46].mxu1 }
 0x160   : > { %vm1162_vm7 = vcmp.ge.f32.partialorder %v1102_v50, 0.0  ;;  %v1194_v56 = vmul.f32 0.2, %v1102_v50  ;;  %v1105_v57 = vadd.f32 %v1104_v54, %v944_v52  ;;  %v1106_v58 = vpop.f32.mrb[47].mxu1  ;;  %v952_v6 = vadd.f32 %v1538_v55, %v1909_v34 }
 0x162   : > { %v1226_v59 = vsel %vm1162_vm7, %v1102_v50, %v1194_v56  ;;  %vm1163_vm8 = vcmp.ge.f32.partialorder %v1105_v57, 0.0  ;;  %v1195_v60 = vmul.f32 0.2, %v1105_v57  ;;  %v1539_v62 = vpop.f32.mrb[52].mxu0 }
 0x163   : > { %1258 = vst [vmem:[%s1917_s27 + $0xb0] sm:$0xff] %v1226_v59  ;;  %v1540_v0 = vpop.f32.mrb[53].mxu0 }
 0x164   : > { %v1227_v63 = vsel %vm1163_vm8, %v1105_v57, %v1195_v60  ;;  %v1541_v2 = vadd.f32 %v1540_v0, %v1539_v62  ;;  %v1542_v3 = vpop.f32.mrb[54].mxu0 }
 0x165   : > { %1259 = vst [vmem:[%s1917_s27 + $0xb8] sm:$0xff] %v1227_v63  ;;  %v1109_v1 = vpop.f32.mrb[48].mxu1  ;;  %v1543_v7 = vpop.f32.mrb[55].mxu0 }
 0x166   : > { %v1110_v4 = vadd.f32 %v1109_v1, %v949_v61  ;;  %v1111_v5 = vpop.f32.mrb[49].mxu1  ;;  %v1544_v9 = vadd.f32 %v1543_v7, %v1542_v3  ;;  %v957_v15 = vadd.f32 %v1541_v2, %v1909_v34 }
 0x167   : > { %v1112_v8 = vpop.f32.mrb[50].mxu1 }
 0x168   : > { %vm1164_vm9 = vcmp.ge.f32.partialorder %v1110_v4, 0.0  ;;  %v1196_v10 = vmul.f32 0.2, %v1110_v4  ;;  %v1113_v11 = vadd.f32 %v1112_v8, %v952_v6  ;;  %v1114_v12 = vpop.f32.mrb[51].mxu1  ;;  %v960_v24 = vadd.f32 %v1544_v9, %v1909_v34 }
 0x16a   : > { %v1228_v13 = vsel %vm1164_vm9, %v1110_v4, %v1196_v10  ;;  %vm1165_vm10 = vcmp.ge.f32.partialorder %v1113_v11, 0.0  ;;  %v1197_v14 = vmul.f32 0.2, %v1113_v11  ;;  %v1545_v16 = vpop.f32.mrb[56].mxu0 }
 0x16b   : > { %1260 = vst [vmem:[%s1917_s27 + $0xc0] sm:$0xff] %v1228_v13  ;;  %v1546_v18 = vpop.f32.mrb[57].mxu0 }
 0x16c   : > { %v1229_v17 = vsel %vm1165_vm10, %v1113_v11, %v1197_v14  ;;  %v1547_v20 = vadd.f32 %v1546_v18, %v1545_v16  ;;  %v1548_v21 = vpop.f32.mrb[58].mxu0 }
 0x16d   : > { %1261 = vst [vmem:[%s1917_s27 + $0xc8] sm:$0xff] %v1229_v17  ;;  %v1117_v19 = vpop.f32.mrb[52].mxu1  ;;  %v1549_v25 = vpop.f32.mrb[59].mxu0 }
 0x16e   : > { %v1118_v22 = vadd.f32 %v1117_v19, %v957_v15  ;;  %v1119_v23 = vpop.f32.mrb[53].mxu1  ;;  %v1550_v27 = vadd.f32 %v1549_v25, %v1548_v21  ;;  %v965_v33 = vadd.f32 %v1547_v20, %v1909_v34 }
 0x16f   : > { %v1120_v26 = vpop.f32.mrb[54].mxu1 }
 0x170   : > { %vm1166_vm11 = vcmp.ge.f32.partialorder %v1118_v22, 0.0  ;;  %v1198_v28 = vmul.f32 0.2, %v1118_v22  ;;  %v1121_v29 = vadd.f32 %v1120_v26, %v960_v24  ;;  %v1122_v30 = vpop.f32.mrb[55].mxu1  ;;  %v968_v43 = vadd.f32 %v1550_v27, %v1909_v34 }
 0x172   : > { %v1230_v31 = vsel %vm1166_vm11, %v1118_v22, %v1198_v28  ;;  %vm1167_vm12 = vcmp.ge.f32.partialorder %v1121_v29, 0.0  ;;  %v1199_v32 = vmul.f32 0.2, %v1121_v29  ;;  %v1551_v35 = vpop.f32.mrb[60].mxu0 }
 0x173   : > { %1262 = vst [vmem:[%s1917_s27 + $0xd0] sm:$0xff] %v1230_v31  ;;  %v1552_v37 = vpop.f32.mrb[61].mxu0 }
 0x174   : > { %v1231_v36 = vsel %vm1167_vm12, %v1121_v29, %v1199_v32  ;;  %v1553_v39 = vadd.f32 %v1552_v37, %v1551_v35  ;;  %v1554_v40 = vpop.f32.mrb[62].mxu0 }
 0x175   : > { %1263 = vst [vmem:[%s1917_s27 + $0xd8] sm:$0xff] %v1231_v36  ;;  %v1125_v38 = vpop.f32.mrb[56].mxu1  ;;  %v1555_v44 = vpop.f32.mrb[63].mxu0 }
 0x176   : > { %v1126_v41 = vadd.f32 %v1125_v38, %v965_v33  ;;  %v1127_v42 = vpop.f32.mrb[57].mxu1  ;;  %v1556_v46 = vadd.f32 %v1555_v44, %v1554_v40  ;;  %v973_v52 = vadd.f32 %v1553_v39, %v1909_v34 }
 0x177   : > { %v1128_v45 = vpop.f32.mrb[58].mxu1 }
 0x178   : > { %vm1168_vm13 = vcmp.ge.f32.partialorder %v1126_v41, 0.0  ;;  %v1200_v47 = vmul.f32 0.2, %v1126_v41  ;;  %v1129_v48 = vadd.f32 %v1128_v45, %v968_v43  ;;  %v1130_v49 = vpop.f32.mrb[59].mxu1  ;;  %v976_v57 = vadd.f32 %v1556_v46, %v1909_v34 }
 0x17a   : > { %v1232_v50 = vsel %vm1168_vm13, %v1126_v41, %v1200_v47  ;;  %vm1169_vm14 = vcmp.ge.f32.partialorder %v1129_v48, 0.0  ;;  %v1201_v51 = vmul.f32 0.2, %v1129_v48 }
 0x17b   : > { %1264 = vst [vmem:[%s1917_s27 + $0xe0] sm:$0xff] %v1232_v50 }
 0x17c   : > { %v1233_v53 = vsel %vm1169_vm14, %v1129_v48, %v1201_v51 }
 0x17d   : > { %1265 = vst [vmem:[%s1917_s27 + $0xe8] sm:$0xff] %v1233_v53  ;;  %v1133_v54 = vpop.f32.mrb[60].mxu1 }
 0x17e   : > { %v1134_v55 = vadd.f32 %v1133_v54, %v973_v52  ;;  %v1135_v56 = vpop.f32.mrb[61].mxu1 }
 0x17f   : > { %v1136_v58 = vpop.f32.mrb[62].mxu1 }
 0x180   : > { %vm1170_vm15 = vcmp.ge.f32.partialorder %v1134_v55, 0.0  ;;  %v1202_v59 = vmul.f32 0.2, %v1134_v55  ;;  %v1137_v60 = vadd.f32 %v1136_v58, %v976_v57  ;;  %v1138_v61 = vpop.f32.mrb[63].mxu1 }
 0x182   : > { %v1234_v62 = vsel %vm1170_vm15, %v1134_v55, %v1202_v59  ;;  %vm1171_vm0 = vcmp.ge.f32.partialorder %v1137_v60, 0.0  ;;  %v1203_v63 = vmul.f32 0.2, %v1137_v60 }
 0x183   : > { %1266 = vst [vmem:[%s1917_s27 + $0xf0] sm:$0xff] %v1234_v62 }
 0x184   : > { %v1235_v0 = vsel %vm1171_vm0, %v1137_v60, %v1203_v63 }
 0x185   : > { %1267 = vst [vmem:[%s1917_s27 + $0xf8] sm:$0xff] %v1235_v0 }
 0x186 PF: > { %s13_s12 = sadd.s32 1, %s1695_s12  }
 0x187   : > { %p10_p4 = scmp.ge.s32.totalorder %s13_s12, 4  }
 0x189   :  { %12 = sbr.rel (!%p10_p4) target bundleno = 1 (0x1), region = 62 }

// kernel: residual_dense_block.7
= control target key start
LH: loop header
LB: loop body
LE: loop exit
PB: predicated region body
PF: predicated region fallthrough
CT: control target
= control target key end

     0   :  { %s2314_s12 = smov 0   ;;  %s2723_s0 = inlined_call_operand.vmem [shape: bf16[512,576], index: 0, kind: input, shape index: {}]   ;;  %s2724_s1 = inlined_call_operand.vmem [shape: bf16[576,128], index: 1, kind: input, shape index: {}]   ;;  %s2725_s2 = inlined_call_operand.vmem [shape: f32[1,128], index: 2, kind: input, shape index: {}]   ;;  %s2726_s3 = inlined_call_operand.vmem [shape: f32[512,128], index: 3, kind: output, shape index: {}]  }
   0x1 LB: > { %s1685_s13 = sadd.s32 4294967295, %s2292_s12   ;;  %p1689_p0 = scmp.ge.s32.totalorder %s2292_s12, 1  ;;  %s2292_s12 = sphi %s2314_s12, %s13_s12  }
   0x2   : > { %p139_p1 = scmp.lt.s32.totalorder %s2292_s12, 3 }
   0x4   : > { %p140_p2 = pnand %p1689_p0, %p139_p1 }
   0x5   : > { %v2138_v0 = vld [vmem:[%s2724_s1 + $0x40] sm:$0xff] (!%p140_p2)   ;;  %s1690_s16 = sshll.u32 (!%p140_p2), %s1685_s13, 5  ;;  %v2140_v2 = vld [vmem:[%s2724_s1 + $0x48] sm:$0xff] (!%p140_p2)   ;;  %v2142_v4 = vld [vmem:[%s2724_s1 + $0x50] sm:$0xff] (!%p140_p2)   ;;  %vm969_vm0 = vcmask (!%p140_p2), 523264  }
   0x6   : > { %143 = sbr.rel (%p140_p2) target bundleno = 415 (0x19f), region = 32  ;;  %v2139_v1 = vld [vmem:[%s2724_s1] sm:$0xff] (!%p140_p2)   ;;  %1829 = vmatprep.subr.bf16.mxu0 (!%p140_p2), %v2138_v0  ;;  %2113 = vmatprep.subr.bf16.mxu1 (!%p140_p2), %v2138_v0  ;;  %p165_p3 = scmp.lt.s32.totalorder (!%p140_p2), %s1690_s16, 63  ;;  %v2141_v3 = vld [vmem:[%s2724_s1 + $0x8] sm:$0xff] (!%p140_p2)   ;;  %v2143_v5 = vld [vmem:[%s2724_s1 + $0x10] sm:$0xff] (!%p140_p2)  }
   0x7   : > { %1830 = vmatpush3.bf16.msra.mxu0 (!%p140_p2), %v2139_v1  ;;  %2121 = vmatpush3.bf16.msra.mxu1 (!%p140_p2), %v2139_v1  ;;  %v2144_v6 = vld [vmem:[%s2724_s1 + $0x58] sm:$0xff] (!%p140_p2)   ;;  %v2146_v8 = vld [vmem:[%s2724_s1 + $0x60] sm:$0xff] (!%p140_p2)   ;;  %v2148_v10 = vld [vmem:[%s2724_s1 + $0x68] sm:$0xff] (!%p140_p2)  }
   0x8   : > { %1831 = vmatprep.subr.bf16.mxu0 (!%p140_p2), %v2140_v2  ;;  %2114 = vmatprep.subr.bf16.mxu1 (!%p140_p2), %v2140_v2  ;;  %v2145_v7 = vld [vmem:[%s2724_s1 + $0x18] sm:$0xff] (!%p140_p2)   ;;  %v2147_v9 = vld [vmem:[%s2724_s1 + $0x20] sm:$0xff] (!%p140_p2)   ;;  %v2149_v13 = vld [vmem:[%s2724_s1 + $0x28] sm:$0xff] (!%p140_p2)  }
   0x9   : > { %v2150_v14 = vld [vmem:[%s2724_s1 + $0x70] sm:$0xff] (!%p140_p2)   ;;  %v2152_v16 = vld [vmem:[%s2724_s1 + $0x78] sm:$0xff] (!%p140_p2)   ;;  %v2160_v18 = vld [vmem:[%s2724_s1 + $0xc0] sm:$0xff] (!%p140_p2)  }
   0xa   : > { %v2151_v15 = vld [vmem:[%s2724_s1 + $0x30] sm:$0xff] (!%p140_p2)   ;;  %v2153_v17 = vld [vmem:[%s2724_s1 + $0x38] sm:$0xff] (!%p140_p2)   ;;  %v2163_v19 = vld [vmem:[%s2724_s1 + $0x100] sm:$0xff] (!%p140_p2)  }
   0xb   : > { %1832 = vmatpush3.bf16.msra.mxu0 (!%p140_p2), %v2141_v3  ;;  %2122 = vmatpush3.bf16.msra.mxu1 (!%p140_p2), %v2141_v3  ;;  %v2161_v22 = vld [vmem:[%s2724_s1 + $0x80] sm:$0xff] (!%p140_p2)   ;;  %v2162_v23 = vld [vmem:[%s2724_s1 + $0xc8] sm:$0xff] (!%p140_p2)   ;;  %v2171_v28 = vld [vmem:[%s2724_s1 + $0xd0] sm:$0xff] (!%p140_p2)  }
   0xc   : > { %1833 = vmatprep.subr.bf16.mxu0 (!%p140_p2), %v2142_v4  ;;  %2115 = vmatprep.subr.bf16.mxu1 (!%p140_p2), %v2142_v4  ;;  %v2164_v26 = vld [vmem:[%s2724_s1 + $0x88] sm:$0xff] (!%p140_p2)   ;;  %v2172_v30 = vld [vmem:[%s2724_s1 + $0x90] sm:$0xff] (!%p140_p2)   ;;  %v2173_v31 = vld [vmem:[%s2724_s1 + $0xd8] sm:$0xff] (!%p140_p2)  }
   0xd   : > { %s2728_s16 = smov (!%p165_p3, %s1690_s16), 63  ;;  %v2174_v34 = vld [vmem:[%s2724_s1 + $0x98] sm:$0xff]   ;;  %v2194_v35 = vld [vmem:[%s2724_s1 + $0x108] sm:$0xff]   ;;  %v2181_v37 = vld [vmem:[%s2724_s1 + $0xe0] sm:$0xff]  }
   0xe   : > { %s2129_s29 = smul.u32 20, %s2728_s16  ;;  %v2182_v39 = vld [vmem:[%s2724_s1 + $0xa0] sm:$0xff]   ;;  %v2183_v40 = vld [vmem:[%s2724_s1 + $0xe8] sm:$0xff]   ;;  %v2191_v46 = vld [vmem:[%s2724_s1 + $0xf0] sm:$0xff]   ;;  %s1693_s19 = sshll.u32 %s2728_s16, 3 }
   0xf   : > { %1834 = vmatpush3.bf16.msra.mxu0 %v2143_v5  ;;  %2123 = vmatpush3.bf16.msra.mxu1 %v2143_v5  ;;  %v2184_v43 = vld [vmem:[%s2724_s1 + $0xa8] sm:$0xff]   ;;  %v2214_v47 = vld [vmem:[%s2724_s1 + $0x110] sm:$0xff]   ;;  %v2193_v49 = vld [vmem:[%s2724_s1 + $0xf8] sm:$0xff]   ;;  %s2626_s22 = scalar_lea.vmem %s2726_s3, %s1693_s19 }
  0x10   : > { %1835 = vmatprep.subr.bf16.mxu0 %v2144_v6  ;;  %2116 = vmatprep.subr.bf16.mxu1 %v2144_v6  ;;  %s2355_s9 = scalar_lea.vmem %s2723_s0, %s2129_s29  ;;  %v2192_v48 = vld [vmem:[%s2724_s1 + $0xb0] sm:$0xff]   ;;  %v2195_v52 = vld [vmem:[%s2724_s1 + $0xb8] sm:$0xff]  }
  0x11   : > { %v2156_v11 = vld [vmem:[%s2355_s9 + $0x4] ss:$20 sps:$4 sm:$0xff]   ;;  %v2154_v20 = vld [vmem:[%s2355_s9] ss:$20 sps:$4 sm:$0xff]   ;;  %v2169_v27 = vld [vmem:[%s2355_s9 + $0x28] ss:$20 sps:$4 sm:$0xff]  }
  0x12   : > { %v2159_v12 = vld [vmem:[%s2355_s9 + $0x1e4] ss:$20 sps:$4 sm:$0xff]   ;;  %1050 = vmatprep.mubr.bf16.mxu0 %v2156_v11  ;;  %v2157_v21 = vld [vmem:[%s2355_s9 + $0x1e0] ss:$20 sps:$4 sm:$0xff]   ;;  %v2170_v29 = vld [vmem:[%s2355_s9 + $0x208] ss:$20 sps:$4 sm:$0xff]  }
  0x13   : > { %1836 = vmatpush3.bf16.msra.mxu0 %v2145_v7  ;;  %2124 = vmatpush3.bf16.msra.mxu1 %v2145_v7  ;;  %v2165_v24 = vld [vmem:[%s2355_s9 + $0x2c] ss:$20 sps:$4 sm:$0xff]   ;;  %v2175_v32 = vld [vmem:[%s2355_s9 + $0x54] ss:$20 sps:$4 sm:$0xff]   ;;  %v2179_v36 = vld [vmem:[%s2355_s9 + $0x50] ss:$20 sps:$4 sm:$0xff]  }
  0x14   : > { %1837 = vmatprep.subr.bf16.mxu0 %v2146_v8  ;;  %2117 = vmatprep.subr.bf16.mxu1 %v2146_v8  ;;  %v2167_v25 = vld [vmem:[%s2355_s9 + $0x20c] ss:$20 sps:$4 sm:$0xff]   ;;  %v2177_v33 = vld [vmem:[%s2355_s9 + $0x234] ss:$20 sps:$4 sm:$0xff]   ;;  %v2180_v38 = vld [vmem:[%s2355_s9 + $0x230] ss:$20 sps:$4 sm:$0xff]  }
  0x15   : > { %1146 = vmatprep.mubr.bf16.mxu1 %v2159_v12  ;;  %v2185_v41 = vld [vmem:[%s2355_s9 + $0x7c] ss:$20 sps:$4 sm:$0xff]   ;;  %v2189_v44 = vld [vmem:[%s2355_s9 + $0x78] ss:$20 sps:$4 sm:$0xff]   ;;  %v2201_v54 = vld [vmem:[%s2355_s9 + $0xa0] ss:$20 sps:$4 sm:$0xff]  }
  0x16   : > { %v2187_v42 = vld [vmem:[%s2355_s9 + $0x25c] ss:$20 sps:$4 sm:$0xff]   ;;  %v2190_v45 = vld [vmem:[%s2355_s9 + $0x258] ss:$20 sps:$4 sm:$0xff]   ;;  %v2204_v57 = vld [vmem:[%s2355_s9 + $0x34] ss:$20 sps:$4 sm:$0xff]  }
  0x17   : > { %1838 = vmatpush3.bf16.msra.mxu0 %v2147_v9  ;;  %2125 = vmatpush3.bf16.msra.mxu1 %v2147_v9  ;;  %v2196_v50 = vld [vmem:[%s2355_s9 + $0xa4] ss:$20 sps:$4 sm:$0xff]   ;;  %v2200_v51 = vld [vmem:[%s2355_s9 + $0xc] ss:$20 sps:$4 sm:$0xff]   ;;  %v2198_v53 = vld [vmem:[%s2355_s9 + $0x8] ss:$20 sps:$4 sm:$0xff]  }
  0x18   : > { %1839 = vmatprep.subr.bf16.mxu0 %v2148_v10  ;;  %2118 = vmatprep.subr.bf16.mxu1 %v2148_v10  ;;  %v2202_v55 = vld [vmem:[%s2355_s9 + $0xcc] ss:$20 sps:$4 sm:$0xff]   ;;  %v2233_v56 = vld [vmem:[%s2724_s1 + $0x118] sm:$0xff]   ;;  %v2207_v59 = vld [vmem:[%s2355_s9 + $0x30] ss:$20 sps:$4 sm:$0xff]  }
  0x19   : > { %v2206_v58 = vld [vmem:[%s2355_s9 + $0xc8] ss:$20 sps:$4 sm:$0xff]   ;;  %v2212_v62 = vld [vmem:[%s2355_s9 + $0xf0] ss:$20 sps:$4 sm:$0xff]   ;;  %v2213_v63 = vld [vmem:[%s2355_s9 + $0x58] ss:$20 sps:$4 sm:$0xff]  }
  0x1a   : > { %v2208_v60 = vld [vmem:[%s2355_s9 + $0xf4] ss:$20 sps:$4 sm:$0xff]   ;;  %v2210_v61 = vld [vmem:[%s2355_s9 + $0x5c] ss:$20 sps:$4 sm:$0xff]   ;;  %v2217_v1 = vld [vmem:[%s2355_s9 + $0x84] ss:$20 sps:$4 sm:$0xff]  }
  0x1b   : > { %1840 = vmatpush3.bf16.msra.mxu0 %v2149_v13  ;;  %2126 = vmatpush3.bf16.msra.mxu1 %v2149_v13  ;;  %v2215_v0 = vld [vmem:[%s2355_s9 + $0x11c] ss:$20 sps:$4 sm:$0xff]   ;;  %v2219_v2 = vld [vmem:[%s2355_s9 + $0x118] ss:$20 sps:$4 sm:$0xff]   ;;  %v2220_v3 = vld [vmem:[%s2355_s9 + $0x80] ss:$20 sps:$4 sm:$0xff]  }
  0x1c   : > { %1841 = vmatprep.subr.bf16.mxu0 %v2150_v14  ;;  %2119 = vmatprep.subr.bf16.mxu1 %v2150_v14  ;;  %v2221_v4 = vld [vmem:[%s2355_s9 + $0x144] ss:$20 sps:$4 sm:$0xff]   ;;  %v2223_v5 = vld [vmem:[%s2355_s9 + $0xac] ss:$20 sps:$4 sm:$0xff]   ;;  %v2226_v7 = vld [vmem:[%s2355_s9 + $0xa8] ss:$20 sps:$4 sm:$0xff]  }
  0x1d   : > { %v2225_v6 = vld [vmem:[%s2355_s9 + $0x140] ss:$20 sps:$4 sm:$0xff]   ;;  %v2231_v10 = vld [vmem:[%s2355_s9 + $0x168] ss:$20 sps:$4 sm:$0xff]   ;;  %v2232_v11 = vld [vmem:[%s2355_s9 + $0xd0] ss:$20 sps:$4 sm:$0xff]  }
  0x1e   : > { %v2227_v8 = vld [vmem:[%s2355_s9 + $0x16c] ss:$20 sps:$4 sm:$0xff]   ;;  %v2229_v9 = vld [vmem:[%s2355_s9 + $0xd4] ss:$20 sps:$4 sm:$0xff]   ;;  %v2236_v13 = vld [vmem:[%s2355_s9 + $0xfc] ss:$20 sps:$4 sm:$0xff]  }
  0x1f   : > { %1842 = vmatpush3.bf16.msra.mxu0 %v2151_v15  ;;  %2127 = vmatpush3.bf16.msra.mxu1 %v2151_v15  ;;  %v2234_v12 = vld [vmem:[%s2355_s9 + $0x194] ss:$20 sps:$4 sm:$0xff]   ;;  %v2238_v14 = vld [vmem:[%s2355_s9 + $0x190] ss:$20 sps:$4 sm:$0xff]   ;;  %v2239_v15 = vld [vmem:[%s2355_s9 + $0xf8] ss:$20 sps:$4 sm:$0xff]  }
  0x20   : > { %1843 = vmatprep.subr.bf16.mxu0 %v2152_v16  ;;  %2120 = vmatprep.subr.bf16.mxu1 %v2152_v16  ;;  %v2240_v16 = vld [vmem:[%s2355_s9 + $0x1bc] ss:$20 sps:$4 sm:$0xff]  }
  0x23   : > { %1844 = vmatpush3.bf16.msra.mxu0 %v2153_v17  ;;  %2128 = vmatpush3.bf16.msra.mxu1 %v2153_v17  ;;  %v2242_v17 = vld [vmem:[%s2355_s9 + $0x124] ss:$20 sps:$4 sm:$0xff]  }
  0x24   : > { %1941 = vmatprep.subr.bf16.mxu1 %v2160_v18  ;;  %2073 = vmatprep.subr.bf16.mxu0 %v2163_v19  ;;  %v2244_v18 = vld [vmem:[%s2355_s9 + $0x1b8] ss:$20 sps:$4 sm:$0xff]  }
  0x26   : > { %1051 = vmatmul.mubr.bf16.vlgmr.msra.gmra.mrb[0].mxu0 %v2154_v20  ;;  %1147 = vmatmul.mubr.bf16.vlgmr.msra.gmra.mrb[0].mxu1 %v2157_v21  ;;  %v2246_v20 = vld [vmem:[%s2355_s9 + $0x14c] ss:$20 sps:$4 sm:$0xff]   ;;  %v2248_v21 = vld [vmem:[%s2355_s9 + $0x10] ss:$20 sps:$4 sm:$0xff]  }
  0x27   : > { %1942 = vmatpush3.bf16.msra.mxu1 %v2161_v22  ;;  %2074 = vmatpush3.bf16.msra.mxu0 %v2163_v19  ;;  %v2245_v19 = vld [vmem:[%s2355_s9 + $0x120] ss:$20 sps:$4 sm:$0xff]   ;;  %v2249_v22 = vld [vmem:[%s2355_s9 + $0x148] ss:$20 sps:$4 sm:$0xff]  }
  0x28   : > { %1943 = vmatprep.subr.bf16.mxu1 %v2162_v23  ;;  %1058 = vmatprep.mubr.bf16.mxu0 %v2165_v24  ;;  %v2250_v23 = vld [vmem:[%s2355_s9 + $0x38] ss:$20 sps:$4 sm:$0xff]   ;;  %v2251_v24 = vld [vmem:[%s2355_s9 + $0x174] ss:$20 sps:$4 sm:$0xff]  }
  0x29   : > { %1154 = vmatprep.mubr.bf16.mxu1 %v2167_v25  ;;  %2075 = vmatprep.subr.bf16.mxu0 %v2194_v35  ;;  %v2253_v25 = vld [vmem:[%s2355_s9 + $0x60] ss:$20 sps:$4 sm:$0xff]  }
  0x2b   : > { %1944 = vmatpush3.bf16.msra.mxu1 %v2164_v26  ;;  %2076 = vmatpush3.bf16.msra.mxu0 %v2194_v35  ;;  %v2254_v26 = vld [vmem:[%s2355_s9 + $0x170] ss:$20 sps:$4 sm:$0xff]   ;;  %v2265_v35 = vld [vmem:[%s2355_s9 + $0x128] ss:$20 sps:$4 sm:$0xff]  }
  0x2c   : > { %1945 = vmatprep.subr.bf16.mxu1 %v2171_v28  ;;  %2077 = vmatprep.subr.bf16.mxu0 %v2214_v47  ;;  %v2256_v28 = vld [vmem:[%s2355_s9 + $0x19c] ss:$20 sps:$4 sm:$0xff]  }
  0x2e   : > { %1059 = vmatmul.mubr.bf16.gmra.mrb[4].mxu0 %v2169_v27  ;;  %1155 = vmatmul.mubr.bf16.gmra.mrb[4].mxu1 %v2170_v29  ;;  %v2255_v27 = vld [vmem:[%s2355_s9 + $0x88] ss:$20 sps:$4 sm:$0xff]   ;;  %v2258_v29 = vld [vmem:[%s2355_s9 + $0xb0] ss:$20 sps:$4 sm:$0xff]  }
  0x2f   : > { %1946 = vmatpush3.bf16.msra.mxu1 %v2172_v30  ;;  %1066 = vmatprep.mubr.bf16.mxu0 %v2175_v32  ;;  %v2259_v30 = vld [vmem:[%s2355_s9 + $0x198] ss:$20 sps:$4 sm:$0xff]  }
  0x30   : > { %1947 = vmatprep.subr.bf16.mxu1 %v2173_v31  ;;  %1162 = vmatprep.mubr.bf16.mxu1 %v2177_v33  ;;  %v2260_v31 = vld [vmem:[%s2355_s9 + $0xd8] ss:$20 sps:$4 sm:$0xff]   ;;  %v2263_v33 = vld [vmem:[%s2355_s9 + $0x100] ss:$20 sps:$4 sm:$0xff]  }
  0x31   : > { %2078 = vmatpush3.bf16.msra.mxu0 %v2214_v47  ;;  %v2261_v32 = vld [vmem:[%s2355_s9 + $0x1c4] ss:$20 sps:$4 sm:$0xff]  }
  0x32   : > { %2079 = vmatprep.subr.bf16.mxu0 %v2233_v56  ;;  %v2280_v47 = vld [vmem:[%s2355_s9 + $0x218] ss:$20 sps:$4 sm:$0xff]  }
  0x33   : > { %1948 = vmatpush3.bf16.msra.mxu1 %v2174_v34  ;;  %v2264_v34 = vld [vmem:[%s2355_s9 + $0x1c0] ss:$20 sps:$4 sm:$0xff]  }
  0x34   : > { %1949 = vmatprep.subr.bf16.mxu1 %v2181_v37  ;;  %v2268_v37 = vld [vmem:[%s2355_s9 + $0x150] ss:$20 sps:$4 sm:$0xff]  }
  0x35   : > { %2080 = vmatpush3.bf16.msra.mxu0 %v2233_v56 }
  0x36   : > { %1067 = vmatmul.mubr.bf16.gmra.mrb[8].mxu0 %v2179_v36  ;;  %1163 = vmatmul.mubr.bf16.gmra.mrb[8].mxu1 %v2180_v38  ;;  %v2266_v36 = vld [vmem:[%s2355_s9 + $0x1ec] ss:$20 sps:$4 sm:$0xff]   ;;  %v2269_v38 = vld [vmem:[%s2355_s9 + $0x1e8] ss:$20 sps:$4 sm:$0xff]  }
  0x37   : > { %1950 = vmatpush3.bf16.msra.mxu1 %v2182_v39  ;;  %1074 = vmatprep.mubr.bf16.mxu0 %v2185_v41  ;;  %v2270_v39 = vld [vmem:[%s2355_s9 + $0x178] ss:$20 sps:$4 sm:$0xff]   ;;  %v2273_v41 = vld [vmem:[%s2355_s9 + $0x1a0] ss:$20 sps:$4 sm:$0xff]  }
  0x38   : > { %1951 = vmatprep.subr.bf16.mxu1 %v2183_v40  ;;  %1170 = vmatprep.mubr.bf16.mxu1 %v2187_v42  ;;  %v2271_v40 = vld [vmem:[%s2355_s9 + $0x214] ss:$20 sps:$4 sm:$0xff]   ;;  %v2274_v42 = vld [vmem:[%s2355_s9 + $0x210] ss:$20 sps:$4 sm:$0xff]  }
  0x3b   : > { %1952 = vmatpush3.bf16.msra.mxu1 %v2184_v43  ;;  %v2275_v43 = vld [vmem:[%s2355_s9 + $0x1c8] ss:$20 sps:$4 sm:$0xff]  }
  0x3c   : > { %1953 = vmatprep.subr.bf16.mxu1 %v2191_v46  ;;  %v2279_v46 = vld [vmem:[%s2355_s9 + $0x238] ss:$20 sps:$4 sm:$0xff]  }
  0x3e   : > { %1075 = vmatmul.mubr.bf16.gmra.mrb[12].mxu0 %v2189_v44  ;;  %1171 = vmatmul.mubr.bf16.gmra.mrb[12].mxu1 %v2190_v45  ;;  %v2276_v44 = vld [vmem:[%s2355_s9 + $0x23c] ss:$20 sps:$4 sm:$0xff]  }
  0x3f   : > { %1954 = vmatpush3.bf16.msra.mxu1 %v2192_v48  ;;  %1082 = vmatprep.mubr.bf16.mxu0 %v2196_v50  ;;  %v2278_v45 = vld [vmem:[%s2355_s9 + $0x1f0] ss:$20 sps:$4 sm:$0xff]   ;;  %v2284_v50 = vld [vmem:[%s2355_s9 + $0x260] ss:$20 sps:$4 sm:$0xff]  }
  0x40   : > { %1955 = vmatprep.subr.bf16.mxu1 %v2193_v49  ;;  %1211 = vmatprep.mubr.bf16.mxu1 %v2200_v51  ;;  %v2281_v48 = vld [vmem:[%s2355_s9 + $0x264] ss:$20 sps:$4 sm:$0xff]   ;;  %v2283_v49 = vld [vmem:[%s2355_s9 + $0x240] ss:$20 sps:$4 sm:$0xff]   ;;  %v2285_v51 = vld [vmem:[%s2355_s9 + $0x268] ss:$20 sps:$4 sm:$0xff]  }
  0x43   : > { %1956 = vmatpush3.bf16.msra.mxu1 %v2195_v52 }
  0x46   : > { %1083 = vmatmul.mubr.bf16.gmra.mrb[16].mxu0 %v2201_v54  ;;  %1212 = vmatmul.mubr.bf16.vlgmr.msra.gmra.mrb[16].mxu1 %v2198_v53 }
  0x47   : > { %1090 = vmatprep.mubr.bf16.mxu0 %v2202_v55  ;;  %1219 = vmatprep.mubr.bf16.mxu1 %v2204_v57 }
  0x4e   : > { %1091 = vmatmul.mubr.bf16.gmra.mrb[20].mxu0 %v2206_v58  ;;  %1220 = vmatmul.mubr.bf16.gmra.mrb[20].mxu1 %v2207_v59 }
  0x4f   : > { %1098 = vmatprep.mubr.bf16.mxu0 %v2208_v60  ;;  %1227 = vmatprep.mubr.bf16.mxu1 %v2210_v61 }
  0x56   : > { %1099 = vmatmul.mubr.bf16.gmra.mrb[24].mxu0 %v2212_v62  ;;  %1228 = vmatmul.mubr.bf16.gmra.mrb[24].mxu1 %v2213_v63 }
  0x57   : > { %1106 = vmatprep.mubr.bf16.mxu0 %v2215_v0  ;;  %1235 = vmatprep.mubr.bf16.mxu1 %v2217_v1 }
  0x5e   : > { %1107 = vmatmul.mubr.bf16.gmra.mrb[28].mxu0 %v2219_v2  ;;  %1236 = vmatmul.mubr.bf16.gmra.mrb[28].mxu1 %v2220_v3 }
  0x5f   : > { %1114 = vmatprep.mubr.bf16.mxu0 %v2221_v4  ;;  %1243 = vmatprep.mubr.bf16.mxu1 %v2223_v5 }
  0x66   : > { %1115 = vmatmul.mubr.bf16.gmra.mrb[32].mxu0 %v2225_v6  ;;  %1244 = vmatmul.mubr.bf16.gmra.mrb[32].mxu1 %v2226_v7 }
  0x67   : > { %1122 = vmatprep.mubr.bf16.mxu0 %v2227_v8  ;;  %1251 = vmatprep.mubr.bf16.mxu1 %v2229_v9 }
  0x6e   : > { %1123 = vmatmul.mubr.bf16.gmra.mrb[36].mxu0 %v2231_v10  ;;  %1252 = vmatmul.mubr.bf16.gmra.mrb[36].mxu1 %v2232_v11 }
  0x6f   : > { %1130 = vmatprep.mubr.bf16.mxu0 %v2234_v12  ;;  %1259 = vmatprep.mubr.bf16.mxu1 %v2236_v13 }
  0x76   : > { %1131 = vmatmul.mubr.bf16.gmra.mrb[40].mxu0 %v2238_v14  ;;  %1260 = vmatmul.mubr.bf16.gmra.mrb[40].mxu1 %v2239_v15 }
  0x77   : > { %1138 = vmatprep.mubr.bf16.mxu0 %v2240_v16  ;;  %1267 = vmatprep.mubr.bf16.mxu1 %v2242_v17 }
  0x7e   : > { %1139 = vmatmul.mubr.bf16.gmra.mrb[44].mxu0 %v2244_v18  ;;  %1268 = vmatmul.mubr.bf16.gmra.mrb[44].mxu1 %v2245_v19 }
  0x7f   : > { %1275 = vmatprep.mubr.bf16.mxu1 %v2246_v20  ;;  %2081 = vmatprep.mubr.msk.bf16.mxu0 %vm969_vm0, %v2248_v21 }
  0x86   : > { %1276 = vmatmul.mubr.bf16.gmra.mrb[48].mxu1 %v2249_v22  ;;  %2082 = vmatmul.mubr.msk.bf16.vlgmr.msra.gmra.mrb[48].mxu0 %vm969_vm0, %v2250_v23 }
  0x87   : > { %1283 = vmatprep.mubr.bf16.mxu1 %v2251_v24  ;;  %2085 = vmatprep.mubr.msk.bf16.mxu0 %vm969_vm0, %v2253_v25 }
  0x8e   : > { %1284 = vmatmul.mubr.bf16.gmra.mrb[52].mxu1 %v2254_v26  ;;  %2086 = vmatmul.mubr.msk.bf16.gmra.mrb[52].mxu0 %vm969_vm0, %v2255_v27 }
  0x8f   : > { %1291 = vmatprep.mubr.bf16.mxu1 %v2256_v28  ;;  %2089 = vmatprep.mubr.msk.bf16.mxu0 %vm969_vm0, %v2258_v29 }
  0x96   : > { %1292 = vmatmul.mubr.bf16.gmra.mrb[56].mxu1 %v2259_v30  ;;  %2090 = vmatmul.mubr.msk.bf16.gmra.mrb[56].mxu0 %vm969_vm0, %v2260_v31 }
  0x97   : > { %1299 = vmatprep.mubr.bf16.mxu1 %v2261_v32  ;;  %2093 = vmatprep.mubr.msk.bf16.mxu0 %vm969_vm0, %v2263_v33 }
  0x9e   : > { %1300 = vmatmul.mubr.bf16.gmra.mrb[60].mxu1 %v2264_v34  ;;  %2094 = vmatmul.mubr.msk.bf16.gmra.mrb[60].mxu0 %vm969_vm0, %v2265_v35 }
  0x9f   : > { %1307 = vmatprep.mubr.bf16.mxu1 %v2266_v36  ;;  %2097 = vmatprep.mubr.msk.bf16.mxu0 %vm969_vm0, %v2268_v37 }
  0xa6   : > { %1308 = vmatmul.mubr.bf16.gmra.mrb[64].mxu1 %v2269_v38  ;;  %2098 = vmatmul.mubr.msk.bf16.gmra.mrb[64].mxu0 %vm969_vm0, %v2270_v39  ;;  %v2553_v38 = vld [vmem:[%s2725_s2] ss:$0 sm:$0xff] }
  0xa7   : > { %1315 = vmatprep.mubr.bf16.mxu1 %v2271_v40  ;;  %2101 = vmatprep.mubr.msk.bf16.mxu0 %vm969_vm0, %v2273_v41 }
  0xae   : > { %1316 = vmatmul.mubr.bf16.gmra.mrb[68].mxu1 %v2274_v42  ;;  %2102 = vmatmul.mubr.msk.bf16.gmra.mrb[68].mxu0 %vm969_vm0, %v2275_v43 }
  0xaf   : > { %1323 = vmatprep.mubr.bf16.mxu1 %v2276_v44  ;;  %2105 = vmatprep.mubr.msk.bf16.mxu0 %vm969_vm0, %v2278_v45 }
  0xb6   : > { %1324 = vmatmul.mubr.bf16.gmra.mrb[72].mxu1 %v2279_v46  ;;  %2106 = vmatmul.mubr.msk.bf16.gmra.mrb[72].mxu0 %vm969_vm0, %v2280_v47 }
  0xb7   : > { %1331 = vmatprep.mubr.bf16.mxu1 %v2281_v48  ;;  %2109 = vmatprep.mubr.msk.bf16.mxu0 %vm969_vm0, %v2283_v49 }
  0xbe   : > { %1332 = vmatmul.mubr.bf16.gmra.mrb[76].mxu1 %v2284_v50  ;;  %2110 = vmatmul.mubr.msk.bf16.gmra.mrb[76].mxu0 %vm969_vm0, %v2285_v51 }
  0xf9   : > { %v1917_v52 = vpop.f32.mrb[0].mxu1  ;;  %v1845_v53 = vpop.f32.mrb[0].mxu0 }
  0xfa   : > { %v1918_v54 = vpop.f32.mrb[1].mxu1  ;;  %v1846_v55 = vpop.f32.mrb[1].mxu0 }
  0xfb   : > { %v2534_v56 = vadd.f32 %v1918_v54, %v1917_v52  ;;  %v1920_v57 = vpop.f32.mrb[2].mxu1  ;;  %v1847_v58 = vadd.f32 %v1846_v55, %v1845_v53  ;;  %v1848_v59 = vpop.f32.mrb[2].mxu0 }
  0xfc   : > { %v1921_v60 = vpop.f32.mrb[3].mxu1  ;;  %v1849_v61 = vpop.f32.mrb[3].mxu0 }
  0xfd   : > { %v2536_v62 = vadd.f32 %v1921_v60, %v1920_v57  ;;  %v1850_v63 = vadd.f32 %v1849_v61, %v1848_v59  ;;  %v1053_v41 = vadd.f32 %v1847_v58, %v2553_v38 }
  0xff   : > { %v1056_v48 = vadd.f32 %v1850_v63, %v2553_v38 }
 0x101   : > { %v1923_v0 = vpop.f32.mrb[4].mxu1  ;;  %v1851_v1 = vpop.f32.mrb[4].mxu0 }
 0x102   : > { %v1924_v2 = vpop.f32.mrb[5].mxu1  ;;  %v1852_v3 = vpop.f32.mrb[5].mxu0 }
 0x103   : > { %v2538_v4 = vadd.f32 %v1924_v2, %v1923_v0  ;;  %v1926_v5 = vpop.f32.mrb[6].mxu1  ;;  %v1853_v6 = vadd.f32 %v1852_v3, %v1851_v1  ;;  %v1854_v7 = vpop.f32.mrb[6].mxu0 }
 0x104   : > { %v1927_v8 = vpop.f32.mrb[7].mxu1  ;;  %v1855_v9 = vpop.f32.mrb[7].mxu0 }
 0x105   : > { %v2540_v10 = vadd.f32 %v1927_v8, %v1926_v5  ;;  %v1856_v11 = vadd.f32 %v1855_v9, %v1854_v7  ;;  %v1061_v58 = vadd.f32 %v1853_v6, %v2553_v38 }
 0x107   : > { %v1064_v63 = vadd.f32 %v1856_v11, %v2553_v38 }
 0x109   : > { %v1929_v12 = vpop.f32.mrb[8].mxu1  ;;  %v1857_v13 = vpop.f32.mrb[8].mxu0 }
 0x10a   : > { %v1930_v14 = vpop.f32.mrb[9].mxu1  ;;  %v1858_v15 = vpop.f32.mrb[9].mxu0 }
 0x10b   : > { %v2542_v16 = vadd.f32 %v1930_v14, %v1929_v12  ;;  %v1932_v17 = vpop.f32.mrb[10].mxu1  ;;  %v1859_v18 = vadd.f32 %v1858_v15, %v1857_v13  ;;  %v1860_v19 = vpop.f32.mrb[10].mxu0 }
 0x10c   : > { %v1933_v20 = vpop.f32.mrb[11].mxu1  ;;  %v1861_v21 = vpop.f32.mrb[11].mxu0 }
 0x10d   : > { %v2544_v22 = vadd.f32 %v1933_v20, %v1932_v17  ;;  %v1862_v23 = vadd.f32 %v1861_v21, %v1860_v19  ;;  %v1069_v6 = vadd.f32 %v1859_v18, %v2553_v38 }
 0x10f   : > { %v1072_v11 = vadd.f32 %v1862_v23, %v2553_v38 }
 0x111   : > { %v1935_v24 = vpop.f32.mrb[12].mxu1  ;;  %v1863_v25 = vpop.f32.mrb[12].mxu0 }
 0x112   : > { %v1936_v26 = vpop.f32.mrb[13].mxu1  ;;  %v1864_v27 = vpop.f32.mrb[13].mxu0 }
 0x113   : > { %v2546_v28 = vadd.f32 %v1936_v26, %v1935_v24  ;;  %v1938_v29 = vpop.f32.mrb[14].mxu1  ;;  %v1865_v30 = vadd.f32 %v1864_v27, %v1863_v25  ;;  %v1866_v31 = vpop.f32.mrb[14].mxu0 }
 0x114   : > { %v1939_v32 = vpop.f32.mrb[15].mxu1  ;;  %v1867_v33 = vpop.f32.mrb[15].mxu0 }
 0x115   : > { %v2548_v34 = vadd.f32 %v1939_v32, %v1938_v29  ;;  %v1868_v35 = vadd.f32 %v1867_v33, %v1866_v31  ;;  %v1077_v18 = vadd.f32 %v1865_v30, %v2553_v38 }
 0x117   : > { %v1080_v23 = vadd.f32 %v1868_v35, %v2553_v38 }
 0x119   : > { %v1957_v36 = vpop.f32.mrb[16].mxu1  ;;  %v1869_v37 = vpop.f32.mrb[16].mxu0 }
 0x11a   : > { %v1958_v39 = vpop.f32.mrb[17].mxu1  ;;  %v1870_v40 = vpop.f32.mrb[17].mxu0 }
 0x11b   : > { %v1959_v42 = vadd.f32 %v1958_v39, %v1957_v36  ;;  %v1960_v43 = vpop.f32.mrb[18].mxu1  ;;  %v1871_v44 = vadd.f32 %v1870_v40, %v1869_v37  ;;  %v1872_v45 = vpop.f32.mrb[18].mxu0 }
 0x11c   : > { %v1961_v46 = vpop.f32.mrb[19].mxu1  ;;  %v1873_v47 = vpop.f32.mrb[19].mxu0 }
 0x11d   : > { %v1962_v49 = vadd.f32 %v1961_v46, %v1960_v43  ;;  %v1874_v50 = vadd.f32 %v1873_v47, %v1872_v45  ;;  %v2557_v51 = vadd.f32 %v1959_v42, %v1053_v41  ;;  %v1085_v30 = vadd.f32 %v1871_v44, %v2553_v38 }
 0x11f   : > { %v2559_v52 = vadd.f32 %v1962_v49, %v1056_v48  ;;  %v1088_v35 = vadd.f32 %v1874_v50, %v2553_v38 }
 0x121   : > { %v1963_v53 = vpop.f32.mrb[20].mxu1  ;;  %v1875_v54 = vpop.f32.mrb[20].mxu0 }
 0x122   : > { %v1964_v55 = vpop.f32.mrb[21].mxu1  ;;  %v1876_v57 = vpop.f32.mrb[21].mxu0 }
 0x123   : > { %v1965_v59 = vadd.f32 %v1964_v55, %v1963_v53  ;;  %v1966_v60 = vpop.f32.mrb[22].mxu1  ;;  %v1877_v61 = vadd.f32 %v1876_v57, %v1875_v54  ;;  %v1878_v0 = vpop.f32.mrb[22].mxu0 }
 0x124   : > { %v1967_v1 = vpop.f32.mrb[23].mxu1  ;;  %v1879_v2 = vpop.f32.mrb[23].mxu0 }
 0x125   : > { %v1968_v3 = vadd.f32 %v1967_v1, %v1966_v60  ;;  %v1880_v5 = vadd.f32 %v1879_v2, %v1878_v0  ;;  %v2563_v7 = vadd.f32 %v1965_v59, %v1061_v58  ;;  %v1093_v44 = vadd.f32 %v1877_v61, %v2553_v38 }
 0x127   : > { %v2565_v8 = vadd.f32 %v1968_v3, %v1064_v63  ;;  %v1096_v50 = vadd.f32 %v1880_v5, %v2553_v38 }
 0x129   : > { %v1969_v9 = vpop.f32.mrb[24].mxu1  ;;  %v1881_v12 = vpop.f32.mrb[24].mxu0 }
 0x12a   : > { %v1970_v13 = vpop.f32.mrb[25].mxu1  ;;  %v1882_v14 = vpop.f32.mrb[25].mxu0 }
 0x12b   : > { %v1971_v15 = vadd.f32 %v1970_v13, %v1969_v9  ;;  %v1972_v17 = vpop.f32.mrb[26].mxu1  ;;  %v1883_v19 = vadd.f32 %v1882_v14, %v1881_v12  ;;  %v1884_v20 = vpop.f32.mrb[26].mxu0 }
 0x12c   : > { %v1973_v21 = vpop.f32.mrb[27].mxu1  ;;  %v1885_v24 = vpop.f32.mrb[27].mxu0 }
 0x12d   : > { %v1974_v25 = vadd.f32 %v1973_v21, %v1972_v17  ;;  %v1886_v26 = vadd.f32 %v1885_v24, %v1884_v20  ;;  %v2569_v27 = vadd.f32 %v1971_v15, %v1069_v6 }
 0x12f   : > { %v2571_v29 = vadd.f32 %v1974_v25, %v1072_v11 }
 0x131   : > { %v1975_v31 = vpop.f32.mrb[28].mxu1  ;;  %v1887_v32 = vpop.f32.mrb[28].mxu0 }
 0x132   : > { %v1976_v33 = vpop.f32.mrb[29].mxu1  ;;  %v1888_v36 = vpop.f32.mrb[29].mxu0 }
 0x133   : > { %v1977_v37 = vadd.f32 %v1976_v33, %v1975_v31  ;;  %v1978_v39 = vpop.f32.mrb[30].mxu1  ;;  %v1889_v40 = vadd.f32 %v1888_v36, %v1887_v32  ;;  %v1890_v41 = vpop.f32.mrb[30].mxu0 }
 0x134   : > { %v1979_v42 = vpop.f32.mrb[31].mxu1  ;;  %v1891_v43 = vpop.f32.mrb[31].mxu0 }
 0x135   : > { %v1980_v45 = vadd.f32 %v1979_v42, %v1978_v39  ;;  %v1892_v46 = vadd.f32 %v1891_v43, %v1890_v41  ;;  %v2575_v47 = vadd.f32 %v1977_v37, %v1077_v18  ;;  %v1101_v39 = vadd.f32 %v1883_v19, %v2553_v38 }
 0x137   : > { %v2577_v48 = vadd.f32 %v1980_v45, %v1080_v23 }
 0x139   : > { %v1981_v49 = vpop.f32.mrb[32].mxu1  ;;  %v1893_v53 = vpop.f32.mrb[32].mxu0 }
 0x13a   : > { %v1982_v54 = vpop.f32.mrb[33].mxu1  ;;  %v1894_v55 = vpop.f32.mrb[33].mxu0 }
 0x13b   : > { %v1983_v57 = vadd.f32 %v1982_v54, %v1981_v49  ;;  %v1984_v58 = vpop.f32.mrb[34].mxu1  ;;  %v2580_v59 = vadd.f32 %v1894_v55, %v1893_v53  ;;  %v1896_v60 = vpop.f32.mrb[34].mxu0  ;;  %v1104_v49 = vadd.f32 %v1886_v26, %v2553_v38 }
 0x13c   : > { %v1985_v0 = vpop.f32.mrb[35].mxu1  ;;  %v1897_v1 = vpop.f32.mrb[35].mxu0 }
 0x13d   : > { %v1986_v2 = vadd.f32 %v1985_v0, %v1984_v58  ;;  %v1898_v63 = vadd.f32 %v1897_v1, %v1896_v60  ;;  %v2583_v3 = vadd.f32 %v1983_v57, %v1085_v30  ;;  %v1109_v0 = vadd.f32 %v1889_v40, %v2553_v38 }
 0x13f   : > { %v2585_v9 = vadd.f32 %v1986_v2, %v1088_v35 }
 0x141   : > { %v1987_v12 = vpop.f32.mrb[36].mxu1  ;;  %v1899_v13 = vpop.f32.mrb[36].mxu0 }
 0x142   : > { %v1988_v14 = vpop.f32.mrb[37].mxu1  ;;  %v1900_v6 = vpop.f32.mrb[37].mxu0 }
 0x143   : > { %v1989_v15 = vadd.f32 %v1988_v14, %v1987_v12  ;;  %v1990_v17 = vpop.f32.mrb[38].mxu1  ;;  %v2588_v20 = vadd.f32 %v1900_v6, %v1899_v13  ;;  %v1902_v21 = vpop.f32.mrb[38].mxu0  ;;  %v1112_v14 = vadd.f32 %v1892_v46, %v2553_v38 }
 0x144   : > { %v1991_v24 = vpop.f32.mrb[39].mxu1  ;;  %v1903_v11 = vpop.f32.mrb[39].mxu0 }
 0x145   : > { %v1992_v25 = vadd.f32 %v1991_v24, %v1990_v17  ;;  %v2591_v31 = vadd.f32 %v1903_v11, %v1902_v21  ;;  %v2593_v32 = vadd.f32 %v1989_v15, %v1093_v44 }
 0x147   : > { %v2595_v33 = vadd.f32 %v1992_v25, %v1096_v50  ;;  %v1117_v25 = vadd.f32 %v2580_v59, %v2553_v38 }
 0x149   : > { %v1993_v36 = vpop.f32.mrb[40].mxu1  ;;  %v1905_v18 = vpop.f32.mrb[40].mxu0 }
 0x14a   : > { %v1994_v37 = vpop.f32.mrb[41].mxu1  ;;  %v1906_v61 = vpop.f32.mrb[41].mxu0 }
 0x14b   : > { %v1995_v41 = vadd.f32 %v1994_v37, %v1993_v36  ;;  %v1996_v42 = vpop.f32.mrb[42].mxu1  ;;  %v2598_v43 = vadd.f32 %v1906_v61, %v1905_v18  ;;  %v1908_v23 = vpop.f32.mrb[42].mxu0  ;;  %v1120_v61 = vadd.f32 %v1898_v63, %v2553_v38 }
 0x14c   : > { %v1997_v45 = vpop.f32.mrb[43].mxu1  ;;  %v1909_v5 = vpop.f32.mrb[43].mxu0 }
 0x14d   : > { %v1998_v53 = vadd.f32 %v1997_v45, %v1996_v42  ;;  %v2601_v54 = vadd.f32 %v1909_v5, %v1908_v23  ;;  %v2603_v55 = vadd.f32 %v1995_v41, %v1101_v39 }
 0x14f   : > { %v2605_v30 = vadd.f32 %v1998_v53, %v1104_v49 }
 0x151   : > { %v1999_v57 = vpop.f32.mrb[44].mxu1  ;;  %v1911_v58 = vpop.f32.mrb[44].mxu0 }
 0x152   : > { %v2000_v19 = vpop.f32.mrb[45].mxu1  ;;  %v1912_v60 = vpop.f32.mrb[45].mxu0 }
 0x153   : > { %v2001_v1 = vadd.f32 %v2000_v19, %v1999_v57  ;;  %v2002_v35 = vpop.f32.mrb[46].mxu1  ;;  %v2608_v2 = vadd.f32 %v1912_v60, %v1911_v58  ;;  %v1914_v12 = vpop.f32.mrb[46].mxu0 }
 0x154   : > { %v2003_v26 = vpop.f32.mrb[47].mxu1  ;;  %v1915_v13 = vpop.f32.mrb[47].mxu0 }
 0x155   : > { %v2004_v6 = vadd.f32 %v2003_v26, %v2002_v35  ;;  %v2611_v44 = vadd.f32 %v1915_v13, %v1914_v12  ;;  %v2613_v15 = vadd.f32 %v2001_v1, %v1109_v0  ;;  %v1125_v35 = vadd.f32 %v2588_v20, %v2553_v38 }
 0x157   : > { %v2615_v17 = vadd.f32 %v2004_v6, %v1112_v14  ;;  %v1128_v6 = vadd.f32 %v2591_v31, %v2553_v38 }
 0x159   : > { %v2005_v21 = vpop.f32.mrb[48].mxu1  ;;  %v2083_v24 = vpop.f32.mrb[48].mxu0 }
 0x15a   : > { %v1383_v40 = vadd.f32 %v2083_v24, %v2563_v7  ;;  %v2006_v11 = vpop.f32.mrb[49].mxu1  ;;  %v1374_v50 = vpop.f32.mrb[49].mxu0 }
 0x15b   : > { %v2007_v36 = vadd.f32 %v2006_v11, %v2005_v21  ;;  %v1375_v46 = vadd.f32 %v1374_v50, %v2557_v51  ;;  %v2008_v18 = vpop.f32.mrb[50].mxu1  ;;  %v2084_v37 = vpop.f32.mrb[50].mxu0 }
 0x15c   : > { %vm1503_vm1 = vcmp.ge.f32.partialorder %v1383_v40, 0.0  ;;  %v1535_v7 = vmul.f32 0.2, %v1383_v40  ;;  %v1386_v39 = vadd.f32 %v2084_v37, %v2565_v8  ;;  %v2009_v41 = vpop.f32.mrb[51].mxu1  ;;  %v1377_v59 = vpop.f32.mrb[51].mxu0 }
 0x15d   : > { %vm1501_vm2 = vcmp.ge.f32.partialorder %v1375_v46, 0.0  ;;  %v1533_v51 = vmul.f32 0.2, %v1375_v46  ;;  %v2010_v42 = vadd.f32 %v2009_v41, %v2008_v18  ;;  %v1378_v23 = vadd.f32 %v1377_v59, %v2559_v52 }
 0x15e   : > { %v1567_v63 = vsel %vm1503_vm1, %v1383_v40, %v1535_v7  ;;  %vm1504_vm3 = vcmp.ge.f32.partialorder %v1386_v39, 0.0  ;;  %v1536_v45 = vmul.f32 0.2, %v1386_v39  ;;  %v2630_v5 = vadd.f32 %v2007_v36, %v1117_v25 }
 0x15f   : > { %1599 = vst [vmem:[%s2626_s22 + $0x10] sm:$0xff] %v1567_v63  ;;  %v1565_v49 = vsel %vm1501_vm2, %v1375_v46, %v1533_v51  ;;  %vm1502_vm4 = vcmp.ge.f32.partialorder %v1378_v23, 0.0  ;;  %v1534_v53 = vmul.f32 0.2, %v1378_v23  ;;  %v2633_v8 = vadd.f32 %v2010_v42, %v1120_v61 }
 0x160   : > { %1597 = vst [vmem:[%s2626_s22] sm:$0xff] %v1565_v49  ;;  %v1568_v57 = vsel %vm1504_vm3, %v1386_v39, %v1536_v45  ;;  %v1133_v59 = vadd.f32 %v2598_v43, %v2553_v38  ;;  %v1136_v45 = vadd.f32 %v2601_v54, %v2553_v38 }
 0x161   : > { %1600 = vst [vmem:[%s2626_s22 + $0x18] sm:$0xff] %v1568_v57  ;;  %v1566_v58 = vsel %vm1502_vm4, %v1378_v23, %v1534_v53  ;;  %v2011_v19 = vpop.f32.mrb[52].mxu1  ;;  %v2087_v60 = vpop.f32.mrb[52].mxu0 }
 0x162   : > { %1598 = vst [vmem:[%s2626_s22 + $0x8] sm:$0xff] %v1566_v58  ;;  %v1399_v52 = vadd.f32 %v2087_v60, %v2575_v47  ;;  %v2012_v0 = vpop.f32.mrb[53].mxu1  ;;  %v1390_v1 = vpop.f32.mrb[53].mxu0 }
 0x163   : > { %v2013_v12 = vadd.f32 %v2012_v0, %v2011_v19  ;;  %v1391_v26 = vadd.f32 %v1390_v1, %v2569_v27  ;;  %v2014_v13 = vpop.f32.mrb[54].mxu1  ;;  %v2088_v14 = vpop.f32.mrb[54].mxu0 }
 0x164   : > { %vm1507_vm5 = vcmp.ge.f32.partialorder %v1399_v52, 0.0  ;;  %v1539_v21 = vmul.f32 0.2, %v1399_v52  ;;  %v1402_v24 = vadd.f32 %v2088_v14, %v2577_v48  ;;  %v2015_v47 = vpop.f32.mrb[55].mxu1  ;;  %v1393_v40 = vpop.f32.mrb[55].mxu0 }
 0x165   : > { %vm1505_vm6 = vcmp.ge.f32.partialorder %v1391_v26, 0.0  ;;  %v1537_v11 = vmul.f32 0.2, %v1391_v26  ;;  %v2016_v20 = vadd.f32 %v2015_v47, %v2014_v13  ;;  %v1394_v50 = vadd.f32 %v1393_v40, %v2571_v29 }
 0x166   : > { %v1571_v27 = vsel %vm1507_vm5, %v1399_v52, %v1539_v21  ;;  %vm1508_vm7 = vcmp.ge.f32.partialorder %v1402_v24, 0.0  ;;  %v1540_v25 = vmul.f32 0.2, %v1402_v24  ;;  %v2646_v36 = vadd.f32 %v2013_v12, %v1125_v35 }
 0x167   : > { %1603 = vst [vmem:[%s2626_s22 + $0x30] sm:$0xff] %v1571_v27  ;;  %v1569_v31 = vsel %vm1505_vm6, %v1391_v26, %v1537_v11  ;;  %vm1506_vm8 = vcmp.ge.f32.partialorder %v1394_v50, 0.0  ;;  %v1538_v46 = vmul.f32 0.2, %v1394_v50  ;;  %v2649_v48 = vadd.f32 %v2016_v20, %v1128_v6 }
 0x168   : > { %1601 = vst [vmem:[%s2626_s22 + $0x20] sm:$0xff] %v1569_v31  ;;  %v1572_v18 = vsel %vm1508_vm7, %v1402_v24, %v1540_v25  ;;  %v1141_v6 = vadd.f32 %v2608_v2, %v2553_v38  ;;  %v1144_v11 = vadd.f32 %v2611_v44, %v2553_v38 }
 0x169   : > { %1604 = vst [vmem:[%s2626_s22 + $0x38] sm:$0xff] %v1572_v18  ;;  %v1570_v37 = vsel %vm1506_vm8, %v1394_v50, %v1538_v46  ;;  %v2017_v61 = vpop.f32.mrb[56].mxu1  ;;  %v2091_v7 = vpop.f32.mrb[56].mxu0 }
 0x16a   : > { %1602 = vst [vmem:[%s2626_s22 + $0x28] sm:$0xff] %v1570_v37  ;;  %v1415_v29 = vadd.f32 %v2091_v7, %v2593_v32  ;;  %v2018_v39 = vpop.f32.mrb[57].mxu1  ;;  %v1406_v41 = vpop.f32.mrb[57].mxu0 }
 0x16b   : > { %v2019_v51 = vadd.f32 %v2018_v39, %v2017_v61  ;;  %v1407_v42 = vadd.f32 %v1406_v41, %v2583_v3  ;;  %v2020_v23 = vpop.f32.mrb[58].mxu1  ;;  %v2092_v63 = vpop.f32.mrb[58].mxu0 }
 0x16c   : > { %vm1511_vm9 = vcmp.ge.f32.partialorder %v1415_v29, 0.0  ;;  %v1543_v49 = vmul.f32 0.2, %v1415_v29  ;;  %v1418_v53 = vadd.f32 %v2092_v63, %v2595_v33  ;;  %v2021_v32 = vpop.f32.mrb[59].mxu1  ;;  %v1409_v57 = vpop.f32.mrb[59].mxu0 }
 0x16d   : > { %vm1509_vm10 = vcmp.ge.f32.partialorder %v1407_v42, 0.0  ;;  %v1541_v58 = vmul.f32 0.2, %v1407_v42  ;;  %v2022_v43 = vadd.f32 %v2021_v32, %v2020_v23  ;;  %v1410_v19 = vadd.f32 %v1409_v57, %v2585_v9 }
 0x16e   : > { %v1575_v3 = vsel %vm1511_vm9, %v1415_v29, %v1543_v49  ;;  %vm1512_vm11 = vcmp.ge.f32.partialorder %v1418_v53, 0.0  ;;  %v1544_v60 = vmul.f32 0.2, %v1418_v53  ;;  %v2662_v52 = vadd.f32 %v2019_v51, %v1133_v59 }
 0x16f   : > { %1607 = vst [vmem:[%s2626_s22 + $0x50] sm:$0xff] %v1575_v3  ;;  %v1573_v54 = vsel %vm1509_vm10, %v1407_v42, %v1541_v58  ;;  %vm1510_vm12 = vcmp.ge.f32.partialorder %v1410_v19, 0.0  ;;  %v1542_v0 = vmul.f32 0.2, %v1410_v19  ;;  %v2665_v33 = vadd.f32 %v2022_v43, %v1136_v45 }
 0x170   : > { %1605 = vst [vmem:[%s2626_s22 + $0x40] sm:$0xff] %v1573_v54  ;;  %v1576_v1 = vsel %vm1512_vm11, %v1418_v53, %v1544_v60  ;;  %v1149_v51 = vadd.f32 %v2534_v56, %v2553_v38  ;;  %v1152_v49 = vadd.f32 %v2536_v62, %v2553_v38 }
 0x171   : > { %1608 = vst [vmem:[%s2626_s22 + $0x58] sm:$0xff] %v1576_v1  ;;  %v1574_v35 = vsel %vm1510_vm12, %v1410_v19, %v1542_v0  ;;  %v2023_v12 = vpop.f32.mrb[60].mxu1  ;;  %v2095_v26 = vpop.f32.mrb[60].mxu0 }
 0x172   : > { %1606 = vst [vmem:[%s2626_s22 + $0x48] sm:$0xff] %v1574_v35  ;;  %v1431_v9 = vadd.f32 %v2095_v26, %v2613_v15  ;;  %v2024_v13 = vpop.f32.mrb[61].mxu1  ;;  %v1422_v14 = vpop.f32.mrb[61].mxu0 }
 0x173   : > { %v2025_v21 = vadd.f32 %v2024_v13, %v2023_v12  ;;  %v1423_v24 = vadd.f32 %v1422_v14, %v2603_v55  ;;  %v2026_v47 = vpop.f32.mrb[62].mxu1  ;;  %v2096_v40 = vpop.f32.mrb[62].mxu0 }
 0x174   : > { %vm1515_vm13 = vcmp.ge.f32.partialorder %v1431_v9, 0.0  ;;  %v1547_v20 = vmul.f32 0.2, %v1431_v9  ;;  %v1434_v50 = vadd.f32 %v2096_v40, %v2615_v17  ;;  %v2027_v15 = vpop.f32.mrb[63].mxu1  ;;  %v1425_v27 = vpop.f32.mrb[63].mxu0 }
 0x175   : > { %vm1513_vm14 = vcmp.ge.f32.partialorder %v1423_v24, 0.0  ;;  %v1545_v25 = vmul.f32 0.2, %v1423_v24  ;;  %v2028_v2 = vadd.f32 %v2027_v15, %v2026_v47  ;;  %v1426_v31 = vadd.f32 %v1425_v27, %v2605_v30 }
 0x176   : > { %v1579_v55 = vsel %vm1515_vm13, %v1431_v9, %v1547_v20  ;;  %vm1516_vm15 = vcmp.ge.f32.partialorder %v1434_v50, 0.0  ;;  %v1548_v46 = vmul.f32 0.2, %v1434_v50  ;;  %v1302_v18 = vadd.f32 %v2025_v21, %v1141_v6 }
 0x177   : > { %1611 = vst [vmem:[%s2626_s22 + $0x70] sm:$0xff] %v1579_v55  ;;  %v1577_v44 = vsel %vm1513_vm14, %v1423_v24, %v1545_v25  ;;  %vm1514_vm0 = vcmp.ge.f32.partialorder %v1426_v31, 0.0  ;;  %v1546_v37 = vmul.f32 0.2, %v1426_v31  ;;  %v1305_v61 = vadd.f32 %v2028_v2, %v1144_v11 }
 0x178   : > { %1609 = vst [vmem:[%s2626_s22 + $0x60] sm:$0xff] %v1577_v44  ;;  %v1580_v17 = vsel %vm1516_vm15, %v1434_v50, %v1548_v46  ;;  %v1157_v9 = vadd.f32 %v2538_v4, %v2553_v38  ;;  %v1160_v24 = vadd.f32 %v2540_v10, %v2553_v38 }
 0x179   : > { %1612 = vst [vmem:[%s2626_s22 + $0x78] sm:$0xff] %v1580_v17  ;;  %v1578_v7 = vsel %vm1514_vm0, %v1426_v31, %v1546_v37  ;;  %v2029_v29 = vpop.f32.mrb[64].mxu1  ;;  %v2099_v39 = vpop.f32.mrb[64].mxu0  ;;  %v1165_v17 = vadd.f32 %v2542_v16, %v2553_v38 }
 0x17a   : > { %1610 = vst [vmem:[%s2626_s22 + $0x68] sm:$0xff] %v1578_v7  ;;  %v1447_v41 = vadd.f32 %v2099_v39, %v2646_v36  ;;  %v2030_v30 = vpop.f32.mrb[65].mxu1  ;;  %v1438_v59 = vpop.f32.mrb[65].mxu0 }
 0x17b   : > { %v2031_v42 = vadd.f32 %v2030_v30, %v2029_v29  ;;  %v1439_v23 = vadd.f32 %v1438_v59, %v2630_v5  ;;  %v2032_v63 = vpop.f32.mrb[66].mxu1  ;;  %v2100_v45 = vpop.f32.mrb[66].mxu0  ;;  %v1168_v30 = vadd.f32 %v2544_v22, %v2553_v38 }
 0x17c   : > { %vm1519_vm1 = vcmp.ge.f32.partialorder %v1447_v41, 0.0  ;;  %v1551_v53 = vmul.f32 0.2, %v1447_v41  ;;  %v1450_v32 = vadd.f32 %v2100_v45, %v2649_v48  ;;  %v2033_v36 = vpop.f32.mrb[67].mxu1  ;;  %v1441_v57 = vpop.f32.mrb[67].mxu0 }
 0x17d   : > { %vm1517_vm2 = vcmp.ge.f32.partialorder %v1439_v23, 0.0  ;;  %v1549_v58 = vmul.f32 0.2, %v1439_v23  ;;  %v2034_v56 = vadd.f32 %v2033_v36, %v2032_v63  ;;  %v1442_v43 = vadd.f32 %v1441_v57, %v2633_v8 }
 0x17e   : > { %v1583_v5 = vsel %vm1519_vm1, %v1447_v41, %v1551_v53  ;;  %vm1520_vm3 = vcmp.ge.f32.partialorder %v1450_v32, 0.0  ;;  %v1552_v19 = vmul.f32 0.2, %v1450_v32  ;;  %v1310_v3 = vadd.f32 %v2031_v42, %v1149_v51 }
 0x17f   : > { %1615 = vst [vmem:[%s2626_s22 + $0x90] sm:$0xff] %v1583_v5  ;;  %v1581_v62 = vsel %vm1517_vm2, %v1439_v23, %v1549_v58  ;;  %vm1518_vm4 = vcmp.ge.f32.partialorder %v1442_v43, 0.0  ;;  %v1550_v60 = vmul.f32 0.2, %v1442_v43  ;;  %v1313_v54 = vadd.f32 %v2034_v56, %v1152_v49 }
 0x180   : > { %1613 = vst [vmem:[%s2626_s22 + $0x80] sm:$0xff] %v1581_v62  ;;  %v1584_v48 = vsel %vm1520_vm3, %v1450_v32, %v1552_v19  ;;  %v1173_v62 = vadd.f32 %v2546_v28, %v2553_v38 }
 0x181   : > { %1616 = vst [vmem:[%s2626_s22 + $0x98] sm:$0xff] %v1584_v48  ;;  %v1582_v0 = vsel %vm1518_vm4, %v1442_v43, %v1550_v60  ;;  %v2035_v1 = vpop.f32.mrb[68].mxu1  ;;  %v2103_v35 = vpop.f32.mrb[68].mxu0 }
 0x182   : > { %1614 = vst [vmem:[%s2626_s22 + $0x88] sm:$0xff] %v1582_v0  ;;  %v1463_v12 = vadd.f32 %v2103_v35, %v1302_v18  ;;  %v2036_v26 = vpop.f32.mrb[69].mxu1  ;;  %v1454_v8 = vpop.f32.mrb[69].mxu0 }
 0x183   : > { %v2037_v13 = vadd.f32 %v2036_v26, %v2035_v1  ;;  %v1455_v14 = vadd.f32 %v1454_v8, %v2662_v52  ;;  %v2038_v6 = vpop.f32.mrb[70].mxu1  ;;  %v2104_v21 = vpop.f32.mrb[70].mxu0  ;;  %v1176_v1 = vadd.f32 %v2548_v34, %v2553_v38 }
 0x184   : > { %vm1523_vm5 = vcmp.ge.f32.partialorder %v1463_v12, 0.0  ;;  %v1555_v47 = vmul.f32 0.2, %v1463_v12  ;;  %v1466_v40 = vadd.f32 %v2104_v21, %v1305_v61  ;;  %v2039_v11 = vpop.f32.mrb[71].mxu1  ;;  %v1457_v20 = vpop.f32.mrb[71].mxu0 }
 0x185   : > { %vm1521_vm6 = vcmp.ge.f32.partialorder %v1455_v14, 0.0  ;;  %v1553_v50 = vmul.f32 0.2, %v1455_v14  ;;  %v2040_v15 = vadd.f32 %v2039_v11, %v2038_v6  ;;  %v1458_v4 = vadd.f32 %v1457_v20, %v2665_v33 }
 0x186   : > { %v1587_v52 = vsel %vm1523_vm5, %v1463_v12, %v1555_v47  ;;  %vm1524_vm7 = vcmp.ge.f32.partialorder %v1466_v40, 0.0  ;;  %v1556_v27 = vmul.f32 0.2, %v1466_v40  ;;  %v1318_v25 = vadd.f32 %v2037_v13, %v1157_v9 }
 0x187   : > { %1619 = vst [vmem:[%s2626_s22 + $0xb0] sm:$0xff] %v1587_v52  ;;  %v1585_v2 = vsel %vm1521_vm6, %v1455_v14, %v1553_v50  ;;  %vm1522_vm8 = vcmp.ge.f32.partialorder %v1458_v4, 0.0  ;;  %v1554_v10 = vmul.f32 0.2, %v1458_v4  ;;  %v1321_v31 = vadd.f32 %v2040_v15, %v1160_v24 }
 0x188   : > { %1617 = vst [vmem:[%s2626_s22 + $0xa0] sm:$0xff] %v1585_v2  ;;  %v1588_v55 = vsel %vm1524_vm7, %v1466_v40, %v1556_v27 }
 0x189   : > { %1620 = vst [vmem:[%s2626_s22 + $0xb8] sm:$0xff] %v1588_v55  ;;  %v1586_v46 = vsel %vm1522_vm8, %v1458_v4, %v1554_v10  ;;  %v2041_v18 = vpop.f32.mrb[72].mxu1  ;;  %v2107_v44 = vpop.f32.mrb[72].mxu0 }
 0x18a   : > { %1618 = vst [vmem:[%s2626_s22 + $0xa8] sm:$0xff] %v1586_v46  ;;  %v1479_v37 = vadd.f32 %v2107_v44, %v1318_v25  ;;  %v2042_v61 = vpop.f32.mrb[73].mxu1  ;;  %v1470_v33 = vpop.f32.mrb[73].mxu0 }
 0x18b   : > { %v2043_v7 = vadd.f32 %v2042_v61, %v2041_v18  ;;  %v1471_v29 = vadd.f32 %v1470_v33, %v1310_v3  ;;  %v2044_v39 = vpop.f32.mrb[74].mxu1  ;;  %v2108_v41 = vpop.f32.mrb[74].mxu0 }
 0x18c   : > { %vm1527_vm9 = vcmp.ge.f32.partialorder %v1479_v37, 0.0  ;;  %v1559_v59 = vmul.f32 0.2, %v1479_v37  ;;  %v1482_v51 = vadd.f32 %v2108_v41, %v1321_v31  ;;  %v2045_v42 = vpop.f32.mrb[75].mxu1  ;;  %v1473_v23 = vpop.f32.mrb[75].mxu0 }
 0x18d   : > { %vm1525_vm10 = vcmp.ge.f32.partialorder %v1471_v29, 0.0  ;;  %v1557_v63 = vmul.f32 0.2, %v1471_v29  ;;  %v2046_v45 = vadd.f32 %v2045_v42, %v2044_v39  ;;  %v1474_v49 = vadd.f32 %v1473_v23, %v1313_v54 }
 0x18e   : > { %v1591_v16 = vsel %vm1527_vm9, %v1479_v37, %v1559_v59  ;;  %vm1528_vm11 = vcmp.ge.f32.partialorder %v1482_v51, 0.0  ;;  %v1560_v53 = vmul.f32 0.2, %v1482_v51  ;;  %v1326_v32 = vadd.f32 %v2043_v7, %v1165_v17 }
 0x18f   : > { %1623 = vst [vmem:[%s2626_s22 + $0xd0] sm:$0xff] %v1591_v16  ;;  %v1589_v36 = vsel %vm1525_vm10, %v1471_v29, %v1557_v63  ;;  %vm1526_vm12 = vcmp.ge.f32.partialorder %v1474_v49, 0.0  ;;  %v1558_v22 = vmul.f32 0.2, %v1474_v49  ;;  %v1329_v57 = vadd.f32 %v2046_v45, %v1168_v30 }
 0x190   : > { %1621 = vst [vmem:[%s2626_s22 + $0xc0] sm:$0xff] %v1589_v36  ;;  %v1592_v58 = vsel %vm1528_vm11, %v1482_v51, %v1560_v53 }
 0x191   : > { %1624 = vst [vmem:[%s2626_s22 + $0xd8] sm:$0xff] %v1592_v58  ;;  %v1590_v56 = vsel %vm1526_vm12, %v1474_v49, %v1558_v22  ;;  %v2047_v43 = vpop.f32.mrb[76].mxu1  ;;  %v2111_v5 = vpop.f32.mrb[76].mxu0 }
 0x192   : > { %1622 = vst [vmem:[%s2626_s22 + $0xc8] sm:$0xff] %v1590_v56  ;;  %v2048_v19 = vpop.f32.mrb[77].mxu1  ;;  %v1486_v3 = vpop.f32.mrb[77].mxu0 }
 0x193   : > { %v2049_v60 = vadd.f32 %v2048_v19, %v2047_v43  ;;  %v1487_v54 = vadd.f32 %v1486_v3, %v1326_v32  ;;  %v2050_v48 = vpop.f32.mrb[78].mxu1  ;;  %v2112_v0 = vpop.f32.mrb[78].mxu0 }
 0x194   : > { %v2051_v35 = vpop.f32.mrb[79].mxu1  ;;  %v1489_v12 = vpop.f32.mrb[79].mxu0 }
 0x195   : > { %v1334_v26 = vadd.f32 %v2049_v60, %v1173_v62  ;;  %vm1529_vm13 = vcmp.ge.f32.partialorder %v1487_v54, 0.0  ;;  %v1561_v8 = vmul.f32 0.2, %v1487_v54  ;;  %v2052_v9 = vadd.f32 %v2051_v35, %v2050_v48 }
 0x196   : > { %v1490_v13 = vadd.f32 %v1489_v12, %v1329_v57 }
 0x197   : > { %v1495_v14 = vadd.f32 %v2111_v5, %v1334_v26  ;;  %v1593_v28 = vsel %vm1529_vm13, %v1487_v54, %v1561_v8  ;;  %v1337_v6 = vadd.f32 %v2052_v9, %v1176_v1 }
 0x198   : > { %1625 = vst [vmem:[%s2626_s22 + $0xe0] sm:$0xff] %v1593_v28  ;;  %vm1530_vm14 = vcmp.ge.f32.partialorder %v1490_v13, 0.0  ;;  %v1562_v21 = vmul.f32 0.2, %v1490_v13 }
 0x199   : > { %vm1531_vm15 = vcmp.ge.f32.partialorder %v1495_v14, 0.0  ;;  %v1563_v24 = vmul.f32 0.2, %v1495_v14  ;;  %v1498_v47 = vadd.f32 %v2112_v0, %v1337_v6 }
 0x19a   : > { %v1594_v34 = vsel %vm1530_vm14, %v1490_v13, %v1562_v21 }
 0x19b   : > { %v1595_v38 = vsel %vm1531_vm15, %v1495_v14, %v1563_v24  ;;  %vm1532_vm0 = vcmp.ge.f32.partialorder %v1498_v47, 0.0  ;;  %v1564_v40 = vmul.f32 0.2, %v1498_v47  ;;  %1626 = vst [vmem:[%s2626_s22 + $0xe8] sm:$0xff] %v1594_v34 }
 0x19c   : > { %1627 = vst [vmem:[%s2626_s22 + $0xf0] sm:$0xff] %v1595_v38 }
 0x19d   : > { %v1596_v11 = vsel %vm1532_vm0, %v1498_v47, %v1564_v40 }
 0x19e   : > { %1628 = vst [vmem:[%s2626_s22 + $0xf8] sm:$0xff] %v1596_v11 }
 0x19f PF: > { %s13_s12 = sadd.s32 1, %s2292_s12  }
 0x1a0   : > { %p10_p4 = scmp.ge.s32.totalorder %s13_s12, 4  }
 0x1a2   :  { %12 = sbr.rel (!%p10_p4) target bundleno = 1 (0x1), region = 62 }

// kernel: residual_dense_block.8
= control target key start
LH: loop header
LB: loop body
LE: loop exit
PB: predicated region body
PF: predicated region fallthrough
CT: control target
= control target key end

     0   :  { %s2458_s12 = smov 0   ;;  %s2908_s0 = inlined_call_operand.vmem [shape: bf16[512,720], index: 0, kind: input, shape index: {}]   ;;  %s2909_s1 = inlined_call_operand.vmem [shape: bf16[720,128], index: 1, kind: input, shape index: {}]   ;;  %s2910_s2 = inlined_call_operand.vmem [shape: f32[1,128], index: 2, kind: input, shape index: {}]   ;;  %s2911_s3 = inlined_call_operand.vmem [shape: f32[512,128], index: 3, kind: output, shape index: {}]  }
   0x1 LB: > { %s1821_s13 = sadd.s32 4294967295, %s2435_s12   ;;  %p1825_p0 = scmp.ge.s32.totalorder %s2435_s12, 1  ;;  %s2435_s12 = sphi %s2458_s12, %s13_s12  }
   0x2   : > { %p139_p1 = scmp.lt.s32.totalorder %s2435_s12, 3 }
   0x4   : > { %p140_p2 = pnand %p1825_p0, %p139_p1 }
   0x5   : > { %v2240_v0 = vld [vmem:[%s2909_s1 + $0x40] sm:$0xff] (!%p140_p2)   ;;  %s1826_s16 = sshll.u32 (!%p140_p2), %s1821_s13, 5  ;;  %v2242_v2 = vld [vmem:[%s2909_s1 + $0x48] sm:$0xff] (!%p140_p2)   ;;  %v2244_v4 = vld [vmem:[%s2909_s1 + $0x50] sm:$0xff] (!%p140_p2)   ;;  %v2437_v23 = vmov (!%p140_p2), 0   ;;  %vm1105_vm0 = vcmask (!%p140_p2), 654336  }
   0x6   : > { %143 = sbr.rel (%p140_p2) target bundleno = 447 (0x1bf), region = 32  ;;  %v2241_v1 = vld [vmem:[%s2909_s1] sm:$0xff] (!%p140_p2)   ;;  %2214 = vmatprep.subr.bf16.mxu1 (!%p140_p2), %v2240_v0  ;;  %1990 = vmatprep.subr.bf16.mxu0 (!%p140_p2), %v2240_v0  ;;  %p165_p3 = scmp.lt.s32.totalorder (!%p140_p2), %s1826_s16, 63  ;;  %v2243_v3 = vld [vmem:[%s2909_s1 + $0x8] sm:$0xff] (!%p140_p2)   ;;  %v2245_v5 = vld [vmem:[%s2909_s1 + $0x10] sm:$0xff] (!%p140_p2)  }
   0x7   : > { %2222 = vmatpush3.bf16.msra.mxu1 (!%p140_p2), %v2241_v1  ;;  %1991 = vmatpush3.bf16.msra.mxu0 (!%p140_p2), %v2241_v1  ;;  %v2246_v6 = vld [vmem:[%s2909_s1 + $0x58] sm:$0xff] (!%p140_p2)   ;;  %v2248_v8 = vld [vmem:[%s2909_s1 + $0x60] sm:$0xff] (!%p140_p2)   ;;  %v2250_v10 = vld [vmem:[%s2909_s1 + $0x68] sm:$0xff] (!%p140_p2)  }
   0x8   : > { %2215 = vmatprep.subr.bf16.mxu1 (!%p140_p2), %v2242_v2  ;;  %1992 = vmatprep.subr.bf16.mxu0 (!%p140_p2), %v2242_v2  ;;  %v2247_v7 = vld [vmem:[%s2909_s1 + $0x18] sm:$0xff] (!%p140_p2)   ;;  %v2249_v9 = vld [vmem:[%s2909_s1 + $0x20] sm:$0xff] (!%p140_p2)   ;;  %v2251_v12 = vld [vmem:[%s2909_s1 + $0x28] sm:$0xff] (!%p140_p2)  }
   0x9   : > { %v2252_v13 = vld [vmem:[%s2909_s1 + $0x70] sm:$0xff] (!%p140_p2)   ;;  %v2254_v16 = vld [vmem:[%s2909_s1 + $0x78] sm:$0xff] (!%p140_p2)   ;;  %v2259_v19 = vld [vmem:[%s2909_s1 + $0xc0] sm:$0xff] (!%p140_p2)  }
   0xa   : > { %v2253_v15 = vld [vmem:[%s2909_s1 + $0x30] sm:$0xff] (!%p140_p2)   ;;  %v2255_v17 = vld [vmem:[%s2909_s1 + $0x38] sm:$0xff] (!%p140_p2)   ;;  %v2260_v20 = vld [vmem:[%s2909_s1 + $0x80] sm:$0xff] (!%p140_p2)  }
   0xb   : > { %2223 = vmatpush3.bf16.msra.mxu1 (!%p140_p2), %v2243_v3  ;;  %1993 = vmatpush3.bf16.msra.mxu0 (!%p140_p2), %v2243_v3  ;;  %v2264_v22 = vld [vmem:[%s2909_s1 + $0x100] sm:$0xff] (!%p140_p2)   ;;  %v2268_v25 = vld [vmem:[%s2909_s1 + $0xc8] sm:$0xff] (!%p140_p2)   ;;  %v2277_v30 = vld [vmem:[%s2909_s1 + $0xd0] sm:$0xff] (!%p140_p2)  }
   0xc   : > { %2216 = vmatprep.subr.bf16.mxu1 (!%p140_p2), %v2244_v4  ;;  %1994 = vmatprep.subr.bf16.mxu0 (!%p140_p2), %v2244_v4  ;;  %v2269_v27 = vld [vmem:[%s2909_s1 + $0x88] sm:$0xff] (!%p140_p2)   ;;  %v2278_v33 = vld [vmem:[%s2909_s1 + $0x110] sm:$0xff] (!%p140_p2)   ;;  %v2287_v36 = vld [vmem:[%s2909_s1 + $0xd8] sm:$0xff] (!%p140_p2)  }
   0xd   : > { %s2913_s16 = smov (!%p165_p3, %s1826_s16), 63  ;;  %v2273_v28 = vld [vmem:[%s2909_s1 + $0x108] sm:$0xff]   ;;  %v2279_v34 = vld [vmem:[%s2909_s1 + $0x90] sm:$0xff]   ;;  %v2283_v37 = vld [vmem:[%s2909_s1 + $0x118] sm:$0xff]  }
   0xe   : > { %s2230_s29 = smul.u32 24, %s2913_s16  ;;  %v2288_v40 = vld [vmem:[%s2909_s1 + $0x98] sm:$0xff]   ;;  %v2297_v41 = vld [vmem:[%s2909_s1 + $0xe0] sm:$0xff]   ;;  %v2306_v46 = vld [vmem:[%s2909_s1 + $0xe8] sm:$0xff]  }
   0xf   : > { %2224 = vmatpush3.bf16.msra.mxu1 %v2245_v5  ;;  %1995 = vmatpush3.bf16.msra.mxu0 %v2245_v5  ;;  %v2291_v44 = vld [vmem:[%s2909_s1 + $0x120] sm:$0xff]   ;;  %v2295_v47 = vld [vmem:[%s2909_s1 + $0x128] sm:$0xff]   ;;  %v2302_v53 = vld [vmem:[%s2909_s1 + $0x130] sm:$0xff]  }
  0x10   : > { %2217 = vmatprep.subr.bf16.mxu1 %v2246_v6  ;;  %1996 = vmatprep.subr.bf16.mxu0 %v2246_v6  ;;  %s2499_s9 = scalar_lea.vmem %s2908_s0, %s2230_s29  ;;  %v2298_v45 = vld [vmem:[%s2909_s1 + $0xa0] sm:$0xff]   ;;  %v2307_v50 = vld [vmem:[%s2909_s1 + $0xa8] sm:$0xff]   ;;  %v2316_v54 = vld [vmem:[%s2909_s1 + $0xf0] sm:$0xff]  }
  0x11   : > { %v2258_v11 = vld [vmem:[%s2499_s9 + $0x184] ss:$24 sps:$4 sm:$0xff]   ;;  %v2256_v18 = vld [vmem:[%s2499_s9 + $0x180] ss:$24 sps:$4 sm:$0xff]   ;;  %v2265_v24 = vld [vmem:[%s2499_s9 + $0x1b4] ss:$24 sps:$4 sm:$0xff]  }
  0x12   : > { %v2263_v14 = vld [vmem:[%s2499_s9 + $0x4] ss:$24 sps:$4 sm:$0xff]   ;;  %1250 = vmatprep.mubr.bf16.mxu1 %v2258_v11  ;;  %v2261_v21 = vld [vmem:[%s2499_s9] ss:$24 sps:$4 sm:$0xff]   ;;  %v2270_v26 = vld [vmem:[%s2499_s9 + $0x34] ss:$24 sps:$4 sm:$0xff]  }
  0x13   : > { %2225 = vmatpush3.bf16.msra.mxu1 %v2247_v7  ;;  %1997 = vmatpush3.bf16.msra.mxu0 %v2247_v7  ;;  %v2267_v29 = vld [vmem:[%s2499_s9 + $0x1b0] ss:$24 sps:$4 sm:$0xff]   ;;  %v2274_v32 = vld [vmem:[%s2499_s9 + $0x1e4] ss:$24 sps:$4 sm:$0xff]   ;;  %v2276_v38 = vld [vmem:[%s2499_s9 + $0x1e0] ss:$24 sps:$4 sm:$0xff]  }
  0x14   : > { %2218 = vmatprep.subr.bf16.mxu1 %v2248_v8  ;;  %1998 = vmatprep.subr.bf16.mxu0 %v2248_v8  ;;  %v2272_v31 = vld [vmem:[%s2499_s9 + $0x30] ss:$24 sps:$4 sm:$0xff]   ;;  %v2280_v35 = vld [vmem:[%s2499_s9 + $0x64] ss:$24 sps:$4 sm:$0xff]   ;;  %v2282_v39 = vld [vmem:[%s2499_s9 + $0x60] ss:$24 sps:$4 sm:$0xff]  }
  0x15   : > { %1186 = vmatprep.mubr.bf16.mxu0 %v2263_v14  ;;  %v2284_v42 = vld [vmem:[%s2499_s9 + $0x214] ss:$24 sps:$4 sm:$0xff]   ;;  %v2286_v48 = vld [vmem:[%s2499_s9 + $0x210] ss:$24 sps:$4 sm:$0xff]   ;;  %v2293_v51 = vld [vmem:[%s2499_s9 + $0x244] ss:$24 sps:$4 sm:$0xff]  }
  0x16   : > { %v2289_v43 = vld [vmem:[%s2499_s9 + $0x94] ss:$24 sps:$4 sm:$0xff]   ;;  %v2292_v49 = vld [vmem:[%s2499_s9 + $0x90] ss:$24 sps:$4 sm:$0xff]   ;;  %v2299_v52 = vld [vmem:[%s2499_s9 + $0xc4] ss:$24 sps:$4 sm:$0xff]  }
  0x17   : > { %2226 = vmatpush3.bf16.msra.mxu1 %v2249_v9  ;;  %1999 = vmatpush3.bf16.msra.mxu0 %v2249_v9  ;;  %v2317_v55 = vld [vmem:[%s2909_s1 + $0xb0] sm:$0xff]   ;;  %v2308_v56 = vld [vmem:[%s2909_s1 + $0x138] sm:$0xff]   ;;  %v2312_v63 = vld [vmem:[%s2909_s1 + $0x140] sm:$0xff]  }
  0x18   : > { %2219 = vmatprep.subr.bf16.mxu1 %v2250_v10  ;;  %2000 = vmatprep.subr.bf16.mxu0 %v2250_v10  ;;  %v2296_v57 = vld [vmem:[%s2499_s9 + $0x240] ss:$24 sps:$4 sm:$0xff]   ;;  %v2303_v60 = vld [vmem:[%s2499_s9 + $0x274] ss:$24 sps:$4 sm:$0xff]   ;;  %v2305_v1 = vld [vmem:[%s2499_s9 + $0x270] ss:$24 sps:$4 sm:$0xff]  }
  0x19   : > { %v2301_v58 = vld [vmem:[%s2499_s9 + $0xc0] ss:$24 sps:$4 sm:$0xff]   ;;  %v2309_v62 = vld [vmem:[%s2499_s9 + $0xf4] ss:$24 sps:$4 sm:$0xff]   ;;  %v2311_v2 = vld [vmem:[%s2499_s9 + $0xf0] ss:$24 sps:$4 sm:$0xff]  }
  0x1a   : > { %v2325_v59 = vld [vmem:[%s2909_s1 + $0xf8] sm:$0xff]   ;;  %v2321_v0 = vld [vmem:[%s2909_s1 + $0x148] sm:$0xff]   ;;  %v2326_v5 = vld [vmem:[%s2909_s1 + $0x150] sm:$0xff]  }
  0x1b   : > { %2227 = vmatpush3.bf16.msra.mxu1 %v2251_v12  ;;  %2001 = vmatpush3.bf16.msra.mxu0 %v2251_v12  ;;  %v2327_v61 = vld [vmem:[%s2909_s1 + $0xb8] sm:$0xff]   ;;  %v2322_v9 = vld [vmem:[%s2499_s9 + $0x2d4] ss:$24 sps:$4 sm:$0xff]   ;;  %v2335_v11 = vld [vmem:[%s2909_s1 + $0x160] sm:$0xff]  }
  0x1c   : > { %2220 = vmatprep.subr.bf16.mxu1 %v2252_v13  ;;  %2002 = vmatprep.subr.bf16.mxu0 %v2252_v13  ;;  %v2313_v3 = vld [vmem:[%s2499_s9 + $0x2a4] ss:$24 sps:$4 sm:$0xff]   ;;  %v2315_v7 = vld [vmem:[%s2499_s9 + $0x2a0] ss:$24 sps:$4 sm:$0xff]   ;;  %v2328_v10 = vld [vmem:[%s2499_s9 + $0x154] ss:$24 sps:$4 sm:$0xff]  }
  0x1d   : > { %v2318_v4 = vld [vmem:[%s2499_s9 + $0x124] ss:$24 sps:$4 sm:$0xff]   ;;  %v2320_v8 = vld [vmem:[%s2499_s9 + $0x120] ss:$24 sps:$4 sm:$0xff]   ;;  %v2324_v12 = vld [vmem:[%s2499_s9 + $0x2d0] ss:$24 sps:$4 sm:$0xff]  }
  0x1e   : > { %v2331_v6 = vld [vmem:[%s2909_s1 + $0x158] sm:$0xff]   ;;  %v2330_v13 = vld [vmem:[%s2499_s9 + $0x150] ss:$24 sps:$4 sm:$0xff]   ;;  %v2334_v14 = vld [vmem:[%s2499_s9 + $0xc] ss:$24 sps:$4 sm:$0xff]  }
  0x1f   : > { %2228 = vmatpush3.bf16.msra.mxu1 %v2253_v15  ;;  %2003 = vmatpush3.bf16.msra.mxu0 %v2253_v15  ;;  %v2338_v15 = vld [vmem:[%s2499_s9 + $0x14] ss:$24 sps:$4 sm:$0xff]  }
  0x20   : > { %2221 = vmatprep.subr.bf16.mxu1 %v2254_v16  ;;  %2004 = vmatprep.subr.bf16.mxu0 %v2254_v16  ;;  %v2332_v16 = vld [vmem:[%s2499_s9 + $0x8] ss:$24 sps:$4 sm:$0xff]  }
  0x23   : > { %2229 = vmatpush3.bf16.msra.mxu1 %v2255_v17  ;;  %2005 = vmatpush3.bf16.msra.mxu0 %v2255_v17  ;;  %v2336_v17 = vld [vmem:[%s2499_s9 + $0x10] ss:$24 sps:$4 sm:$0xff]  }
  0x24   : > { %2102 = vmatprep.subr.bf16.mxu1 %v2259_v19  ;;  %1476 = vmatprep.subr.bf16.mxu0 %v2437_v23  ;;  %v2342_v19 = vld [vmem:[%s2499_s9 + $0x44] ss:$24 sps:$4 sm:$0xff]  }
  0x26   : > { %1251 = vmatmul.mubr.bf16.vlgmr.msra.gmra.mrb[0].mxu1 %v2256_v18  ;;  %1187 = vmatmul.mubr.bf16.vlgmr.msra.gmra.mrb[0].mxu0 %v2261_v21  ;;  %v2339_v18 = vld [vmem:[%s2499_s9 + $0x3c] ss:$24 sps:$4 sm:$0xff]   ;;  %v2344_v21 = vld [vmem:[%s2499_s9 + $0x40] ss:$24 sps:$4 sm:$0xff]  }
  0x27   : > { %2103 = vmatpush3.bf16.msra.mxu1 %v2260_v20  ;;  %1477 = vmatpush1.bf16.msra.mxu0 %v2264_v22  ;;  %v2341_v20 = vld [vmem:[%s2499_s9 + $0x38] ss:$24 sps:$4 sm:$0xff]   ;;  %v2345_v22 = vld [vmem:[%s2499_s9 + $0x6c] ss:$24 sps:$4 sm:$0xff]  }
  0x28   : > { %1258 = vmatprep.mubr.bf16.mxu1 %v2265_v24  ;;  %2104 = vmatprep.subr.bf16.mxu1 %v2268_v25  ;;  %v2347_v24 = vld [vmem:[%s2499_s9 + $0x68] ss:$24 sps:$4 sm:$0xff]  }
  0x29   : > { %1194 = vmatprep.mubr.bf16.mxu0 %v2270_v26  ;;  %1478 = vmatprep.subr.bf16.mxu0 %v2437_v23  ;;  %v2350_v25 = vld [vmem:[%s2499_s9 + $0x70] ss:$24 sps:$4 sm:$0xff]   ;;  %v2351_v26 = vld [vmem:[%s2499_s9 + $0x9c] ss:$24 sps:$4 sm:$0xff]  }
  0x2b   : > { %2105 = vmatpush3.bf16.msra.mxu1 %v2269_v27  ;;  %1479 = vmatpush1.bf16.msra.mxu0 %v2273_v28  ;;  %v2354_v27 = vld [vmem:[%s2499_s9 + $0xa4] ss:$24 sps:$4 sm:$0xff]   ;;  %v2353_v28 = vld [vmem:[%s2499_s9 + $0x98] ss:$24 sps:$4 sm:$0xff]  }
  0x2c   : > { %1480 = vmatprep.subr.bf16.mxu0 %v2437_v23  ;;  %2106 = vmatprep.subr.bf16.mxu1 %v2277_v30  ;;  %v2357_v30 = vld [vmem:[%s2499_s9 + $0xcc] ss:$24 sps:$4 sm:$0xff]  }
  0x2e   : > { %1259 = vmatmul.mubr.bf16.gmra.mrb[4].mxu1 %v2267_v29  ;;  %1195 = vmatmul.mubr.bf16.gmra.mrb[4].mxu0 %v2272_v31  ;;  %v2356_v29 = vld [vmem:[%s2499_s9 + $0xa0] ss:$24 sps:$4 sm:$0xff]   ;;  %v2360_v31 = vld [vmem:[%s2499_s9 + $0xd4] ss:$24 sps:$4 sm:$0xff]  }
  0x2f   : > { %1266 = vmatprep.mubr.bf16.mxu1 %v2274_v32  ;;  %1481 = vmatpush1.bf16.msra.mxu0 %v2278_v33  ;;  %v2359_v32 = vld [vmem:[%s2499_s9 + $0xc8] ss:$24 sps:$4 sm:$0xff]  }
  0x30   : > { %2107 = vmatpush3.bf16.msra.mxu1 %v2279_v34  ;;  %1202 = vmatprep.mubr.bf16.mxu0 %v2280_v35  ;;  %v2362_v33 = vld [vmem:[%s2499_s9 + $0xd0] ss:$24 sps:$4 sm:$0xff]   ;;  %v2363_v34 = vld [vmem:[%s2499_s9 + $0xfc] ss:$24 sps:$4 sm:$0xff]  }
  0x31   : > { %1482 = vmatprep.subr.bf16.mxu0 %v2437_v23  ;;  %2108 = vmatprep.subr.bf16.mxu1 %v2287_v36  ;;  %v2366_v35 = vld [vmem:[%s2499_s9 + $0x104] ss:$24 sps:$4 sm:$0xff]   ;;  %v2365_v36 = vld [vmem:[%s2499_s9 + $0xf8] ss:$24 sps:$4 sm:$0xff]  }
  0x33   : > { %1483 = vmatpush1.bf16.msra.mxu0 %v2283_v37  ;;  %v2368_v37 = vld [vmem:[%s2499_s9 + $0x100] ss:$24 sps:$4 sm:$0xff]  }
  0x34   : > { %2109 = vmatpush3.bf16.msra.mxu1 %v2288_v40  ;;  %1484 = vmatprep.subr.bf16.mxu0 %v2437_v23  ;;  %v2371_v40 = vld [vmem:[%s2499_s9 + $0x128] ss:$24 sps:$4 sm:$0xff]  }
  0x35   : > { %2110 = vmatprep.subr.bf16.mxu1 %v2297_v41  ;;  %v2374_v41 = vld [vmem:[%s2499_s9 + $0x130] ss:$24 sps:$4 sm:$0xff]  }
  0x36   : > { %1267 = vmatmul.mubr.bf16.gmra.mrb[8].mxu1 %v2276_v38  ;;  %1203 = vmatmul.mubr.bf16.gmra.mrb[8].mxu0 %v2282_v39  ;;  %v2369_v38 = vld [vmem:[%s2499_s9 + $0x12c] ss:$24 sps:$4 sm:$0xff]  }
  0x37   : > { %1274 = vmatprep.mubr.bf16.mxu1 %v2284_v42  ;;  %1210 = vmatprep.mubr.bf16.mxu0 %v2289_v43  ;;  %v2372_v39 = vld [vmem:[%s2499_s9 + $0x134] ss:$24 sps:$4 sm:$0xff]   ;;  %v2378_v43 = vld [vmem:[%s2499_s9 + $0x164] ss:$24 sps:$4 sm:$0xff]  }
  0x38   : > { %1485 = vmatpush1.bf16.msra.mxu0 %v2291_v44  ;;  %2111 = vmatpush3.bf16.msra.mxu1 %v2298_v45  ;;  %v2375_v42 = vld [vmem:[%s2499_s9 + $0x15c] ss:$24 sps:$4 sm:$0xff]   ;;  %v2377_v44 = vld [vmem:[%s2499_s9 + $0x158] ss:$24 sps:$4 sm:$0xff]  }
  0x39   : > { %1486 = vmatprep.subr.bf16.mxu0 %v2437_v23  ;;  %2112 = vmatprep.subr.bf16.mxu1 %v2306_v46  ;;  %v2380_v45 = vld [vmem:[%s2499_s9 + $0x160] ss:$24 sps:$4 sm:$0xff]   ;;  %v2381_v46 = vld [vmem:[%s2499_s9 + $0x18c] ss:$24 sps:$4 sm:$0xff]  }
  0x3c   : > { %1487 = vmatpush1.bf16.msra.mxu0 %v2295_v47  ;;  %2113 = vmatpush3.bf16.msra.mxu1 %v2307_v50  ;;  %v2384_v47 = vld [vmem:[%s2499_s9 + $0x194] ss:$24 sps:$4 sm:$0xff]  }
  0x3d   : > { %1488 = vmatprep.subr.bf16.mxu0 %v2437_v23  ;;  %2114 = vmatprep.subr.bf16.mxu1 %v2316_v54  ;;  %v2387_v50 = vld [vmem:[%s2499_s9 + $0x1bc] ss:$24 sps:$4 sm:$0xff]   ;;  %v2393_v54 = vld [vmem:[%s2499_s9 + $0x1ec] ss:$24 sps:$4 sm:$0xff]  }
  0x3e   : > { %1275 = vmatmul.mubr.bf16.gmra.mrb[12].mxu1 %v2286_v48  ;;  %1211 = vmatmul.mubr.bf16.gmra.mrb[12].mxu0 %v2292_v49  ;;  %v2383_v48 = vld [vmem:[%s2499_s9 + $0x188] ss:$24 sps:$4 sm:$0xff]  }
  0x3f   : > { %1282 = vmatprep.mubr.bf16.mxu1 %v2293_v51  ;;  %1218 = vmatprep.mubr.bf16.mxu0 %v2299_v52  ;;  %v2386_v49 = vld [vmem:[%s2499_s9 + $0x190] ss:$24 sps:$4 sm:$0xff]   ;;  %v2390_v51 = vld [vmem:[%s2499_s9 + $0x1c4] ss:$24 sps:$4 sm:$0xff]  }
  0x40   : > { %1489 = vmatpush1.bf16.msra.mxu0 %v2302_v53  ;;  %2115 = vmatpush3.bf16.msra.mxu1 %v2317_v55  ;;  %v2389_v52 = vld [vmem:[%s2499_s9 + $0x1b8] ss:$24 sps:$4 sm:$0xff]   ;;  %v2396_v55 = vld [vmem:[%s2499_s9 + $0x1f4] ss:$24 sps:$4 sm:$0xff]  }
  0x41   : > { %1490 = vmatprep.subr.bf16.mxu0 %v2437_v23  ;;  %2116 = vmatprep.subr.bf16.mxu1 %v2325_v59  ;;  %v2392_v53 = vld [vmem:[%s2499_s9 + $0x1c0] ss:$24 sps:$4 sm:$0xff]   ;;  %v2402_v59 = vld [vmem:[%s2499_s9 + $0x224] ss:$24 sps:$4 sm:$0xff]  }
  0x44   : > { %1491 = vmatpush1.bf16.msra.mxu0 %v2308_v56  ;;  %2117 = vmatpush3.bf16.msra.mxu1 %v2327_v61  ;;  %v2395_v56 = vld [vmem:[%s2499_s9 + $0x1e8] ss:$24 sps:$4 sm:$0xff]  }
  0x45   : > { %1492 = vmatprep.subr.bf16.mxu0 %v2437_v23  ;;  %v2404_v61 = vld [vmem:[%s2499_s9 + $0x220] ss:$24 sps:$4 sm:$0xff]  }
  0x46   : > { %1283 = vmatmul.mubr.bf16.gmra.mrb[16].mxu1 %v2296_v57  ;;  %1219 = vmatmul.mubr.bf16.gmra.mrb[16].mxu0 %v2301_v58  ;;  %v2398_v57 = vld [vmem:[%s2499_s9 + $0x1f0] ss:$24 sps:$4 sm:$0xff]   ;;  %v2399_v58 = vld [vmem:[%s2499_s9 + $0x21c] ss:$24 sps:$4 sm:$0xff]  }
  0x47   : > { %1290 = vmatprep.mubr.bf16.mxu1 %v2303_v60  ;;  %1226 = vmatprep.mubr.bf16.mxu0 %v2309_v62  ;;  %v2401_v60 = vld [vmem:[%s2499_s9 + $0x218] ss:$24 sps:$4 sm:$0xff]   ;;  %v2405_v62 = vld [vmem:[%s2499_s9 + $0x24c] ss:$24 sps:$4 sm:$0xff]  }
  0x48   : > { %1493 = vmatpush1.bf16.msra.mxu0 %v2312_v63  ;;  %v2408_v63 = vld [vmem:[%s2499_s9 + $0x254] ss:$24 sps:$4 sm:$0xff]  }
  0x49   : > { %1494 = vmatprep.subr.bf16.mxu0 %v2437_v23 }
  0x4c   : > { %1495 = vmatpush1.bf16.msra.mxu0 %v2321_v0  ;;  %v2407_v0 = vld [vmem:[%s2499_s9 + $0x248] ss:$24 sps:$4 sm:$0xff]  }
  0x4d   : > { %1496 = vmatprep.subr.bf16.mxu0 %v2437_v23 }
  0x4e   : > { %1291 = vmatmul.mubr.bf16.gmra.mrb[20].mxu1 %v2305_v1  ;;  %1227 = vmatmul.mubr.bf16.gmra.mrb[20].mxu0 %v2311_v2  ;;  %v2410_v1 = vld [vmem:[%s2499_s9 + $0x250] ss:$24 sps:$4 sm:$0xff]   ;;  %v2411_v2 = vld [vmem:[%s2499_s9 + $0x27c] ss:$24 sps:$4 sm:$0xff]  }
  0x4f   : > { %1298 = vmatprep.mubr.bf16.mxu1 %v2313_v3  ;;  %1234 = vmatprep.mubr.bf16.mxu0 %v2318_v4  ;;  %v2414_v3 = vld [vmem:[%s2499_s9 + $0x284] ss:$24 sps:$4 sm:$0xff]   ;;  %v2413_v4 = vld [vmem:[%s2499_s9 + $0x278] ss:$24 sps:$4 sm:$0xff]  }
  0x50   : > { %1497 = vmatpush1.bf16.msra.mxu0 %v2326_v5  ;;  %v2416_v5 = vld [vmem:[%s2499_s9 + $0x280] ss:$24 sps:$4 sm:$0xff]  }
  0x51   : > { %1498 = vmatprep.subr.bf16.mxu0 %v2437_v23 }
  0x54   : > { %1499 = vmatpush1.bf16.msra.mxu0 %v2331_v6  ;;  %v2417_v6 = vld [vmem:[%s2499_s9 + $0x2ac] ss:$24 sps:$4 sm:$0xff]  }
  0x55   : > { %1500 = vmatprep.subr.bf16.mxu0 %v2437_v23  ;;  %v2348_v23 = vld [vmem:[%s2499_s9 + $0x74] ss:$24 sps:$4 sm:$0xff]  }
  0x56   : > { %1299 = vmatmul.mubr.bf16.gmra.mrb[24].mxu1 %v2315_v7  ;;  %1235 = vmatmul.mubr.bf16.gmra.mrb[24].mxu0 %v2320_v8  ;;  %v2420_v7 = vld [vmem:[%s2499_s9 + $0x2b4] ss:$24 sps:$4 sm:$0xff]   ;;  %v2419_v8 = vld [vmem:[%s2499_s9 + $0x2a8] ss:$24 sps:$4 sm:$0xff]  }
  0x57   : > { %1306 = vmatprep.mubr.bf16.mxu1 %v2322_v9  ;;  %1242 = vmatprep.mubr.bf16.mxu0 %v2328_v10  ;;  %v2422_v9 = vld [vmem:[%s2499_s9 + $0x2b0] ss:$24 sps:$4 sm:$0xff]   ;;  %v2423_v10 = vld [vmem:[%s2499_s9 + $0x2dc] ss:$24 sps:$4 sm:$0xff]  }
  0x58   : > { %1501 = vmatpush1.bf16.msra.mxu0 %v2335_v11  ;;  %v2426_v11 = vld [vmem:[%s2499_s9 + $0x2e4] ss:$24 sps:$4 sm:$0xff]  }
  0x5e   : > { %1307 = vmatmul.mubr.bf16.gmra.mrb[28].mxu1 %v2324_v12  ;;  %1243 = vmatmul.mubr.bf16.gmra.mrb[28].mxu0 %v2330_v13  ;;  %v2425_v12 = vld [vmem:[%s2499_s9 + $0x2d8] ss:$24 sps:$4 sm:$0xff]  }
  0x5f   : > { %1347 = vmatprep.mubr.bf16.mxu1 %v2334_v14  ;;  %1972 = vmatprep.mubr.msk.bf16.mxu0 %vm1105_vm0, %v2338_v15  ;;  %v2428_v13 = vld [vmem:[%s2499_s9 + $0x2e0] ss:$24 sps:$4 sm:$0xff]   ;;  %s1829_s9 = sshll.u32 %s2913_s16, 3 }
  0x60   : > { %s2827_s15 = scalar_lea.vmem %s2911_s3, %s1829_s9 }
  0x66   : > { %1348 = vmatmul.mubr.bf16.vlgmr.msra.gmra.mrb[32].mxu1 %v2332_v16  ;;  %1509 = vmatmul.mubr.bf16.vlgmr.msra.gmra.mrb[32].mxu0 %v2336_v17  ;;  %v2737_v16 = vld [vmem:[%s2910_s2] ss:$0 sm:$0xff] }
  0x67   : > { %1355 = vmatprep.mubr.bf16.mxu1 %v2339_v18  ;;  %1973 = vmatprep.mubr.msk.bf16.mxu0 %vm1105_vm0, %v2342_v19 }
  0x6e   : > { %1356 = vmatmul.mubr.bf16.gmra.mrb[36].mxu1 %v2341_v20  ;;  %1517 = vmatmul.mubr.bf16.gmra.mrb[36].mxu0 %v2344_v21 }
  0x6f   : > { %1363 = vmatprep.mubr.bf16.mxu1 %v2345_v22  ;;  %1974 = vmatprep.mubr.msk.bf16.mxu0 %vm1105_vm0, %v2348_v23 }
  0x76   : > { %1364 = vmatmul.mubr.bf16.gmra.mrb[40].mxu1 %v2347_v24  ;;  %1525 = vmatmul.mubr.bf16.gmra.mrb[40].mxu0 %v2350_v25 }
  0x77   : > { %1371 = vmatprep.mubr.bf16.mxu1 %v2351_v26  ;;  %1975 = vmatprep.mubr.msk.bf16.mxu0 %vm1105_vm0, %v2354_v27 }
  0x7e   : > { %1372 = vmatmul.mubr.bf16.gmra.mrb[44].mxu1 %v2353_v28  ;;  %1533 = vmatmul.mubr.bf16.gmra.mrb[44].mxu0 %v2356_v29 }
  0x7f   : > { %1379 = vmatprep.mubr.bf16.mxu1 %v2357_v30  ;;  %1976 = vmatprep.mubr.msk.bf16.mxu0 %vm1105_vm0, %v2360_v31 }
  0x86   : > { %1380 = vmatmul.mubr.bf16.gmra.mrb[48].mxu1 %v2359_v32  ;;  %1541 = vmatmul.mubr.bf16.gmra.mrb[48].mxu0 %v2362_v33 }
  0x87   : > { %1387 = vmatprep.mubr.bf16.mxu1 %v2363_v34  ;;  %1977 = vmatprep.mubr.msk.bf16.mxu0 %vm1105_vm0, %v2366_v35 }
  0x8e   : > { %1388 = vmatmul.mubr.bf16.gmra.mrb[52].mxu1 %v2365_v36  ;;  %1549 = vmatmul.mubr.bf16.gmra.mrb[52].mxu0 %v2368_v37 }
  0x8f   : > { %1395 = vmatprep.mubr.bf16.mxu1 %v2369_v38  ;;  %1978 = vmatprep.mubr.msk.bf16.mxu0 %vm1105_vm0, %v2372_v39 }
  0x96   : > { %1396 = vmatmul.mubr.bf16.gmra.mrb[56].mxu1 %v2371_v40  ;;  %1557 = vmatmul.mubr.bf16.gmra.mrb[56].mxu0 %v2374_v41 }
  0x97   : > { %1403 = vmatprep.mubr.bf16.mxu1 %v2375_v42  ;;  %1979 = vmatprep.mubr.msk.bf16.mxu0 %vm1105_vm0, %v2378_v43 }
  0x9e   : > { %1404 = vmatmul.mubr.bf16.gmra.mrb[60].mxu1 %v2377_v44  ;;  %1565 = vmatmul.mubr.bf16.gmra.mrb[60].mxu0 %v2380_v45 }
  0x9f   : > { %1411 = vmatprep.mubr.bf16.mxu1 %v2381_v46  ;;  %1980 = vmatprep.mubr.msk.bf16.mxu0 %vm1105_vm0, %v2384_v47 }
  0xa6   : > { %1412 = vmatmul.mubr.bf16.gmra.mrb[64].mxu1 %v2383_v48  ;;  %1573 = vmatmul.mubr.bf16.gmra.mrb[64].mxu0 %v2386_v49 }
  0xa7   : > { %1419 = vmatprep.mubr.bf16.mxu1 %v2387_v50  ;;  %1981 = vmatprep.mubr.msk.bf16.mxu0 %vm1105_vm0, %v2390_v51 }
  0xae   : > { %1420 = vmatmul.mubr.bf16.gmra.mrb[68].mxu1 %v2389_v52  ;;  %1581 = vmatmul.mubr.bf16.gmra.mrb[68].mxu0 %v2392_v53 }
  0xaf   : > { %1427 = vmatprep.mubr.bf16.mxu1 %v2393_v54  ;;  %1982 = vmatprep.mubr.msk.bf16.mxu0 %vm1105_vm0, %v2396_v55 }
  0xb6   : > { %1428 = vmatmul.mubr.bf16.gmra.mrb[72].mxu1 %v2395_v56  ;;  %1589 = vmatmul.mubr.bf16.gmra.mrb[72].mxu0 %v2398_v57 }
  0xb7   : > { %1435 = vmatprep.mubr.bf16.mxu1 %v2399_v58  ;;  %1983 = vmatprep.mubr.msk.bf16.mxu0 %vm1105_vm0, %v2402_v59 }
  0xbe   : > { %1436 = vmatmul.mubr.bf16.gmra.mrb[76].mxu1 %v2401_v60  ;;  %1597 = vmatmul.mubr.bf16.gmra.mrb[76].mxu0 %v2404_v61 }
  0xbf   : > { %1443 = vmatprep.mubr.bf16.mxu1 %v2405_v62  ;;  %1984 = vmatprep.mubr.msk.bf16.mxu0 %vm1105_vm0, %v2408_v63 }
  0xc6   : > { %1444 = vmatmul.mubr.bf16.gmra.mrb[80].mxu1 %v2407_v0  ;;  %1605 = vmatmul.mubr.bf16.gmra.mrb[80].mxu0 %v2410_v1 }
  0xc7   : > { %1451 = vmatprep.mubr.bf16.mxu1 %v2411_v2  ;;  %1985 = vmatprep.mubr.msk.bf16.mxu0 %vm1105_vm0, %v2414_v3 }
  0xce   : > { %1452 = vmatmul.mubr.bf16.gmra.mrb[84].mxu1 %v2413_v4  ;;  %1613 = vmatmul.mubr.bf16.gmra.mrb[84].mxu0 %v2416_v5 }
  0xcf   : > { %1459 = vmatprep.mubr.bf16.mxu1 %v2417_v6  ;;  %1986 = vmatprep.mubr.msk.bf16.mxu0 %vm1105_vm0, %v2420_v7 }
  0xd6   : > { %1460 = vmatmul.mubr.bf16.gmra.mrb[88].mxu1 %v2419_v8  ;;  %1621 = vmatmul.mubr.bf16.gmra.mrb[88].mxu0 %v2422_v9 }
  0xd7   : > { %1467 = vmatprep.mubr.bf16.mxu1 %v2423_v10  ;;  %1987 = vmatprep.mubr.msk.bf16.mxu0 %vm1105_vm0, %v2426_v11 }
  0xde   : > { %1468 = vmatmul.mubr.bf16.gmra.mrb[92].mxu1 %v2425_v12  ;;  %1629 = vmatmul.mubr.bf16.gmra.mrb[92].mxu0 %v2428_v13 }
  0xf9   : > { %v2054_v14 = vpop.f32.mrb[0].mxu1  ;;  %v2006_v15 = vpop.f32.mrb[0].mxu0 }
  0xfa   : > { %v2055_v17 = vpop.f32.mrb[1].mxu1  ;;  %v2007_v18 = vpop.f32.mrb[1].mxu0 }
  0xfb   : > { %v2056_v19 = vadd.f32 %v2055_v17, %v2054_v14  ;;  %v2057_v20 = vpop.f32.mrb[2].mxu1  ;;  %v2739_v21 = vadd.f32 %v2007_v18, %v2006_v15  ;;  %v2009_v22 = vpop.f32.mrb[2].mxu0 }
  0xfc   : > { %v2058_v23 = vpop.f32.mrb[3].mxu1  ;;  %v2010_v24 = vpop.f32.mrb[3].mxu0 }
  0xfd   : > { %v2742_v25 = vadd.f32 %v2056_v19, %v2737_v16  ;;  %v2059_v26 = vadd.f32 %v2058_v23, %v2057_v20  ;;  %v2744_v27 = vadd.f32 %v2010_v24, %v2009_v22 }
  0xff   : > { %v2747_v28 = vadd.f32 %v2059_v26, %v2737_v16 }
 0x101   : > { %v2060_v29 = vpop.f32.mrb[4].mxu1  ;;  %v2012_v30 = vpop.f32.mrb[4].mxu0 }
 0x102   : > { %v2061_v31 = vpop.f32.mrb[5].mxu1  ;;  %v2013_v32 = vpop.f32.mrb[5].mxu0 }
 0x103   : > { %v2062_v33 = vadd.f32 %v2061_v31, %v2060_v29  ;;  %v2063_v34 = vpop.f32.mrb[6].mxu1  ;;  %v2749_v35 = vadd.f32 %v2013_v32, %v2012_v30  ;;  %v2015_v36 = vpop.f32.mrb[6].mxu0 }
 0x104   : > { %v2064_v37 = vpop.f32.mrb[7].mxu1  ;;  %v2016_v38 = vpop.f32.mrb[7].mxu0 }
 0x105   : > { %v2752_v39 = vadd.f32 %v2062_v33, %v2737_v16  ;;  %v2065_v40 = vadd.f32 %v2064_v37, %v2063_v34  ;;  %v2754_v41 = vadd.f32 %v2016_v38, %v2015_v36 }
 0x107   : > { %v2757_v42 = vadd.f32 %v2065_v40, %v2737_v16 }
 0x109   : > { %v2066_v43 = vpop.f32.mrb[8].mxu1  ;;  %v2018_v44 = vpop.f32.mrb[8].mxu0 }
 0x10a   : > { %v2067_v45 = vpop.f32.mrb[9].mxu1  ;;  %v2019_v46 = vpop.f32.mrb[9].mxu0 }
 0x10b   : > { %v2068_v47 = vadd.f32 %v2067_v45, %v2066_v43  ;;  %v2069_v48 = vpop.f32.mrb[10].mxu1  ;;  %v2759_v49 = vadd.f32 %v2019_v46, %v2018_v44  ;;  %v2021_v50 = vpop.f32.mrb[10].mxu0 }
 0x10c   : > { %v2070_v51 = vpop.f32.mrb[11].mxu1  ;;  %v2022_v52 = vpop.f32.mrb[11].mxu0 }
 0x10d   : > { %v2762_v53 = vadd.f32 %v2068_v47, %v2737_v16  ;;  %v2071_v54 = vadd.f32 %v2070_v51, %v2069_v48  ;;  %v2764_v55 = vadd.f32 %v2022_v52, %v2021_v50 }
 0x10f   : > { %v2767_v56 = vadd.f32 %v2071_v54, %v2737_v16 }
 0x111   : > { %v2072_v57 = vpop.f32.mrb[12].mxu1  ;;  %v2024_v58 = vpop.f32.mrb[12].mxu0 }
 0x112   : > { %v2073_v59 = vpop.f32.mrb[13].mxu1  ;;  %v2025_v60 = vpop.f32.mrb[13].mxu0 }
 0x113   : > { %v2074_v61 = vadd.f32 %v2073_v59, %v2072_v57  ;;  %v2075_v62 = vpop.f32.mrb[14].mxu1  ;;  %v2769_v63 = vadd.f32 %v2025_v60, %v2024_v58  ;;  %v2027_v0 = vpop.f32.mrb[14].mxu0 }
 0x114   : > { %v2076_v1 = vpop.f32.mrb[15].mxu1  ;;  %v2028_v2 = vpop.f32.mrb[15].mxu0 }
 0x115   : > { %v2772_v3 = vadd.f32 %v2074_v61, %v2737_v16  ;;  %v2077_v4 = vadd.f32 %v2076_v1, %v2075_v62  ;;  %v2774_v5 = vadd.f32 %v2028_v2, %v2027_v0 }
 0x117   : > { %v2777_v6 = vadd.f32 %v2077_v4, %v2737_v16 }
 0x119   : > { %v2078_v7 = vpop.f32.mrb[16].mxu1  ;;  %v2030_v8 = vpop.f32.mrb[16].mxu0 }
 0x11a   : > { %v2079_v9 = vpop.f32.mrb[17].mxu1  ;;  %v2031_v10 = vpop.f32.mrb[17].mxu0 }
 0x11b   : > { %v2080_v11 = vadd.f32 %v2079_v9, %v2078_v7  ;;  %v2081_v12 = vpop.f32.mrb[18].mxu1  ;;  %v2779_v13 = vadd.f32 %v2031_v10, %v2030_v8  ;;  %v2033_v14 = vpop.f32.mrb[18].mxu0 }
 0x11c   : > { %v2082_v15 = vpop.f32.mrb[19].mxu1  ;;  %v2034_v17 = vpop.f32.mrb[19].mxu0 }
 0x11d   : > { %v2782_v18 = vadd.f32 %v2080_v11, %v2737_v16  ;;  %v2083_v19 = vadd.f32 %v2082_v15, %v2081_v12  ;;  %v2784_v20 = vadd.f32 %v2034_v17, %v2033_v14 }
 0x11f   : > { %v2787_v22 = vadd.f32 %v2083_v19, %v2737_v16 }
 0x121   : > { %v2084_v23 = vpop.f32.mrb[20].mxu1  ;;  %v2036_v24 = vpop.f32.mrb[20].mxu0 }
 0x122   : > { %v2085_v26 = vpop.f32.mrb[21].mxu1  ;;  %v2037_v29 = vpop.f32.mrb[21].mxu0 }
 0x123   : > { %v2086_v30 = vadd.f32 %v2085_v26, %v2084_v23  ;;  %v2087_v31 = vpop.f32.mrb[22].mxu1  ;;  %v2789_v32 = vadd.f32 %v2037_v29, %v2036_v24  ;;  %v2039_v33 = vpop.f32.mrb[22].mxu0  ;;  %v1189_v29 = vadd.f32 %v2739_v21, %v2737_v16 }
 0x124   : > { %v2088_v34 = vpop.f32.mrb[23].mxu1  ;;  %v2040_v36 = vpop.f32.mrb[23].mxu0 }
 0x125   : > { %v2792_v37 = vadd.f32 %v2086_v30, %v2737_v16  ;;  %v2089_v38 = vadd.f32 %v2088_v34, %v2087_v31  ;;  %v2794_v40 = vadd.f32 %v2040_v36, %v2039_v33 }
 0x127   : > { %v2797_v43 = vadd.f32 %v2089_v38, %v2737_v16  ;;  %v1192_v38 = vadd.f32 %v2744_v27, %v2737_v16 }
 0x129   : > { %v2090_v44 = vpop.f32.mrb[24].mxu1  ;;  %v2042_v45 = vpop.f32.mrb[24].mxu0 }
 0x12a   : > { %v2091_v46 = vpop.f32.mrb[25].mxu1  ;;  %v2043_v47 = vpop.f32.mrb[25].mxu0 }
 0x12b   : > { %v2092_v48 = vadd.f32 %v2091_v46, %v2090_v44  ;;  %v2093_v50 = vpop.f32.mrb[26].mxu1  ;;  %v2799_v51 = vadd.f32 %v2043_v47, %v2042_v45  ;;  %v2045_v52 = vpop.f32.mrb[26].mxu0 }
 0x12c   : > { %v2094_v54 = vpop.f32.mrb[27].mxu1  ;;  %v2046_v57 = vpop.f32.mrb[27].mxu0 }
 0x12d   : > { %v2802_v58 = vadd.f32 %v2092_v48, %v2737_v16  ;;  %v2095_v59 = vadd.f32 %v2094_v54, %v2093_v50  ;;  %v2804_v60 = vadd.f32 %v2046_v57, %v2045_v52  ;;  %v1197_v54 = vadd.f32 %v2749_v35, %v2737_v16 }
 0x12f   : > { %v2807_v61 = vadd.f32 %v2095_v59, %v2737_v16 }
 0x131   : > { %v2096_v62 = vpop.f32.mrb[28].mxu1  ;;  %v2048_v0 = vpop.f32.mrb[28].mxu0 }
 0x132   : > { %v2097_v1 = vpop.f32.mrb[29].mxu1  ;;  %v2049_v2 = vpop.f32.mrb[29].mxu0 }
 0x133   : > { %v2098_v4 = vadd.f32 %v2097_v1, %v2096_v62  ;;  %v2099_v7 = vpop.f32.mrb[30].mxu1  ;;  %v2809_v8 = vadd.f32 %v2049_v2, %v2048_v0  ;;  %v2051_v9 = vpop.f32.mrb[30].mxu0 }
 0x134   : > { %v2100_v10 = vpop.f32.mrb[31].mxu1  ;;  %v2052_v11 = vpop.f32.mrb[31].mxu0 }
 0x135   : > { %v2812_v12 = vadd.f32 %v2098_v4, %v2737_v16  ;;  %v2101_v14 = vadd.f32 %v2100_v10, %v2099_v7  ;;  %v2814_v15 = vadd.f32 %v2052_v11, %v2051_v9  ;;  %v1200_v9 = vadd.f32 %v2754_v41, %v2737_v16 }
 0x137   : > { %v2817_v17 = vadd.f32 %v2101_v14, %v2737_v16 }
 0x139   : > { %v2118_v19 = vpop.f32.mrb[32].mxu1  ;;  %v1510_v23 = vpop.f32.mrb[32].mxu0 }
 0x13a   : > { %v2119_v24 = vpop.f32.mrb[33].mxu1  ;;  %v1512_v26 = vpop.f32.mrb[33].mxu0 }
 0x13b   : > { %v2120_v30 = vadd.f32 %v2119_v24, %v2118_v19  ;;  %v2121_v31 = vpop.f32.mrb[34].mxu1  ;;  %v1513_v33 = vpop.f32.mrb[34].mxu0 }
 0x13c   : > { %v2122_v34 = vpop.f32.mrb[35].mxu1  ;;  %v1515_v36 = vpop.f32.mrb[35].mxu0 }
 0x13d   : > { %v2123_v44 = vadd.f32 %v2122_v34, %v2121_v31  ;;  %v1350_v45 = vadd.f32 %v2120_v30, %v1189_v29  ;;  %v1205_v30 = vadd.f32 %v2759_v49, %v2737_v16 }
 0x13f   : > { %v1511_v46 = vadd.f32 %v1510_v23, %v1350_v45  ;;  %v1353_v47 = vadd.f32 %v2123_v44, %v1192_v38 }
 0x141   : > { %vm1637_vm1 = vcmp.ge.f32.partialorder %v1511_v46, 0.0  ;;  %v1669_v21 = vmul.f32 0.2, %v1511_v46  ;;  %v1514_v48 = vadd.f32 %v1513_v33, %v1353_v47  ;;  %v2124_v50 = vpop.f32.mrb[36].mxu1  ;;  %v1518_v52 = vpop.f32.mrb[36].mxu0  ;;  %v1208_v47 = vadd.f32 %v2764_v55, %v2737_v16 }
 0x142   : > { %v2125_v27 = vpop.f32.mrb[37].mxu1  ;;  %v1520_v57 = vpop.f32.mrb[37].mxu0 }
 0x143   : > { %v1701_v59 = vsel %vm1637_vm1, %v1511_v46, %v1669_v21  ;;  %vm1638_vm2 = vcmp.ge.f32.partialorder %v1514_v48, 0.0  ;;  %v1670_v62 = vmul.f32 0.2, %v1514_v48  ;;  %v2126_v0 = vadd.f32 %v2125_v27, %v2124_v50  ;;  %v2127_v1 = vpop.f32.mrb[38].mxu1  ;;  %v1521_v2 = vpop.f32.mrb[38].mxu0 }
 0x144   : > { %1733 = vst [vmem:[%s2827_s15] sm:$0xff] %v1701_v59  ;;  %v2128_v4 = vpop.f32.mrb[39].mxu1  ;;  %v1523_v7 = vpop.f32.mrb[39].mxu0 }
 0x145   : > { %v1702_v10 = vsel %vm1638_vm2, %v1514_v48, %v1670_v62  ;;  %v2129_v11 = vadd.f32 %v2128_v4, %v2127_v1  ;;  %v1358_v14 = vadd.f32 %v2126_v0, %v1197_v54  ;;  %v1213_v62 = vadd.f32 %v2769_v63, %v2737_v16 }
 0x146   : > { %1734 = vst [vmem:[%s2827_s15 + $0x8] sm:$0xff] %v1702_v10 }
 0x147   : > { %v1519_v35 = vadd.f32 %v1518_v52, %v1358_v14  ;;  %v1361_v19 = vadd.f32 %v2129_v11, %v1200_v9  ;;  %v1216_v14 = vadd.f32 %v2774_v5, %v2737_v16 }
 0x149   : > { %vm1639_vm3 = vcmp.ge.f32.partialorder %v1519_v35, 0.0  ;;  %v1671_v23 = vmul.f32 0.2, %v1519_v35  ;;  %v1522_v24 = vadd.f32 %v1521_v2, %v1361_v19  ;;  %v2130_v26 = vpop.f32.mrb[40].mxu1  ;;  %v1526_v29 = vpop.f32.mrb[40].mxu0 }
 0x14a   : > { %v2131_v31 = vpop.f32.mrb[41].mxu1  ;;  %v1528_v33 = vpop.f32.mrb[41].mxu0 }
 0x14b   : > { %v1703_v34 = vsel %vm1639_vm3, %v1519_v35, %v1671_v23  ;;  %vm1640_vm4 = vcmp.ge.f32.partialorder %v1522_v24, 0.0  ;;  %v1672_v41 = vmul.f32 0.2, %v1522_v24  ;;  %v2132_v36 = vadd.f32 %v2131_v31, %v2130_v26  ;;  %v2133_v38 = vpop.f32.mrb[42].mxu1  ;;  %v1529_v44 = vpop.f32.mrb[42].mxu0 }
 0x14c   : > { %1735 = vst [vmem:[%s2827_s15 + $0x10] sm:$0xff] %v1703_v34  ;;  %v2134_v45 = vpop.f32.mrb[43].mxu1  ;;  %v1531_v46 = vpop.f32.mrb[43].mxu0  ;;  %v1221_v33 = vadd.f32 %v2779_v13, %v2737_v16 }
 0x14d   : > { %v1704_v21 = vsel %vm1640_vm4, %v1522_v24, %v1672_v41  ;;  %v2135_v48 = vadd.f32 %v2134_v45, %v2133_v38  ;;  %v1366_v50 = vadd.f32 %v2132_v36, %v1205_v30 }
 0x14e   : > { %1736 = vst [vmem:[%s2827_s15 + $0x18] sm:$0xff] %v1704_v21  ;;  %v1224_v21 = vadd.f32 %v2784_v20, %v2737_v16 }
 0x14f   : > { %v1527_v49 = vadd.f32 %v1526_v29, %v1366_v50  ;;  %v1369_v52 = vadd.f32 %v2135_v48, %v1208_v47 }
 0x151   : > { %vm1641_vm5 = vcmp.ge.f32.partialorder %v1527_v49, 0.0  ;;  %v1673_v54 = vmul.f32 0.2, %v1527_v49  ;;  %v1530_v27 = vadd.f32 %v1529_v44, %v1369_v52  ;;  %v2136_v57 = vpop.f32.mrb[44].mxu1  ;;  %v1534_v59 = vpop.f32.mrb[44].mxu0 }
 0x152   : > { %v2137_v0 = vpop.f32.mrb[45].mxu1  ;;  %v1536_v1 = vpop.f32.mrb[45].mxu0 }
 0x153   : > { %v1705_v2 = vsel %vm1641_vm5, %v1527_v49, %v1673_v54  ;;  %vm1642_vm6 = vcmp.ge.f32.partialorder %v1530_v27, 0.0  ;;  %v1674_v55 = vmul.f32 0.2, %v1530_v27  ;;  %v2138_v4 = vadd.f32 %v2137_v0, %v2136_v57  ;;  %v2139_v7 = vpop.f32.mrb[46].mxu1  ;;  %v1537_v9 = vpop.f32.mrb[46].mxu0 }
 0x154   : > { %1737 = vst [vmem:[%s2827_s15 + $0x20] sm:$0xff] %v1705_v2  ;;  %v2140_v10 = vpop.f32.mrb[47].mxu1  ;;  %v1539_v11 = vpop.f32.mrb[47].mxu0 }
 0x155   : > { %v1706_v35 = vsel %vm1642_vm6, %v1530_v27, %v1674_v55  ;;  %v2141_v19 = vadd.f32 %v2140_v10, %v2139_v7  ;;  %v1374_v23 = vadd.f32 %v2138_v4, %v1213_v62  ;;  %v1229_v62 = vadd.f32 %v2789_v32, %v2737_v16 }
 0x156   : > { %1738 = vst [vmem:[%s2827_s15 + $0x28] sm:$0xff] %v1706_v35  ;;  %v1232_v11 = vadd.f32 %v2794_v40, %v2737_v16 }
 0x157   : > { %v1535_v63 = vadd.f32 %v1534_v59, %v1374_v23  ;;  %v1377_v24 = vadd.f32 %v2141_v19, %v1216_v14 }
 0x159   : > { %vm1643_vm7 = vcmp.ge.f32.partialorder %v1535_v63, 0.0  ;;  %v1675_v26 = vmul.f32 0.2, %v1535_v63  ;;  %v1538_v29 = vadd.f32 %v1537_v9, %v1377_v24  ;;  %v2142_v30 = vpop.f32.mrb[48].mxu1  ;;  %v1542_v31 = vpop.f32.mrb[48].mxu0 }
 0x15a   : > { %v2143_v34 = vpop.f32.mrb[49].mxu1  ;;  %v1544_v41 = vpop.f32.mrb[49].mxu0 }
 0x15b   : > { %v1707_v36 = vsel %vm1643_vm7, %v1535_v63, %v1675_v26  ;;  %vm1644_vm8 = vcmp.ge.f32.partialorder %v1538_v29, 0.0  ;;  %v1676_v5 = vmul.f32 0.2, %v1538_v29  ;;  %v2144_v38 = vadd.f32 %v2143_v34, %v2142_v30  ;;  %v2145_v44 = vpop.f32.mrb[50].mxu1  ;;  %v1545_v45 = vpop.f32.mrb[50].mxu0 }
 0x15c   : > { %1739 = vst [vmem:[%s2827_s15 + $0x30] sm:$0xff] %v1707_v36  ;;  %v2146_v46 = vpop.f32.mrb[51].mxu1  ;;  %v1547_v47 = vpop.f32.mrb[51].mxu0  ;;  %v1237_v30 = vadd.f32 %v2799_v51, %v2737_v16 }
 0x15d   : > { %v1708_v48 = vsel %vm1644_vm8, %v1538_v29, %v1676_v5  ;;  %v2147_v50 = vadd.f32 %v2146_v46, %v2145_v44  ;;  %v1382_v49 = vadd.f32 %v2144_v38, %v1221_v33 }
 0x15e   : > { %1740 = vst [vmem:[%s2827_s15 + $0x38] sm:$0xff] %v1708_v48 }
 0x15f   : > { %v1543_v13 = vadd.f32 %v1542_v31, %v1382_v49  ;;  %v1385_v52 = vadd.f32 %v2147_v50, %v1224_v21 }
 0x161   : > { %vm1645_vm9 = vcmp.ge.f32.partialorder %v1543_v13, 0.0  ;;  %v1677_v54 = vmul.f32 0.2, %v1543_v13  ;;  %v1546_v27 = vadd.f32 %v1545_v45, %v1385_v52  ;;  %v2148_v57 = vpop.f32.mrb[52].mxu1  ;;  %v1550_v59 = vpop.f32.mrb[52].mxu0  ;;  %v1240_v45 = vadd.f32 %v2804_v60, %v2737_v16 }
 0x162   : > { %v2149_v0 = vpop.f32.mrb[53].mxu1  ;;  %v1552_v1 = vpop.f32.mrb[53].mxu0 }
 0x163   : > { %v1709_v2 = vsel %vm1645_vm9, %v1543_v13, %v1677_v54  ;;  %vm1646_vm10 = vcmp.ge.f32.partialorder %v1546_v27, 0.0  ;;  %v1678_v20 = vmul.f32 0.2, %v1546_v27  ;;  %v2150_v55 = vadd.f32 %v2149_v0, %v2148_v57  ;;  %v2151_v4 = vpop.f32.mrb[54].mxu1  ;;  %v1553_v7 = vpop.f32.mrb[54].mxu0 }
 0x164   : > { %1741 = vst [vmem:[%s2827_s15 + $0x40] sm:$0xff] %v1709_v2  ;;  %v2152_v9 = vpop.f32.mrb[55].mxu1  ;;  %v1555_v10 = vpop.f32.mrb[55].mxu0  ;;  %v1245_v54 = vadd.f32 %v2809_v8, %v2737_v16 }
 0x165   : > { %v1710_v14 = vsel %vm1646_vm10, %v1546_v27, %v1678_v20  ;;  %v2153_v35 = vadd.f32 %v2152_v9, %v2151_v4  ;;  %v1390_v19 = vadd.f32 %v2150_v55, %v1229_v62  ;;  %v1248_v55 = vadd.f32 %v2814_v15, %v2737_v16 }
 0x166   : > { %1742 = vst [vmem:[%s2827_s15 + $0x48] sm:$0xff] %v1710_v14 }
 0x167   : > { %v1551_v32 = vadd.f32 %v1550_v59, %v1390_v19  ;;  %v1393_v23 = vadd.f32 %v2153_v35, %v1232_v11 }
 0x169   : > { %vm1647_vm11 = vcmp.ge.f32.partialorder %v1551_v32, 0.0  ;;  %v1679_v63 = vmul.f32 0.2, %v1551_v32  ;;  %v1554_v24 = vadd.f32 %v1553_v7, %v1393_v23  ;;  %v2154_v26 = vpop.f32.mrb[56].mxu1  ;;  %v1558_v29 = vpop.f32.mrb[56].mxu0 }
 0x16a   : > { %v2155_v31 = vpop.f32.mrb[57].mxu1  ;;  %v1560_v33 = vpop.f32.mrb[57].mxu0 }
 0x16b   : > { %v1711_v34 = vsel %vm1647_vm11, %v1551_v32, %v1679_v63  ;;  %vm1648_vm12 = vcmp.ge.f32.partialorder %v1554_v24, 0.0  ;;  %v1680_v40 = vmul.f32 0.2, %v1554_v24  ;;  %v2156_v41 = vadd.f32 %v2155_v31, %v2154_v26  ;;  %v2157_v36 = vpop.f32.mrb[58].mxu1  ;;  %v1561_v5 = vpop.f32.mrb[58].mxu0 }
 0x16c   : > { %1743 = vst [vmem:[%s2827_s15 + $0x50] sm:$0xff] %v1711_v34  ;;  %v2158_v38 = vpop.f32.mrb[59].mxu1  ;;  %v1563_v44 = vpop.f32.mrb[59].mxu0 }
 0x16d   : > { %v1712_v46 = vsel %vm1648_vm12, %v1554_v24, %v1680_v40  ;;  %v2159_v47 = vadd.f32 %v2158_v38, %v2157_v36  ;;  %v1398_v21 = vadd.f32 %v2156_v41, %v1237_v30 }
 0x16e   : > { %1744 = vst [vmem:[%s2827_s15 + $0x58] sm:$0xff] %v1712_v46 }
 0x16f   : > { %v1559_v51 = vadd.f32 %v1558_v29, %v1398_v21  ;;  %v1401_v48 = vadd.f32 %v2159_v47, %v1240_v45 }
 0x171   : > { %vm1649_vm13 = vcmp.ge.f32.partialorder %v1559_v51, 0.0  ;;  %v1681_v50 = vmul.f32 0.2, %v1559_v51  ;;  %v1562_v49 = vadd.f32 %v1561_v5, %v1401_v48  ;;  %v2160_v13 = vpop.f32.mrb[60].mxu1  ;;  %v1566_v52 = vpop.f32.mrb[60].mxu0 }
 0x172   : > { %v2161_v27 = vpop.f32.mrb[61].mxu1  ;;  %v1568_v57 = vpop.f32.mrb[61].mxu0 }
 0x173   : > { %v1713_v59 = vsel %vm1649_vm13, %v1559_v51, %v1681_v50  ;;  %vm1650_vm14 = vcmp.ge.f32.partialorder %v1562_v49, 0.0  ;;  %v1682_v60 = vmul.f32 0.2, %v1562_v49  ;;  %v2162_v62 = vadd.f32 %v2161_v27, %v2160_v13  ;;  %v2163_v0 = vpop.f32.mrb[62].mxu1  ;;  %v1569_v1 = vpop.f32.mrb[62].mxu0 }
 0x174   : > { %1745 = vst [vmem:[%s2827_s15 + $0x60] sm:$0xff] %v1713_v59  ;;  %v2164_v2 = vpop.f32.mrb[63].mxu1  ;;  %v1571_v20 = vpop.f32.mrb[63].mxu0 }
 0x175   : > { %v1714_v4 = vsel %vm1650_vm14, %v1562_v49, %v1682_v60  ;;  %v2165_v7 = vadd.f32 %v2164_v2, %v2163_v0  ;;  %v1406_v9 = vadd.f32 %v2162_v62, %v1245_v54 }
 0x176   : > { %1746 = vst [vmem:[%s2827_s15 + $0x68] sm:$0xff] %v1714_v4 }
 0x177   : > { %v1567_v8 = vadd.f32 %v1566_v52, %v1406_v9  ;;  %v1409_v10 = vadd.f32 %v2165_v7, %v1248_v55 }
 0x179   : > { %vm1651_vm15 = vcmp.ge.f32.partialorder %v1567_v8, 0.0  ;;  %v1683_v11 = vmul.f32 0.2, %v1567_v8  ;;  %v1570_v14 = vadd.f32 %v1569_v1, %v1409_v10  ;;  %v2166_v35 = vpop.f32.mrb[64].mxu1  ;;  %v1574_v19 = vpop.f32.mrb[64].mxu0 }
 0x17a   : > { %v2167_v32 = vpop.f32.mrb[65].mxu1  ;;  %v1576_v23 = vpop.f32.mrb[65].mxu0 }
 0x17b   : > { %v1715_v63 = vsel %vm1651_vm15, %v1567_v8, %v1683_v11  ;;  %vm1652_vm0 = vcmp.ge.f32.partialorder %v1570_v14, 0.0  ;;  %v1684_v24 = vmul.f32 0.2, %v1570_v14  ;;  %v2168_v26 = vadd.f32 %v2167_v32, %v2166_v35  ;;  %v2169_v16 = vpop.f32.mrb[66].mxu1  ;;  %v1577_v15 = vpop.f32.mrb[66].mxu0 }
 0x17c   : > { %1747 = vst [vmem:[%s2827_s15 + $0x70] sm:$0xff] %v1715_v63  ;;  %v2170_v29 = vpop.f32.mrb[67].mxu1  ;;  %v1579_v30 = vpop.f32.mrb[67].mxu0 }
 0x17d   : > { %v1716_v31 = vsel %vm1652_vm0, %v1570_v14, %v1684_v24  ;;  %v2171_v33 = vadd.f32 %v2170_v29, %v2169_v16  ;;  %v1414_v34 = vadd.f32 %v2168_v26, %v2742_v25 }
 0x17e   : > { %1748 = vst [vmem:[%s2827_s15 + $0x78] sm:$0xff] %v1716_v31 }
 0x17f   : > { %v1575_v40 = vadd.f32 %v1574_v19, %v1414_v34  ;;  %v1417_v41 = vadd.f32 %v2171_v33, %v2747_v28 }
 0x181   : > { %vm1653_vm1 = vcmp.ge.f32.partialorder %v1575_v40, 0.0  ;;  %v1685_v36 = vmul.f32 0.2, %v1575_v40  ;;  %v1578_v5 = vadd.f32 %v1577_v15, %v1417_v41  ;;  %v2172_v38 = vpop.f32.mrb[68].mxu1  ;;  %v1582_v44 = vpop.f32.mrb[68].mxu0 }
 0x182   : > { %v2173_v45 = vpop.f32.mrb[69].mxu1  ;;  %v1584_v46 = vpop.f32.mrb[69].mxu0 }
 0x183   : > { %v1717_v47 = vsel %vm1653_vm1, %v1575_v40, %v1685_v36  ;;  %vm1654_vm2 = vcmp.ge.f32.partialorder %v1578_v5, 0.0  ;;  %v1686_v21 = vmul.f32 0.2, %v1578_v5  ;;  %v2174_v51 = vadd.f32 %v2173_v45, %v2172_v38  ;;  %v2175_v48 = vpop.f32.mrb[70].mxu1  ;;  %v1585_v50 = vpop.f32.mrb[70].mxu0 }
 0x184   : > { %1749 = vst [vmem:[%s2827_s15 + $0x80] sm:$0xff] %v1717_v47  ;;  %v2176_v25 = vpop.f32.mrb[71].mxu1  ;;  %v1587_v49 = vpop.f32.mrb[71].mxu0 }
 0x185   : > { %v1718_v13 = vsel %vm1654_vm2, %v1578_v5, %v1686_v21  ;;  %v2177_v52 = vadd.f32 %v2176_v25, %v2175_v48  ;;  %v1422_v28 = vadd.f32 %v2174_v51, %v2752_v39 }
 0x186   : > { %1750 = vst [vmem:[%s2827_s15 + $0x88] sm:$0xff] %v1718_v13 }
 0x187   : > { %v1583_v54 = vadd.f32 %v1582_v44, %v1422_v28  ;;  %v1425_v27 = vadd.f32 %v2177_v52, %v2757_v42 }
 0x189   : > { %vm1655_vm3 = vcmp.ge.f32.partialorder %v1583_v54, 0.0  ;;  %v1687_v57 = vmul.f32 0.2, %v1583_v54  ;;  %v1586_v59 = vadd.f32 %v1585_v50, %v1425_v27  ;;  %v2178_v60 = vpop.f32.mrb[72].mxu1  ;;  %v1590_v62 = vpop.f32.mrb[72].mxu0 }
 0x18a   : > { %v2179_v0 = vpop.f32.mrb[73].mxu1  ;;  %v1592_v1 = vpop.f32.mrb[73].mxu0 }
 0x18b   : > { %v1719_v2 = vsel %vm1655_vm3, %v1583_v54, %v1687_v57  ;;  %vm1656_vm4 = vcmp.ge.f32.partialorder %v1586_v59, 0.0  ;;  %v1688_v20 = vmul.f32 0.2, %v1586_v59  ;;  %v2180_v55 = vadd.f32 %v2179_v0, %v2178_v60  ;;  %v2181_v4 = vpop.f32.mrb[74].mxu1  ;;  %v1593_v7 = vpop.f32.mrb[74].mxu0 }
 0x18c   : > { %1751 = vst [vmem:[%s2827_s15 + $0x90] sm:$0xff] %v1719_v2  ;;  %v2182_v39 = vpop.f32.mrb[75].mxu1  ;;  %v1595_v9 = vpop.f32.mrb[75].mxu0 }
 0x18d   : > { %v1720_v8 = vsel %vm1656_vm4, %v1586_v59, %v1688_v20  ;;  %v2183_v10 = vadd.f32 %v2182_v39, %v2181_v4  ;;  %v1430_v42 = vadd.f32 %v2180_v55, %v2762_v53 }
 0x18e   : > { %1752 = vst [vmem:[%s2827_s15 + $0x98] sm:$0xff] %v1720_v8 }
 0x18f   : > { %v1591_v11 = vadd.f32 %v1590_v62, %v1430_v42  ;;  %v1433_v14 = vadd.f32 %v2183_v10, %v2767_v56 }
 0x191   : > { %vm1657_vm5 = vcmp.ge.f32.partialorder %v1591_v11, 0.0  ;;  %v1689_v35 = vmul.f32 0.2, %v1591_v11  ;;  %v1594_v19 = vadd.f32 %v1593_v7, %v1433_v14  ;;  %v2184_v32 = vpop.f32.mrb[76].mxu1  ;;  %v1598_v23 = vpop.f32.mrb[76].mxu0 }
 0x192   : > { %v2185_v63 = vpop.f32.mrb[77].mxu1  ;;  %v1600_v24 = vpop.f32.mrb[77].mxu0 }
 0x193   : > { %v1721_v26 = vsel %vm1657_vm5, %v1591_v11, %v1689_v35  ;;  %vm1658_vm6 = vcmp.ge.f32.partialorder %v1594_v19, 0.0  ;;  %v1690_v16 = vmul.f32 0.2, %v1594_v19  ;;  %v2186_v15 = vadd.f32 %v2185_v63, %v2184_v32  ;;  %v2187_v29 = vpop.f32.mrb[78].mxu1  ;;  %v1601_v30 = vpop.f32.mrb[78].mxu0 }
 0x194   : > { %1753 = vst [vmem:[%s2827_s15 + $0xa0] sm:$0xff] %v1721_v26  ;;  %v2188_v53 = vpop.f32.mrb[79].mxu1  ;;  %v1603_v31 = vpop.f32.mrb[79].mxu0 }
 0x195   : > { %v1722_v33 = vsel %vm1658_vm6, %v1594_v19, %v1690_v16  ;;  %v2189_v34 = vadd.f32 %v2188_v53, %v2187_v29  ;;  %v1438_v56 = vadd.f32 %v2186_v15, %v2772_v3 }
 0x196   : > { %1754 = vst [vmem:[%s2827_s15 + $0xa8] sm:$0xff] %v1722_v33 }
 0x197   : > { %v1599_v40 = vadd.f32 %v1598_v23, %v1438_v56  ;;  %v1441_v41 = vadd.f32 %v2189_v34, %v2777_v6 }
 0x199   : > { %vm1659_vm7 = vcmp.ge.f32.partialorder %v1599_v40, 0.0  ;;  %v1691_v36 = vmul.f32 0.2, %v1599_v40  ;;  %v1602_v5 = vadd.f32 %v1601_v30, %v1441_v41  ;;  %v2190_v38 = vpop.f32.mrb[80].mxu1  ;;  %v1606_v44 = vpop.f32.mrb[80].mxu0 }
 0x19a   : > { %v2191_v45 = vpop.f32.mrb[81].mxu1  ;;  %v1608_v46 = vpop.f32.mrb[81].mxu0 }
 0x19b   : > { %v1723_v47 = vsel %vm1659_vm7, %v1599_v40, %v1691_v36  ;;  %vm1660_vm8 = vcmp.ge.f32.partialorder %v1602_v5, 0.0  ;;  %v1692_v21 = vmul.f32 0.2, %v1602_v5  ;;  %v2192_v51 = vadd.f32 %v2191_v45, %v2190_v38  ;;  %v2193_v48 = vpop.f32.mrb[82].mxu1  ;;  %v1609_v50 = vpop.f32.mrb[82].mxu0 }
 0x19c   : > { %1755 = vst [vmem:[%s2827_s15 + $0xb0] sm:$0xff] %v1723_v47  ;;  %v2194_v3 = vpop.f32.mrb[83].mxu1  ;;  %v1611_v25 = vpop.f32.mrb[83].mxu0 }
 0x19d   : > { %v1724_v49 = vsel %vm1660_vm8, %v1602_v5, %v1692_v21  ;;  %v2195_v13 = vadd.f32 %v2194_v3, %v2193_v48  ;;  %v1446_v6 = vadd.f32 %v2192_v51, %v2782_v18 }
 0x19e   : > { %1756 = vst [vmem:[%s2827_s15 + $0xb8] sm:$0xff] %v1724_v49 }
 0x19f   : > { %v1607_v52 = vadd.f32 %v1606_v44, %v1446_v6  ;;  %v1449_v28 = vadd.f32 %v2195_v13, %v2787_v22 }
 0x1a1   : > { %vm1661_vm9 = vcmp.ge.f32.partialorder %v1607_v52, 0.0  ;;  %v1693_v54 = vmul.f32 0.2, %v1607_v52  ;;  %v1610_v27 = vadd.f32 %v1609_v50, %v1449_v28  ;;  %v2196_v57 = vpop.f32.mrb[84].mxu1  ;;  %v1614_v59 = vpop.f32.mrb[84].mxu0 }
 0x1a2   : > { %v2197_v60 = vpop.f32.mrb[85].mxu1  ;;  %v1616_v62 = vpop.f32.mrb[85].mxu0 }
 0x1a3   : > { %v1725_v0 = vsel %vm1661_vm9, %v1607_v52, %v1693_v54  ;;  %vm1662_vm10 = vcmp.ge.f32.partialorder %v1610_v27, 0.0  ;;  %v1694_v1 = vmul.f32 0.2, %v1610_v27  ;;  %v2198_v2 = vadd.f32 %v2197_v60, %v2196_v57  ;;  %v2199_v20 = vpop.f32.mrb[86].mxu1  ;;  %v1617_v55 = vpop.f32.mrb[86].mxu0 }
 0x1a4   : > { %1757 = vst [vmem:[%s2827_s15 + $0xc0] sm:$0xff] %v1725_v0  ;;  %v2200_v18 = vpop.f32.mrb[87].mxu1  ;;  %v1619_v4 = vpop.f32.mrb[87].mxu0 }
 0x1a5   : > { %v1726_v7 = vsel %vm1662_vm10, %v1610_v27, %v1694_v1  ;;  %v2201_v39 = vadd.f32 %v2200_v18, %v2199_v20  ;;  %v1454_v22 = vadd.f32 %v2198_v2, %v2792_v37 }
 0x1a6   : > { %1758 = vst [vmem:[%s2827_s15 + $0xc8] sm:$0xff] %v1726_v7 }
 0x1a7   : > { %v1615_v9 = vadd.f32 %v1614_v59, %v1454_v22  ;;  %v1457_v8 = vadd.f32 %v2201_v39, %v2797_v43 }
 0x1a9   : > { %vm1663_vm11 = vcmp.ge.f32.partialorder %v1615_v9, 0.0  ;;  %v1695_v10 = vmul.f32 0.2, %v1615_v9  ;;  %v1618_v42 = vadd.f32 %v1617_v55, %v1457_v8  ;;  %v2202_v11 = vpop.f32.mrb[88].mxu1  ;;  %v1622_v14 = vpop.f32.mrb[88].mxu0 }
 0x1aa   : > { %v2203_v35 = vpop.f32.mrb[89].mxu1  ;;  %v1624_v19 = vpop.f32.mrb[89].mxu0 }
 0x1ab   : > { %v1727_v32 = vsel %vm1663_vm11, %v1615_v9, %v1695_v10  ;;  %vm1664_vm12 = vcmp.ge.f32.partialorder %v1618_v42, 0.0  ;;  %v1696_v23 = vmul.f32 0.2, %v1618_v42  ;;  %v2204_v63 = vadd.f32 %v2203_v35, %v2202_v11  ;;  %v2205_v24 = vpop.f32.mrb[90].mxu1  ;;  %v1625_v26 = vpop.f32.mrb[90].mxu0 }
 0x1ac   : > { %1759 = vst [vmem:[%s2827_s15 + $0xd0] sm:$0xff] %v1727_v32  ;;  %v2206_v37 = vpop.f32.mrb[91].mxu1  ;;  %v1627_v16 = vpop.f32.mrb[91].mxu0 }
 0x1ad   : > { %v1728_v15 = vsel %vm1664_vm12, %v1618_v42, %v1696_v23  ;;  %v2207_v29 = vadd.f32 %v2206_v37, %v2205_v24  ;;  %v1462_v43 = vadd.f32 %v2204_v63, %v2802_v58 }
 0x1ae   : > { %1760 = vst [vmem:[%s2827_s15 + $0xd8] sm:$0xff] %v1728_v15 }
 0x1af   : > { %v1623_v30 = vadd.f32 %v1622_v14, %v1462_v43  ;;  %v1465_v53 = vadd.f32 %v2207_v29, %v2807_v61 }
 0x1b1   : > { %vm1665_vm13 = vcmp.ge.f32.partialorder %v1623_v30, 0.0  ;;  %v1697_v31 = vmul.f32 0.2, %v1623_v30  ;;  %v1626_v33 = vadd.f32 %v1625_v26, %v1465_v53  ;;  %v2208_v34 = vpop.f32.mrb[92].mxu1  ;;  %v1630_v56 = vpop.f32.mrb[92].mxu0 }
 0x1b2   : > { %v2209_v40 = vpop.f32.mrb[93].mxu1  ;;  %v1632_v41 = vpop.f32.mrb[93].mxu0 }
 0x1b3   : > { %v1729_v36 = vsel %vm1665_vm13, %v1623_v30, %v1697_v31  ;;  %vm1666_vm14 = vcmp.ge.f32.partialorder %v1626_v33, 0.0  ;;  %v1698_v5 = vmul.f32 0.2, %v1626_v33  ;;  %v2210_v38 = vadd.f32 %v2209_v40, %v2208_v34  ;;  %v2211_v44 = vpop.f32.mrb[94].mxu1  ;;  %v1633_v45 = vpop.f32.mrb[94].mxu0 }
 0x1b4   : > { %1761 = vst [vmem:[%s2827_s15 + $0xe0] sm:$0xff] %v1729_v36  ;;  %v2212_v58 = vpop.f32.mrb[95].mxu1  ;;  %v1635_v46 = vpop.f32.mrb[95].mxu0 }
 0x1b5   : > { %v1730_v61 = vsel %vm1666_vm14, %v1626_v33, %v1698_v5  ;;  %v2213_v47 = vadd.f32 %v2212_v58, %v2211_v44  ;;  %v1470_v21 = vadd.f32 %v2210_v38, %v2812_v12 }
 0x1b6   : > { %1762 = vst [vmem:[%s2827_s15 + $0xe8] sm:$0xff] %v1730_v61 }
 0x1b7   : > { %v1631_v51 = vadd.f32 %v1630_v56, %v1470_v21  ;;  %v1473_v48 = vadd.f32 %v2213_v47, %v2817_v17 }
 0x1b9   : > { %vm1667_vm15 = vcmp.ge.f32.partialorder %v1631_v51, 0.0  ;;  %v1699_v50 = vmul.f32 0.2, %v1631_v51  ;;  %v1634_v3 = vadd.f32 %v1633_v45, %v1473_v48 }
 0x1bb   : > { %v1731_v25 = vsel %vm1667_vm15, %v1631_v51, %v1699_v50  ;;  %vm1668_vm0 = vcmp.ge.f32.partialorder %v1634_v3, 0.0  ;;  %v1700_v49 = vmul.f32 0.2, %v1634_v3 }
 0x1bc   : > { %1763 = vst [vmem:[%s2827_s15 + $0xf0] sm:$0xff] %v1731_v25 }
 0x1bd   : > { %v1732_v13 = vsel %vm1668_vm0, %v1634_v3, %v1700_v49 }
 0x1be   : > { %1764 = vst [vmem:[%s2827_s15 + $0xf8] sm:$0xff] %v1732_v13 }
 0x1bf PF: > { %s13_s12 = sadd.s32 1, %s2435_s12  }
 0x1c0   : > { %p10_p4 = scmp.ge.s32.totalorder %s13_s12, 4  }
 0x1c2   :  { %12 = sbr.rel (!%p10_p4) target bundleno = 1 (0x1), region = 62 }

// kernel: residual_dense_block.9
= control target key start
LH: loop header
LB: loop body
LE: loop exit
PB: predicated region body
PF: predicated region fallthrough
CT: control target
= control target key end

     0   :  { %9 = vsyncpa [#allocation3], 0  ;;  %s3952_s0 = inlined_call_operand.vmem [shape: bf16[512,864], index: 0, kind: input, shape index: {}]   ;;  %s3953_s1 = inlined_call_operand.vmem [shape: bf16[864,128], index: 1, kind: input, shape index: {}]   ;;  %s3954_s2 = inlined_call_operand.vmem [shape: f32[1,128], index: 2, kind: input, shape index: {}]   ;;  %s3955_s3 = inlined_call_operand.vmem [shape: f32[512,128], index: 3, kind: input, shape index: {}]   ;;  %s3956_s4 = inlined_call_operand.hbm [shape: f32[512,128], index: 4, kind: output, shape index: {}]  }
   0x1   :  { %11 = vsyncpa [#allocation3 + $0x1], 0  ;;  %s3225_s15 = smov 0   ;;  %s3227_s16 = smov 0  }
   0x2   :  { %s3229_s17 = smov 0   ;;  %s3231_s18 = smov 0  }
   0x3 LB: > { %s3246_s19 = sadd.s32 4294967295, %s3195_s18   ;;  %s2261_s20 = sadd.s32 4294967294, %s3195_s18   ;;  %s3195_s18 = sphi %s3231_s18, %s3962_s18   ;;  %s3191_s17 = sphi %s3229_s17, %s3961_s17   ;;  %s3187_s16 = sphi %s3227_s16, %s3960_s16   ;;  %s3183_s15 = sphi %s3225_s15, %s3959_s15  }
   0x4   : > { %s3250_s21 = sadd.s32 1, %s3195_s18   ;;  %s118_s22 = sadd.s32 1, %s3191_s17 }
   0x5   : > { %s115_s23 = ssub.s32 %s3195_s18, %s3250_s21  ;;  %p128_p0 = scmp.ne.s32.totalorder %s3191_s17, %s3187_s16 }
   0x6   : > { %p116_p1 = scmp.eq.s32.totalorder %s115_s23, 0  ;;  %p129_p2 = scmp.eq.s32.totalorder %s3246_s19, 1 }
   0x7   : > { %p134_p3 = scmp.ne.s32.totalorder %s3187_s16, %s3183_s15  ;;  %p135_p4 = scmp.eq.s32.totalorder %s2261_s20, 1 }
   0x8   : > { %s3261_s24 = scalar_select %p116_p1, %s3191_s17, %s118_s22  }
   0x9   : > { %p3263_p5 = por %p129_p2, %p128_p0  ;;  %p3267_p6 = por %p135_p4, %p134_p3 }
   0xa   : > { %p2264_p7 = scmp.ge.s32.totalorder %s3195_s18, 1  ;;  %p178_p8 = scmp.lt.s32.totalorder %s3195_s18, 3 }
   0xc   : > { %p179_p9 = pnand %p2264_p7, %p178_p8 }
   0xd   : > { %v2919_v0 = vld [vmem:[%s3953_s1 + $0x40] sm:$0xff] (!%p179_p9)   ;;  %s2266_s29 = sshll.u32 (!%p179_p9), %s3246_s19, 5  ;;  %v2921_v2 = vld [vmem:[%s3953_s1 + $0x48] sm:$0xff] (!%p179_p9)   ;;  %v2923_v4 = vld [vmem:[%s3953_s1 + $0x50] sm:$0xff] (!%p179_p9)   ;;  %vm1352_vm0 = vcmask (!%p179_p9), 785408   ;;  %s207_s10 = sand.u32 (!%p179_p9), 1, %s3187_s16  }
   0xe   : > { %182 = sbr.rel (%p179_p9) target bundleno = 502 (0x1f6), region = 36  ;;  %v2920_v1 = vld [vmem:[%s3953_s1] sm:$0xff] (!%p179_p9)   ;;  %2459 = vmatprep.subr.bf16.mxu0 (!%p179_p9), %v2919_v0  ;;  %2861 = vmatprep.subr.bf16.mxu1 (!%p179_p9), %v2919_v0  ;;  %p211_p10 = scmp.lt.s32.totalorder (!%p179_p9), %s2266_s29, 63  ;;  %v2922_v3 = vld [vmem:[%s3953_s1 + $0x8] sm:$0xff] (!%p179_p9)   ;;  %v2924_v5 = vld [vmem:[%s3953_s1 + $0x10] sm:$0xff] (!%p179_p9)  }
   0xf   : > { %2460 = vmatpush3.bf16.msra.mxu0 (!%p179_p9), %v2920_v1  ;;  %2869 = vmatpush3.bf16.msra.mxu1 (!%p179_p9), %v2920_v1  ;;  %v2925_v6 = vld [vmem:[%s3953_s1 + $0x58] sm:$0xff] (!%p179_p9)   ;;  %v2927_v8 = vld [vmem:[%s3953_s1 + $0x60] sm:$0xff] (!%p179_p9)   ;;  %v2929_v10 = vld [vmem:[%s3953_s1 + $0x68] sm:$0xff] (!%p179_p9)   ;;  %s2458_s20 = sshll.u32 (!%p179_p9), %s3246_s19, 12  ;;  %s3911_s19 = scalar_lea.sflag (!%p179_p9), [#allocation3], %s207_s10 }
  0x10   : > { %2461 = vmatprep.subr.bf16.mxu0 (!%p179_p9), %v2921_v2  ;;  %2862 = vmatprep.subr.bf16.mxu1 (!%p179_p9), %v2921_v2  ;;  %v2926_v7 = vld [vmem:[%s3953_s1 + $0x18] sm:$0xff] (!%p179_p9)   ;;  %v2928_v9 = vld [vmem:[%s3953_s1 + $0x20] sm:$0xff] (!%p179_p9)   ;;  %v2930_v13 = vld [vmem:[%s3953_s1 + $0x28] sm:$0xff] (!%p179_p9)   ;;  %s3903_s28 = scalar_lea.hbm (!%p179_p9), %s3956_s4, %s2458_s20  ;;  %s3197_s5 = smov (!%p179_p9), [#allocation2]  }
  0x11   : > { %v2931_v14 = vld [vmem:[%s3953_s1 + $0x70] sm:$0xff] (!%p179_p9)   ;;  %v2933_v16 = vld [vmem:[%s3953_s1 + $0x78] sm:$0xff] (!%p179_p9)   ;;  %v2941_v18 = vld [vmem:[%s3953_s1 + $0xc0] sm:$0xff] (!%p179_p9)   ;;  %s3137_s6 = sshll.u32 (!%p179_p9), %s3197_s5, 4  ;;  %s3138_s6 = int_to_ptr.vmem [resolvable:$false] %s3137_s6 }
  0x12   : > { %v2932_v15 = vld [vmem:[%s3953_s1 + $0x30] sm:$0xff] (!%p179_p9)   ;;  %v2934_v17 = vld [vmem:[%s3953_s1 + $0x38] sm:$0xff] (!%p179_p9)   ;;  %v2942_v21 = vld [vmem:[%s3953_s1 + $0x140] sm:$0xff] (!%p179_p9)  }
  0x13   : > { %2462 = vmatpush3.bf16.msra.mxu0 (!%p179_p9), %v2922_v3  ;;  %2870 = vmatpush3.bf16.msra.mxu1 (!%p179_p9), %v2922_v3  ;;  %v2943_v22 = vld [vmem:[%s3953_s1 + $0x80] sm:$0xff] (!%p179_p9)   ;;  %v2945_v24 = vld [vmem:[%s3953_s1 + $0xc8] sm:$0xff] (!%p179_p9)   ;;  %v2953_v32 = vld [vmem:[%s3953_s1 + $0xd0] sm:$0xff] (!%p179_p9)  }
  0x14   : > { %2463 = vmatprep.subr.bf16.mxu0 (!%p179_p9), %v2923_v4  ;;  %2863 = vmatprep.subr.bf16.mxu1 (!%p179_p9), %v2923_v4  ;;  %v2944_v23 = vld [vmem:[%s3953_s1 + $0x100] sm:$0xff] (!%p179_p9)   ;;  %v2956_v27 = vld [vmem:[%s3953_s1 + $0x148] sm:$0xff] (!%p179_p9)   ;;  %v2954_v33 = vld [vmem:[%s3953_s1 + $0x90] sm:$0xff] (!%p179_p9)  }
  0x15   : > { %s3964_s29 = smov (!%p211_p10, %s2266_s29), 63  ;;  %v2946_v28 = vld [vmem:[%s3953_s1 + $0x88] sm:$0xff]   ;;  %v2955_v34 = vld [vmem:[%s3953_s1 + $0xd8] sm:$0xff]   ;;  %v2965_v38 = vld [vmem:[%s3953_s1 + $0xe0] sm:$0xff]  }
  0x16   : > { %s2877_s22 = smul.u32 28, %s3964_s29  ;;  %v2958_v29 = vld [vmem:[%s3953_s1 + $0x108] sm:$0xff]   ;;  %v2957_v37 = vld [vmem:[%s3953_s1 + $0x98] sm:$0xff]   ;;  %v2976_v41 = vld [vmem:[%s3953_s1 + $0x150] sm:$0xff]   ;;  %s2269_s9 = sshll.u32 %s3964_s29, 3 }
  0x17   : > { %2464 = vmatpush3.bf16.msra.mxu0 %v2924_v5  ;;  %2871 = vmatpush3.bf16.msra.mxu1 %v2924_v5  ;;  %v2966_v42 = vld [vmem:[%s3953_s1 + $0xa0] sm:$0xff]   ;;  %v2967_v43 = vld [vmem:[%s3953_s1 + $0xe8] sm:$0xff]   ;;  %v2978_v44 = vld [vmem:[%s3953_s1 + $0x110] sm:$0xff]   ;;  %s3780_s13 = scalar_lea.vmem %s3955_s3, %s2269_s9  ;;  %s2265_s29 = sshll.u32 %s207_s10, 8 }
  0x18   : > { %2465 = vmatprep.subr.bf16.mxu0 %v2925_v6  ;;  %2864 = vmatprep.subr.bf16.mxu1 %v2925_v6  ;;  %s3307_s7 = scalar_lea.vmem %s3952_s0, %s2877_s22  ;;  %v2968_v47 = vld [vmem:[%s3953_s1 + $0xa8] sm:$0xff]   ;;  %v2975_v48 = vld [vmem:[%s3953_s1 + $0xf0] sm:$0xff]   ;;  %v2987_v51 = vld [vmem:[%s3953_s1 + $0x158] sm:$0xff]   ;;  %s3798_s14 = scalar_lea.vmem [#allocation2], %s2265_s29 }
  0x19   : > { %v2937_v11 = vld [vmem:[%s3307_s7 + $0x4] ss:$28 sps:$4 sm:$0xff]   ;;  %v2947_v25 = vld [vmem:[%s3307_s7 + $0x3c] ss:$28 sps:$4 sm:$0xff]   ;;  %v2959_v35 = vld [vmem:[%s3307_s7 + $0x74] ss:$28 sps:$4 sm:$0xff]  }
  0x1a   : > { %v2940_v12 = vld [vmem:[%s3307_s7 + $0x2a4] ss:$28 sps:$4 sm:$0xff]   ;;  %1433 = vmatprep.mubr.bf16.mxu0 %v2937_v11  ;;  %v2949_v26 = vld [vmem:[%s3307_s7 + $0x2dc] ss:$28 sps:$4 sm:$0xff]   ;;  %v2961_v36 = vld [vmem:[%s3307_s7 + $0x314] ss:$28 sps:$4 sm:$0xff]  }
  0x1b   : > { %2466 = vmatpush3.bf16.msra.mxu0 %v2926_v7  ;;  %2872 = vmatpush3.bf16.msra.mxu1 %v2926_v7  ;;  %v2935_v19 = vld [vmem:[%s3307_s7] ss:$28 sps:$4 sm:$0xff]   ;;  %v2951_v30 = vld [vmem:[%s3307_s7 + $0x38] ss:$28 sps:$4 sm:$0xff]   ;;  %v2963_v39 = vld [vmem:[%s3307_s7 + $0x70] ss:$28 sps:$4 sm:$0xff]  }
  0x1c   : > { %2467 = vmatprep.subr.bf16.mxu0 %v2927_v8  ;;  %2865 = vmatprep.subr.bf16.mxu1 %v2927_v8  ;;  %v2938_v20 = vld [vmem:[%s3307_s7 + $0x2a0] ss:$28 sps:$4 sm:$0xff]   ;;  %v2952_v31 = vld [vmem:[%s3307_s7 + $0x2d8] ss:$28 sps:$4 sm:$0xff]   ;;  %v2964_v40 = vld [vmem:[%s3307_s7 + $0x310] ss:$28 sps:$4 sm:$0xff]  }
  0x1d   : > { %1529 = vmatprep.mubr.bf16.mxu1 %v2940_v12  ;;  %v2969_v45 = vld [vmem:[%s3307_s7 + $0xac] ss:$28 sps:$4 sm:$0xff]   ;;  %v2977_v52 = vld [vmem:[%s3953_s1 + $0xb0] sm:$0xff]   ;;  %v2989_v53 = vld [vmem:[%s3953_s1 + $0x118] sm:$0xff]   ;;  %s2187_s22 = sshll.u32 %s3798_s14, 4  ;;  %s3905_s22 = int_to_ptr.vmem [resolvable:$true] %s2187_s22 }
  0x1e   : > { %v2971_v46 = vld [vmem:[%s3307_s7 + $0x34c] ss:$28 sps:$4 sm:$0xff]   ;;  %v2981_v54 = vld [vmem:[%s3307_s7 + $0xe4] ss:$28 sps:$4 sm:$0xff]   ;;  %v2979_v55 = vld [vmem:[%s3953_s1 + $0xf8] sm:$0xff]   ;;  %s3133_s30 = scalar_lea.vmem %s3905_s22, 4096  ;;  %p3140_p0 = scmp.lt.s32.totalorder %s3905_s22, %s3138_s6 }
  0x1f   : > { %2468 = vmatpush3.bf16.msra.mxu0 %v2928_v9  ;;  %2873 = vmatpush3.bf16.msra.mxu1 %v2928_v9  ;;  %v2973_v49 = vld [vmem:[%s3307_s7 + $0xa8] ss:$28 sps:$4 sm:$0xff]   ;;  %v2980_v57 = vld [vmem:[%s3953_s1 + $0xb8] sm:$0xff]   ;;  %v2996_v6 = vld [vmem:[%s3307_s7 + $0x154] ss:$28 sps:$4 sm:$0xff]   ;;  %p3134_p11 = scmp.ne.s32.totalorder %s3905_s22, %s3133_s30 }
  0x20   : > { %2469 = vmatprep.subr.bf16.mxu0 %v2929_v10  ;;  %2866 = vmatprep.subr.bf16.mxu1 %v2929_v10  ;;  %v2974_v50 = vld [vmem:[%s3307_s7 + $0x348] ss:$28 sps:$4 sm:$0xff]   ;;  %v2986_v62 = vld [vmem:[%s3307_s7 + $0xe0] ss:$28 sps:$4 sm:$0xff]   ;;  %v2994_v4 = vld [vmem:[%s3307_s7 + $0x118] ss:$28 sps:$4 sm:$0xff]  }
  0x21   : > { %v2985_v56 = vld [vmem:[%s3307_s7 + $0xc] ss:$28 sps:$4 sm:$0xff]   ;;  %v2988_v58 = vld [vmem:[%s3953_s1 + $0x180] sm:$0xff]   ;;  %v2990_v63 = vld [vmem:[%s3307_s7 + $0x11c] ss:$28 sps:$4 sm:$0xff]   ;;  %p3135_p12 = pnand %p3134_p11, %p3263_p5 }
  0x22   : > { %v2983_v59 = vld [vmem:[%s3307_s7 + $0x8] ss:$28 sps:$4 sm:$0xff]   ;;  %v2995_v5 = vld [vmem:[%s3307_s7 + $0x40] ss:$28 sps:$4 sm:$0xff]   ;;  %v3025_v8 = vld [vmem:[%s3953_s1 + $0x170] sm:$0xff]  }
  0x23   : > { %2470 = vmatpush3.bf16.msra.mxu0 %v2930_v13  ;;  %2874 = vmatpush3.bf16.msra.mxu1 %v2930_v13  ;;  %v3002_v60 = vld [vmem:[%s3953_s1 + $0x160] sm:$0xff]   ;;  %v3010_v1 = vld [vmem:[%s3953_s1 + $0x188] sm:$0xff]   ;;  %v2998_v7 = vld [vmem:[%s3307_s7 + $0x7c] ss:$28 sps:$4 sm:$0xff]   ;;  %p3136_p13 = pneg %p3135_p12 }
  0x24   : > { %2471 = vmatprep.subr.bf16.mxu0 %v2931_v14  ;;  %2867 = vmatprep.subr.bf16.mxu1 %v2931_v14  ;;  %v3003_v61 = vld [vmem:[%s3953_s1 + $0x120] sm:$0xff]   ;;  %v3011_v2 = vld [vmem:[%s3953_s1 + $0x168] sm:$0xff]   ;;  %v3026_v9 = vld [vmem:[%s3953_s1 + $0x130] sm:$0xff]  }
  0x25   : > { %v2992_v0 = vld [vmem:[%s3307_s7 + $0x44] ss:$28 sps:$4 sm:$0xff]   ;;  %v3012_v3 = vld [vmem:[%s3953_s1 + $0x128] sm:$0xff]   ;;  %v3001_v11 = vld [vmem:[%s3307_s7 + $0x78] ss:$28 sps:$4 sm:$0xff]  }
  0x26   : > { %v3000_v10 = vld [vmem:[%s3307_s7 + $0x150] ss:$28 sps:$4 sm:$0xff]  }
  0x27   : > { %2472 = vmatpush3.bf16.msra.mxu0 %v2932_v15  ;;  %2875 = vmatpush3.bf16.msra.mxu1 %v2932_v15  ;;  %v3004_v12 = vld [vmem:[%s3307_s7 + $0x18c] ss:$28 sps:$4 sm:$0xff]   ;;  %v3031_v13 = vld [vmem:[%s3953_s1 + $0x190] sm:$0xff]   ;;  %v3034_v15 = vld [vmem:[%s3953_s1 + $0x178] sm:$0xff]  }
  0x28   : > { %2473 = vmatprep.subr.bf16.mxu0 %v2933_v16  ;;  %2868 = vmatprep.subr.bf16.mxu1 %v2933_v16  ;;  %v3006_v14 = vld [vmem:[%s3307_s7 + $0xb4] ss:$28 sps:$4 sm:$0xff]   ;;  %v3035_v16 = vld [vmem:[%s3953_s1 + $0x138] sm:$0xff]  }
  0x2b   : > { %2474 = vmatpush3.bf16.msra.mxu0 %v2934_v17  ;;  %2876 = vmatpush3.bf16.msra.mxu1 %v2934_v17  ;;  %v3008_v17 = vld [vmem:[%s3307_s7 + $0x188] ss:$28 sps:$4 sm:$0xff]  }
  0x2c   : > { %2571 = vmatprep.subr.bf16.mxu1 %v2941_v18  ;;  %2683 = vmatprep.subr.bf16.mxu0 %v2942_v21  ;;  %v3009_v18 = vld [vmem:[%s3307_s7 + $0xb0] ss:$28 sps:$4 sm:$0xff]  }
  0x2d   : > { %v3015_v21 = vld [vmem:[%s3307_s7 + $0xec] ss:$28 sps:$4 sm:$0xff]  }
  0x2e   : > { %1434 = vmatmul.mubr.bf16.vlgmr.msra.gmra.mrb[0].mxu0 %v2935_v19  ;;  %1530 = vmatmul.mubr.bf16.vlgmr.msra.gmra.mrb[0].mxu1 %v2938_v20  ;;  %v3013_v19 = vld [vmem:[%s3307_s7 + $0x1c4] ss:$28 sps:$4 sm:$0xff]   ;;  %v3048_v20 = vld [vmem:[%s3953_s1 + $0x198] sm:$0xff]  }
  0x2f   : > { %2572 = vmatpush3.bf16.msra.mxu1 %v2943_v22  ;;  %2684 = vmatpush3.bf16.msra.mxu0 %v2944_v23  ;;  %v3017_v22 = vld [vmem:[%s3307_s7 + $0x1c0] ss:$28 sps:$4 sm:$0xff]   ;;  %v3018_v23 = vld [vmem:[%s3307_s7 + $0xe8] ss:$28 sps:$4 sm:$0xff]  }
  0x30   : > { %2573 = vmatprep.subr.bf16.mxu1 %v2945_v24  ;;  %1441 = vmatprep.mubr.bf16.mxu0 %v2947_v25  ;;  %v3019_v24 = vld [vmem:[%s3307_s7 + $0x1fc] ss:$28 sps:$4 sm:$0xff]   ;;  %v3021_v25 = vld [vmem:[%s3307_s7 + $0x124] ss:$28 sps:$4 sm:$0xff]  }
  0x31   : > { %1537 = vmatprep.mubr.bf16.mxu1 %v2949_v26  ;;  %2685 = vmatprep.subr.bf16.mxu0 %v2956_v27  ;;  %v3067_v26 = vld [vmem:[%s3953_s1 + $0x1a0] sm:$0xff]   ;;  %v3023_v27 = vld [vmem:[%s3307_s7 + $0x1f8] ss:$28 sps:$4 sm:$0xff]  }
  0x33   : > { %2574 = vmatpush3.bf16.msra.mxu1 %v2946_v28  ;;  %2686 = vmatpush3.bf16.msra.mxu0 %v2958_v29  ;;  %v3024_v28 = vld [vmem:[%s3307_s7 + $0x120] ss:$28 sps:$4 sm:$0xff]   ;;  %v3027_v29 = vld [vmem:[%s3307_s7 + $0x234] ss:$28 sps:$4 sm:$0xff]  }
  0x34   : > { %2575 = vmatprep.subr.bf16.mxu1 %v2953_v32  ;;  %2687 = vmatprep.subr.bf16.mxu0 %v2976_v41  ;;  %v3032_v32 = vld [vmem:[%s3307_s7 + $0x230] ss:$28 sps:$4 sm:$0xff]   ;;  %v3047_v41 = vld [vmem:[%s3307_s7 + $0x1c8] ss:$28 sps:$4 sm:$0xff]  }
  0x36   : > { %1442 = vmatmul.mubr.bf16.gmra.mrb[4].mxu0 %v2951_v30  ;;  %1538 = vmatmul.mubr.bf16.gmra.mrb[4].mxu1 %v2952_v31  ;;  %v3029_v30 = vld [vmem:[%s3307_s7 + $0x15c] ss:$28 sps:$4 sm:$0xff]   ;;  %v3084_v31 = vld [vmem:[%s3953_s1 + $0x1a8] sm:$0xff]  }
  0x37   : > { %2576 = vmatpush3.bf16.msra.mxu1 %v2954_v33  ;;  %1449 = vmatprep.mubr.bf16.mxu0 %v2959_v35  ;;  %v3033_v33 = vld [vmem:[%s3307_s7 + $0x158] ss:$28 sps:$4 sm:$0xff]  }
  0x38   : > { %2577 = vmatprep.subr.bf16.mxu1 %v2955_v34  ;;  %1545 = vmatprep.mubr.bf16.mxu1 %v2961_v36  ;;  %v3036_v34 = vld [vmem:[%s3307_s7 + $0x26c] ss:$28 sps:$4 sm:$0xff]   ;;  %v3038_v35 = vld [vmem:[%s3307_s7 + $0x194] ss:$28 sps:$4 sm:$0xff]  }
  0x39   : > { %2688 = vmatpush3.bf16.msra.mxu0 %v2978_v44  ;;  %v3040_v36 = vld [vmem:[%s3307_s7 + $0x268] ss:$28 sps:$4 sm:$0xff]   ;;  %v3053_v44 = vld [vmem:[%s3307_s7 + $0x200] ss:$28 sps:$4 sm:$0xff]  }
  0x3a   : > { %2689 = vmatprep.subr.bf16.mxu0 %v2987_v51  ;;  %v3063_v51 = vld [vmem:[%s3307_s7 + $0xbc] ss:$28 sps:$4 sm:$0xff]  }
  0x3b   : > { %2578 = vmatpush3.bf16.msra.mxu1 %v2957_v37  ;;  %v3041_v37 = vld [vmem:[%s3307_s7 + $0x190] ss:$28 sps:$4 sm:$0xff]  }
  0x3c   : > { %2579 = vmatprep.subr.bf16.mxu1 %v2965_v38  ;;  %v3042_v38 = vld [vmem:[%s3307_s7 + $0x1cc] ss:$28 sps:$4 sm:$0xff]  }
  0x3d   : > { %2690 = vmatpush3.bf16.msra.mxu0 %v2989_v53  ;;  %v3066_v53 = vld [vmem:[%s3307_s7 + $0xb8] ss:$28 sps:$4 sm:$0xff]  }
  0x3e   : > { %1450 = vmatmul.mubr.bf16.gmra.mrb[8].mxu0 %v2963_v39  ;;  %1546 = vmatmul.mubr.bf16.gmra.mrb[8].mxu1 %v2964_v40  ;;  %v3046_v39 = vld [vmem:[%s3307_s7 + $0x14] ss:$28 sps:$4 sm:$0xff]  }
  0x3f   : > { %2580 = vmatpush3.bf16.msra.mxu1 %v2966_v42  ;;  %1457 = vmatprep.mubr.bf16.mxu0 %v2969_v45  ;;  %v3044_v40 = vld [vmem:[%s3307_s7 + $0x10] ss:$28 sps:$4 sm:$0xff]   ;;  %v3049_v42 = vld [vmem:[%s3307_s7 + $0x204] ss:$28 sps:$4 sm:$0xff]  }
  0x40   : > { %2581 = vmatprep.subr.bf16.mxu1 %v2967_v43  ;;  %1553 = vmatprep.mubr.bf16.mxu1 %v2971_v46  ;;  %v3051_v43 = vld [vmem:[%s3307_s7 + $0x4c] ss:$28 sps:$4 sm:$0xff]   ;;  %v3055_v46 = vld [vmem:[%s3307_s7 + $0x23c] ss:$28 sps:$4 sm:$0xff]  }
  0x41   : > { %2691 = vmatprep.subr.bf16.mxu0 %v3002_v60  ;;  %v3054_v45 = vld [vmem:[%s3307_s7 + $0x48] ss:$28 sps:$4 sm:$0xff]   ;;  %v3078_v60 = vld [vmem:[%s3307_s7 + $0x2e0] ss:$28 sps:$4 sm:$0xff]  }
  0x42   : > { %2692 = vmatpush3.bf16.msra.mxu0 %v3003_v61  ;;  %v3079_v61 = vld [vmem:[%s3307_s7 + $0x128] ss:$28 sps:$4 sm:$0xff]  }
  0x43   : > { %2582 = vmatpush3.bf16.msra.mxu1 %v2968_v47  ;;  %2693 = vmatprep.subr.bf16.mxu0 %v3011_v2  ;;  %v3057_v47 = vld [vmem:[%s3307_s7 + $0x84] ss:$28 sps:$4 sm:$0xff]   ;;  %v3087_v2 = vld [vmem:[%s3307_s7 + $0x354] ss:$28 sps:$4 sm:$0xff]  }
  0x44   : > { %2583 = vmatprep.subr.bf16.mxu1 %v2975_v48  ;;  %v3059_v48 = vld [vmem:[%s3307_s7 + $0x238] ss:$28 sps:$4 sm:$0xff]  }
  0x46   : > { %1458 = vmatmul.mubr.bf16.gmra.mrb[12].mxu0 %v2973_v49  ;;  %1554 = vmatmul.mubr.bf16.gmra.mrb[12].mxu1 %v2974_v50  ;;  %v3060_v49 = vld [vmem:[%s3307_s7 + $0x80] ss:$28 sps:$4 sm:$0xff]   ;;  %v3061_v50 = vld [vmem:[%s3307_s7 + $0x274] ss:$28 sps:$4 sm:$0xff]  }
  0x47   : > { %2584 = vmatpush3.bf16.msra.mxu1 %v2977_v52  ;;  %1465 = vmatprep.mubr.bf16.mxu0 %v2981_v54  ;;  %v3065_v52 = vld [vmem:[%s3307_s7 + $0x270] ss:$28 sps:$4 sm:$0xff]  }
  0x48   : > { %2585 = vmatprep.subr.bf16.mxu1 %v2979_v55  ;;  %1594 = vmatprep.mubr.bf16.mxu1 %v2985_v56  ;;  %v3068_v54 = vld [vmem:[%s3307_s7 + $0x2ac] ss:$28 sps:$4 sm:$0xff]   ;;  %v3070_v55 = vld [vmem:[%s3307_s7 + $0xf4] ss:$28 sps:$4 sm:$0xff]  }
  0x49   : > { %2694 = vmatpush3.bf16.msra.mxu0 %v3012_v3  ;;  %v3072_v56 = vld [vmem:[%s3307_s7 + $0x2a8] ss:$28 sps:$4 sm:$0xff]   ;;  %v3089_v3 = vld [vmem:[%s3307_s7 + $0x19c] ss:$28 sps:$4 sm:$0xff]  }
  0x4a   : > { %2695 = vmatprep.subr.bf16.mxu0 %v3025_v8  ;;  %v3096_v8 = vld [vmem:[%s3307_s7 + $0x1d0] ss:$28 sps:$4 sm:$0xff]  }
  0x4b   : > { %2586 = vmatpush3.bf16.msra.mxu1 %v2980_v57  ;;  %v3073_v57 = vld [vmem:[%s3307_s7 + $0xf0] ss:$28 sps:$4 sm:$0xff]  }
  0x4c   : > { %2817 = vmatprep.subr.bf16.mxu1 %v2988_v58 }
  0x4d   : > { %2696 = vmatpush3.bf16.msra.mxu0 %v3026_v9  ;;  %v3097_v9 = vld [vmem:[%s3307_s7 + $0x50] ss:$28 sps:$4 sm:$0xff]  }
  0x4e   : > { %1466 = vmatmul.mubr.bf16.gmra.mrb[16].mxu0 %v2986_v62  ;;  %1595 = vmatmul.mubr.bf16.vlgmr.msra.gmra.mrb[16].mxu1 %v2983_v59  ;;  %v3076_v59 = vld [vmem:[%s3307_s7 + $0x12c] ss:$28 sps:$4 sm:$0xff]   ;;  %v3080_v62 = vld [vmem:[%s3307_s7 + $0x31c] ss:$28 sps:$4 sm:$0xff]  }
  0x4f   : > { %2818 = vmatpush3.bf16.msra.mxu1 %v2988_v58  ;;  %1473 = vmatprep.mubr.bf16.mxu0 %v2990_v63  ;;  %v3074_v58 = vld [vmem:[%s3307_s7 + $0x2e4] ss:$28 sps:$4 sm:$0xff]  }
  0x50   : > { %1602 = vmatprep.mubr.bf16.mxu1 %v2992_v0  ;;  %2819 = vmatprep.subr.bf16.mxu1 %v3010_v1  ;;  %v3082_v63 = vld [vmem:[%s3307_s7 + $0x164] ss:$28 sps:$4 sm:$0xff]   ;;  %v3085_v0 = vld [vmem:[%s3307_s7 + $0x318] ss:$28 sps:$4 sm:$0xff]  }
  0x51   : > { %2697 = vmatprep.subr.bf16.mxu0 %v3034_v15  ;;  %v3105_v15 = vld [vmem:[%s3307_s7 + $0xf8] ss:$28 sps:$4 sm:$0xff]  }
  0x52   : > { %2698 = vmatpush3.bf16.msra.mxu0 %v3035_v16  ;;  %v3106_v16 = vld [vmem:[%s3307_s7 + $0x240] ss:$28 sps:$4 sm:$0xff]  }
  0x53   : > { %2820 = vmatpush3.bf16.msra.mxu1 %v3010_v1  ;;  %v3086_v1 = vld [vmem:[%s3307_s7 + $0x160] ss:$28 sps:$4 sm:$0xff]  }
  0x54   : > { %2821 = vmatprep.subr.bf16.mxu1 %v3031_v13 }
  0x56   : > { %1474 = vmatmul.mubr.bf16.gmra.mrb[20].mxu0 %v2994_v4  ;;  %1603 = vmatmul.mubr.bf16.gmra.mrb[20].mxu1 %v2995_v5  ;;  %v3091_v4 = vld [vmem:[%s3307_s7 + $0x350] ss:$28 sps:$4 sm:$0xff]   ;;  %v3092_v5 = vld [vmem:[%s3307_s7 + $0x198] ss:$28 sps:$4 sm:$0xff]  }
  0x57   : > { %1481 = vmatprep.mubr.bf16.mxu0 %v2996_v6  ;;  %1610 = vmatprep.mubr.bf16.mxu1 %v2998_v7  ;;  %v3093_v6 = vld [vmem:[%s3307_s7 + $0x1d4] ss:$28 sps:$4 sm:$0xff]  }
  0x58   : > { %2822 = vmatpush3.bf16.msra.mxu1 %v3031_v13  ;;  %v3095_v7 = vld [vmem:[%s3307_s7 + $0x18] ss:$28 sps:$4 sm:$0xff]   ;;  %v3102_v13 = vld [vmem:[%s3307_s7 + $0xc0] ss:$28 sps:$4 sm:$0xff]  }
  0x59   : > { %2823 = vmatprep.subr.bf16.mxu1 %v3048_v20 }
  0x5c   : > { %2824 = vmatpush3.bf16.msra.mxu1 %v3048_v20  ;;  %v3111_v20 = vld [vmem:[%s3307_s7 + $0x278] ss:$28 sps:$4 sm:$0xff]  }
  0x5d   : > { %2825 = vmatprep.subr.bf16.mxu1 %v3067_v26 }
  0x5e   : > { %1482 = vmatmul.mubr.bf16.gmra.mrb[24].mxu0 %v3000_v10  ;;  %1611 = vmatmul.mubr.bf16.gmra.mrb[24].mxu1 %v3001_v11  ;;  %v3098_v10 = vld [vmem:[%s3307_s7 + $0x20c] ss:$28 sps:$4 sm:$0xff]  }
  0x5f   : > { %1489 = vmatprep.mubr.bf16.mxu0 %v3004_v12  ;;  %1618 = vmatprep.mubr.bf16.mxu1 %v3006_v14  ;;  %v3100_v11 = vld [vmem:[%s3307_s7 + $0x88] ss:$28 sps:$4 sm:$0xff]  }
  0x60   : > { %2826 = vmatpush3.bf16.msra.mxu1 %v3067_v26  ;;  %v3101_v12 = vld [vmem:[%s3307_s7 + $0x208] ss:$28 sps:$4 sm:$0xff]  }
  0x61   : > { %2827 = vmatprep.subr.bf16.mxu1 %v3084_v31  ;;  %v3103_v14 = vld [vmem:[%s3307_s7 + $0x244] ss:$28 sps:$4 sm:$0xff]   ;;  %v3118_v26 = vld [vmem:[%s3307_s7 + $0x2ec] ss:$28 sps:$4 sm:$0xff]  }
  0x64   : > { %2828 = vmatpush3.bf16.msra.mxu1 %v3084_v31  ;;  %v3125_v31 = vld [vmem:[%s3307_s7 + $0x2b8] ss:$28 sps:$4 sm:$0xff]  }
  0x66   : > { %1490 = vmatmul.mubr.bf16.gmra.mrb[28].mxu0 %v3008_v17  ;;  %1619 = vmatmul.mubr.bf16.gmra.mrb[28].mxu1 %v3009_v18  ;;  %v3107_v17 = vld [vmem:[%s3307_s7 + $0x130] ss:$28 sps:$4 sm:$0xff]   ;;  %v3108_v18 = vld [vmem:[%s3307_s7 + $0x27c] ss:$28 sps:$4 sm:$0xff]  }
  0x67   : > { %1497 = vmatprep.mubr.bf16.mxu0 %v3013_v19  ;;  %1626 = vmatprep.mubr.bf16.mxu1 %v3015_v21  ;;  %v3110_v19 = vld [vmem:[%s3307_s7 + $0x168] ss:$28 sps:$4 sm:$0xff]   ;;  %v3112_v21 = vld [vmem:[%s3307_s7 + $0x1a0] ss:$28 sps:$4 sm:$0xff]  }
  0x6e   : > { %1498 = vmatmul.mubr.bf16.gmra.mrb[32].mxu0 %v3017_v22  ;;  %1627 = vmatmul.mubr.bf16.gmra.mrb[32].mxu1 %v3018_v23  ;;  %v3113_v22 = vld [vmem:[%s3307_s7 + $0x2b4] ss:$28 sps:$4 sm:$0xff]  }
  0x6f   : > { %1505 = vmatprep.mubr.bf16.mxu0 %v3019_v24  ;;  %1634 = vmatprep.mubr.bf16.mxu1 %v3021_v25  ;;  %v3115_v23 = vld [vmem:[%s3307_s7 + $0x1d8] ss:$28 sps:$4 sm:$0xff]   ;;  %v3116_v24 = vld [vmem:[%s3307_s7 + $0x2b0] ss:$28 sps:$4 sm:$0xff]  }
  0x70   : > { %v3117_v25 = vld [vmem:[%s3307_s7 + $0x210] ss:$28 sps:$4 sm:$0xff]  }
  0x76   : > { %1506 = vmatmul.mubr.bf16.gmra.mrb[36].mxu0 %v3023_v27  ;;  %1635 = vmatmul.mubr.bf16.gmra.mrb[36].mxu1 %v3024_v28  ;;  %v3120_v27 = vld [vmem:[%s3307_s7 + $0x248] ss:$28 sps:$4 sm:$0xff]  }
  0x77   : > { %1513 = vmatprep.mubr.bf16.mxu0 %v3027_v29  ;;  %1642 = vmatprep.mubr.bf16.mxu1 %v3029_v30  ;;  %v3121_v28 = vld [vmem:[%s3307_s7 + $0x2e8] ss:$28 sps:$4 sm:$0xff]   ;;  %v3122_v29 = vld [vmem:[%s3307_s7 + $0x280] ss:$28 sps:$4 sm:$0xff]  }
  0x78   : > { %v3123_v30 = vld [vmem:[%s3307_s7 + $0x324] ss:$28 sps:$4 sm:$0xff]  }
  0x7e   : > { %1514 = vmatmul.mubr.bf16.gmra.mrb[40].mxu0 %v3032_v32  ;;  %1643 = vmatmul.mubr.bf16.gmra.mrb[40].mxu1 %v3033_v33  ;;  %v3126_v32 = vld [vmem:[%s3307_s7 + $0x320] ss:$28 sps:$4 sm:$0xff]   ;;  %v3127_v33 = vld [vmem:[%s3307_s7 + $0x2f0] ss:$28 sps:$4 sm:$0xff]  }
  0x7f   : > { %1521 = vmatprep.mubr.bf16.mxu0 %v3036_v34  ;;  %1650 = vmatprep.mubr.bf16.mxu1 %v3038_v35  ;;  %v3128_v34 = vld [vmem:[%s3307_s7 + $0x35c] ss:$28 sps:$4 sm:$0xff]   ;;  %v3130_v35 = vld [vmem:[%s3307_s7 + $0x328] ss:$28 sps:$4 sm:$0xff]  }
  0x86   : > { %1522 = vmatmul.mubr.bf16.gmra.mrb[44].mxu0 %v3040_v36  ;;  %1651 = vmatmul.mubr.bf16.gmra.mrb[44].mxu1 %v3041_v37 }
  0x87   : > { %1658 = vmatprep.mubr.bf16.mxu1 %v3042_v38  ;;  %1755 = vmatprep.mubr.bf16.mxu0 %v3046_v39 }
  0x8e   : > { %1659 = vmatmul.mubr.bf16.gmra.mrb[48].mxu1 %v3047_v41  ;;  %1756 = vmatmul.mubr.bf16.vlgmr.msra.gmra.mrb[48].mxu0 %v3044_v40  ;;  %v3131_v40 = vld [vmem:[%s3307_s7 + $0x358] ss:$28 sps:$4 sm:$0xff]   ;;  %v3132_v41 = vld [vmem:[%s3307_s7 + $0x360] ss:$28 sps:$4 sm:$0xff]   ;;  %s3139_s7 = scalar_lea.vmem %s3138_s6, 8192 }
  0x8f   : > { %1666 = vmatprep.mubr.bf16.mxu1 %v3049_v42  ;;  %1763 = vmatprep.mubr.bf16.mxu0 %v3051_v43  ;;  %p3141_p1 = scmp.lt.s32.totalorder %s3139_s7, %s3133_s30 }
  0x91   : > { %p3142_p2 = por %p3141_p1, %p3140_p0 }
  0x93   : > { %p3143_p3 = pnand %p3142_p2, %p3136_p13 }
  0x96   : > { %1667 = vmatmul.mubr.bf16.gmra.mrb[52].mxu1 %v3053_v44  ;;  %1764 = vmatmul.mubr.bf16.gmra.mrb[52].mxu0 %v3054_v45 }
  0x97   : > { %1674 = vmatprep.mubr.bf16.mxu1 %v3055_v46  ;;  %1771 = vmatprep.mubr.bf16.mxu0 %v3057_v47 }
  0x9e   : > { %1675 = vmatmul.mubr.bf16.gmra.mrb[56].mxu1 %v3059_v48  ;;  %1772 = vmatmul.mubr.bf16.gmra.mrb[56].mxu0 %v3060_v49 }
  0x9f   : > { %1682 = vmatprep.mubr.bf16.mxu1 %v3061_v50  ;;  %1779 = vmatprep.mubr.bf16.mxu0 %v3063_v51 }
  0xa6   : > { %1683 = vmatmul.mubr.bf16.gmra.mrb[60].mxu1 %v3065_v52  ;;  %1780 = vmatmul.mubr.bf16.gmra.mrb[60].mxu0 %v3066_v53 }
  0xa7   : > { %1690 = vmatprep.mubr.bf16.mxu1 %v3068_v54  ;;  %1787 = vmatprep.mubr.bf16.mxu0 %v3070_v55 }
  0xae   : > { %1691 = vmatmul.mubr.bf16.gmra.mrb[64].mxu1 %v3072_v56  ;;  %1788 = vmatmul.mubr.bf16.gmra.mrb[64].mxu0 %v3073_v57 }
  0xaf   : > { %1698 = vmatprep.mubr.bf16.mxu1 %v3074_v58  ;;  %1795 = vmatprep.mubr.bf16.mxu0 %v3076_v59 }
  0xb6   : > { %1699 = vmatmul.mubr.bf16.gmra.mrb[68].mxu1 %v3078_v60  ;;  %1796 = vmatmul.mubr.bf16.gmra.mrb[68].mxu0 %v3079_v61 }
  0xb7   : > { %1706 = vmatprep.mubr.bf16.mxu1 %v3080_v62  ;;  %1803 = vmatprep.mubr.bf16.mxu0 %v3082_v63 }
  0xbe   : > { %1707 = vmatmul.mubr.bf16.gmra.mrb[72].mxu1 %v3085_v0  ;;  %1804 = vmatmul.mubr.bf16.gmra.mrb[72].mxu0 %v3086_v1 }
  0xbf   : > { %1714 = vmatprep.mubr.bf16.mxu1 %v3087_v2  ;;  %1811 = vmatprep.mubr.bf16.mxu0 %v3089_v3 }
  0xc6   : > { %1715 = vmatmul.mubr.bf16.gmra.mrb[76].mxu1 %v3091_v4  ;;  %1812 = vmatmul.mubr.bf16.gmra.mrb[76].mxu0 %v3092_v5 }
  0xc7   : > { %1819 = vmatprep.mubr.bf16.mxu0 %v3093_v6  ;;  %2829 = vmatprep.mubr.msk.bf16.mxu1 %vm1352_vm0, %v3095_v7 }
  0xce   : > { %1820 = vmatmul.mubr.bf16.gmra.mrb[80].mxu0 %v3096_v8  ;;  %2830 = vmatmul.mubr.msk.bf16.vlgmr.msra.gmra.mrb[80].mxu1 %vm1352_vm0, %v3097_v9 }
  0xcf   : > { %1827 = vmatprep.mubr.bf16.mxu0 %v3098_v10  ;;  %2833 = vmatprep.mubr.msk.bf16.mxu1 %vm1352_vm0, %v3100_v11 }
  0xd6   : > { %1828 = vmatmul.mubr.bf16.gmra.mrb[84].mxu0 %v3101_v12  ;;  %2834 = vmatmul.mubr.msk.bf16.gmra.mrb[84].mxu1 %vm1352_vm0, %v3102_v13 }
  0xd7   : > { %1835 = vmatprep.mubr.bf16.mxu0 %v3103_v14  ;;  %2837 = vmatprep.mubr.msk.bf16.mxu1 %vm1352_vm0, %v3105_v15 }
  0xde   : > { %1836 = vmatmul.mubr.bf16.gmra.mrb[88].mxu0 %v3106_v16  ;;  %2838 = vmatmul.mubr.msk.bf16.gmra.mrb[88].mxu1 %vm1352_vm0, %v3107_v17 }
  0xdf   : > { %1843 = vmatprep.mubr.bf16.mxu0 %v3108_v18  ;;  %2841 = vmatprep.mubr.msk.bf16.mxu1 %vm1352_vm0, %v3110_v19 }
  0xe6   : > { %1844 = vmatmul.mubr.bf16.gmra.mrb[92].mxu0 %v3111_v20  ;;  %2842 = vmatmul.mubr.msk.bf16.gmra.mrb[92].mxu1 %vm1352_vm0, %v3112_v21 }
  0xe7   : > { %1851 = vmatprep.mubr.bf16.mxu0 %v3113_v22  ;;  %2845 = vmatprep.mubr.msk.bf16.mxu1 %vm1352_vm0, %v3115_v23  ;;  %v3591_v22 = vld [vmem:[%s3954_s2] ss:$0 sm:$0xff] }
  0xee   : > { %1852 = vmatmul.mubr.bf16.gmra.mrb[96].mxu0 %v3116_v24  ;;  %2846 = vmatmul.mubr.msk.bf16.gmra.mrb[96].mxu1 %vm1352_vm0, %v3117_v25 }
  0xef   : > { %1859 = vmatprep.mubr.bf16.mxu0 %v3118_v26  ;;  %2849 = vmatprep.mubr.msk.bf16.mxu1 %vm1352_vm0, %v3120_v27 }
  0xf6   : > { %1860 = vmatmul.mubr.bf16.gmra.mrb[100].mxu0 %v3121_v28  ;;  %2850 = vmatmul.mubr.msk.bf16.gmra.mrb[100].mxu1 %vm1352_vm0, %v3122_v29 }
  0xf7   : > { %1867 = vmatprep.mubr.bf16.mxu0 %v3123_v30  ;;  %2853 = vmatprep.mubr.msk.bf16.mxu1 %vm1352_vm0, %v3125_v31 }
  0xfe   : > { %1868 = vmatmul.mubr.bf16.gmra.mrb[104].mxu0 %v3126_v32  ;;  %2854 = vmatmul.mubr.msk.bf16.gmra.mrb[104].mxu1 %vm1352_vm0, %v3127_v33 }
  0xff   : > { %1875 = vmatprep.mubr.bf16.mxu0 %v3128_v34  ;;  %2857 = vmatprep.mubr.msk.bf16.mxu1 %vm1352_vm0, %v3130_v35 }
 0x101   : > { %v2475_v36 = vpop.f32.mrb[0].mxu0  ;;  %v2547_v37 = vpop.f32.mrb[0].mxu1 }
 0x102   : > { %v2476_v38 = vpop.f32.mrb[1].mxu0  ;;  %v2548_v39 = vpop.f32.mrb[1].mxu1 }
 0x103   : > { %v2477_v42 = vadd.f32 %v2476_v38, %v2475_v36  ;;  %v2478_v43 = vpop.f32.mrb[2].mxu0  ;;  %v3571_v44 = vadd.f32 %v2548_v39, %v2547_v37  ;;  %v2550_v45 = vpop.f32.mrb[2].mxu1 }
 0x104   : > { %v2479_v46 = vpop.f32.mrb[3].mxu0  ;;  %v2551_v47 = vpop.f32.mrb[3].mxu1 }
 0x105   : > { %v2480_v48 = vadd.f32 %v2479_v46, %v2478_v43  ;;  %v3573_v49 = vadd.f32 %v2551_v47, %v2550_v45  ;;  %v1436_v27 = vadd.f32 %v2477_v42, %v3591_v22 }
 0x106   : > { %1876 = vmatmul.mubr.bf16.gmra.mrb[108].mxu0 %v3131_v40  ;;  %2858 = vmatmul.mubr.msk.bf16.gmra.mrb[108].mxu1 %vm1352_vm0, %v3132_v41 }
 0x107   : > { %v1439_v34 = vadd.f32 %v2480_v48, %v3591_v22 }
 0x109   : > { %v2481_v50 = vpop.f32.mrb[4].mxu0  ;;  %v2553_v51 = vpop.f32.mrb[4].mxu1 }
 0x10a   : > { %v2482_v52 = vpop.f32.mrb[5].mxu0  ;;  %v2554_v53 = vpop.f32.mrb[5].mxu1 }
 0x10b   : > { %v2483_v54 = vadd.f32 %v2482_v52, %v2481_v50  ;;  %v2484_v55 = vpop.f32.mrb[6].mxu0  ;;  %v3576_v56 = vadd.f32 %v2554_v53, %v2553_v51  ;;  %v2556_v57 = vpop.f32.mrb[6].mxu1 }
 0x10c   : > { %v2485_v58 = vpop.f32.mrb[7].mxu0  ;;  %v2557_v59 = vpop.f32.mrb[7].mxu1 }
 0x10d   : > { %v2486_v60 = vadd.f32 %v2485_v58, %v2484_v55  ;;  %v3578_v61 = vadd.f32 %v2557_v59, %v2556_v57  ;;  %v1444_v42 = vadd.f32 %v2483_v54, %v3591_v22 }
 0x10f   : > { %v1447_v48 = vadd.f32 %v2486_v60, %v3591_v22 }
 0x111   : > { %v2487_v62 = vpop.f32.mrb[8].mxu0  ;;  %v2559_v63 = vpop.f32.mrb[8].mxu1 }
 0x112   : > { %v2488_v0 = vpop.f32.mrb[9].mxu0  ;;  %v2560_v1 = vpop.f32.mrb[9].mxu1 }
 0x113   : > { %v2489_v2 = vadd.f32 %v2488_v0, %v2487_v62  ;;  %v2490_v3 = vpop.f32.mrb[10].mxu0  ;;  %v3580_v4 = vadd.f32 %v2560_v1, %v2559_v63  ;;  %v2562_v5 = vpop.f32.mrb[10].mxu1 }
 0x114   : > { %v2491_v6 = vpop.f32.mrb[11].mxu0  ;;  %v2563_v7 = vpop.f32.mrb[11].mxu1 }
 0x115   : > { %v2492_v8 = vadd.f32 %v2491_v6, %v2490_v3  ;;  %v3582_v9 = vadd.f32 %v2563_v7, %v2562_v5  ;;  %v1452_v54 = vadd.f32 %v2489_v2, %v3591_v22 }
 0x117   : > { %v1455_v60 = vadd.f32 %v2492_v8, %v3591_v22 }
 0x119   : > { %v2493_v10 = vpop.f32.mrb[12].mxu0  ;;  %v2565_v11 = vpop.f32.mrb[12].mxu1 }
 0x11a   : > { %v2494_v12 = vpop.f32.mrb[13].mxu0  ;;  %v2566_v13 = vpop.f32.mrb[13].mxu1 }
 0x11b   : > { %v2495_v14 = vadd.f32 %v2494_v12, %v2493_v10  ;;  %v2496_v15 = vpop.f32.mrb[14].mxu0  ;;  %v3584_v16 = vadd.f32 %v2566_v13, %v2565_v11  ;;  %v2568_v17 = vpop.f32.mrb[14].mxu1 }
 0x11c   : > { %v2497_v18 = vpop.f32.mrb[15].mxu0  ;;  %v2569_v19 = vpop.f32.mrb[15].mxu1 }
 0x11d   : > { %v2498_v20 = vadd.f32 %v2497_v18, %v2496_v15  ;;  %v3586_v21 = vadd.f32 %v2569_v19, %v2568_v17  ;;  %v1460_v2 = vadd.f32 %v2495_v14, %v3591_v22 }
 0x11f   : > { %v1463_v8 = vadd.f32 %v2498_v20, %v3591_v22 }
 0x121   : > { %v2499_v23 = vpop.f32.mrb[16].mxu0  ;;  %v2587_v24 = vpop.f32.mrb[16].mxu1 }
 0x122   : > { %v2500_v25 = vpop.f32.mrb[17].mxu0  ;;  %v2588_v26 = vpop.f32.mrb[17].mxu1 }
 0x123   : > { %v3594_v28 = vadd.f32 %v2500_v25, %v2499_v23  ;;  %v2589_v29 = vadd.f32 %v2588_v26, %v2587_v24  ;;  %v2502_v30 = vpop.f32.mrb[18].mxu0  ;;  %v2590_v31 = vpop.f32.mrb[18].mxu1 }
 0x124   : > { %v2503_v32 = vpop.f32.mrb[19].mxu0  ;;  %v2591_v33 = vpop.f32.mrb[19].mxu1 }
 0x125   : > { %v3597_v35 = vadd.f32 %v2589_v29, %v1436_v27  ;;  %v2504_v36 = vadd.f32 %v2503_v32, %v2502_v30  ;;  %v2592_v37 = vadd.f32 %v2591_v33, %v2590_v31  ;;  %v1468_v14 = vadd.f32 %v3594_v28, %v3591_v22 }
 0x127   : > { %v3599_v38 = vadd.f32 %v2592_v37, %v1439_v34 }
 0x129   : > { %v2505_v39 = vpop.f32.mrb[20].mxu0  ;;  %v2593_v40 = vpop.f32.mrb[20].mxu1 }
 0x12a   : > { %v2506_v41 = vpop.f32.mrb[21].mxu0  ;;  %v2594_v43 = vpop.f32.mrb[21].mxu1 }
 0x12b   : > { %v3602_v45 = vadd.f32 %v2506_v41, %v2505_v39  ;;  %v2595_v46 = vadd.f32 %v2594_v43, %v2593_v40  ;;  %v2508_v47 = vpop.f32.mrb[22].mxu0  ;;  %v2596_v50 = vpop.f32.mrb[22].mxu1 }
 0x12c   : > { %v2509_v51 = vpop.f32.mrb[23].mxu0  ;;  %v2597_v52 = vpop.f32.mrb[23].mxu1 }
 0x12d   : > { %v3605_v53 = vadd.f32 %v2595_v46, %v1444_v42  ;;  %v2510_v55 = vadd.f32 %v2509_v51, %v2508_v47  ;;  %v2598_v57 = vadd.f32 %v2597_v52, %v2596_v50  ;;  %v1471_v51 = vadd.f32 %v2504_v36, %v3591_v22 }
 0x12e   : > { %v1476_v28 = vadd.f32 %v3602_v45, %v3591_v22 }
 0x12f   : > { %v3607_v58 = vadd.f32 %v2598_v57, %v1447_v48 }
 0x131   : > { %v2511_v59 = vpop.f32.mrb[24].mxu0  ;;  %v2599_v62 = vpop.f32.mrb[24].mxu1 }
 0x132   : > { %v2512_v63 = vpop.f32.mrb[25].mxu0  ;;  %v2600_v0 = vpop.f32.mrb[25].mxu1 }
 0x133   : > { %v3610_v1 = vadd.f32 %v2512_v63, %v2511_v59  ;;  %v2601_v3 = vadd.f32 %v2600_v0, %v2599_v62  ;;  %v2514_v5 = vpop.f32.mrb[26].mxu0  ;;  %v2602_v6 = vpop.f32.mrb[26].mxu1 }
 0x134   : > { %v2515_v7 = vpop.f32.mrb[27].mxu0  ;;  %v2603_v10 = vpop.f32.mrb[27].mxu1 }
 0x135   : > { %v3613_v11 = vadd.f32 %v2601_v3, %v1452_v54  ;;  %v2516_v12 = vadd.f32 %v2515_v7, %v2514_v5  ;;  %v2604_v13 = vadd.f32 %v2603_v10, %v2602_v6  ;;  %v1484_v45 = vadd.f32 %v3610_v1, %v3591_v22 }
 0x137   : > { %v3615_v15 = vadd.f32 %v2604_v13, %v1455_v60  ;;  %v1479_v60 = vadd.f32 %v2510_v55, %v3591_v22 }
 0x139   : > { %v2517_v17 = vpop.f32.mrb[28].mxu0  ;;  %v2605_v18 = vpop.f32.mrb[28].mxu1 }
 0x13a   : > { %v2518_v19 = vpop.f32.mrb[29].mxu0  ;;  %v2606_v23 = vpop.f32.mrb[29].mxu1 }
 0x13b   : > { %v3618_v24 = vadd.f32 %v2518_v19, %v2517_v17  ;;  %v2607_v25 = vadd.f32 %v2606_v23, %v2605_v18  ;;  %v2520_v26 = vpop.f32.mrb[30].mxu0  ;;  %v2608_v27 = vpop.f32.mrb[30].mxu1 }
 0x13c   : > { %v2521_v29 = vpop.f32.mrb[31].mxu0  ;;  %v2609_v30 = vpop.f32.mrb[31].mxu1 }
 0x13d   : > { %v3621_v31 = vadd.f32 %v2607_v25, %v1460_v2  ;;  %v2522_v32 = vadd.f32 %v2521_v29, %v2520_v26  ;;  %v2610_v33 = vadd.f32 %v2609_v30, %v2608_v27 }
 0x13f   : > { %v3623_v34 = vadd.f32 %v2610_v33, %v1463_v8 }
 0x141   : > { %v2523_v37 = vpop.f32.mrb[32].mxu0  ;;  %v2611_v39 = vpop.f32.mrb[32].mxu1 }
 0x142   : > { %v2524_v40 = vpop.f32.mrb[33].mxu0  ;;  %v2612_v41 = vpop.f32.mrb[33].mxu1 }
 0x143   : > { %v3627_v43 = vadd.f32 %v2524_v40, %v2523_v37  ;;  %v2613_v42 = vadd.f32 %v2612_v41, %v2611_v39  ;;  %v2526_v46 = vpop.f32.mrb[34].mxu0  ;;  %v2614_v47 = vpop.f32.mrb[34].mxu1  ;;  %v1487_v37 = vadd.f32 %v2516_v12, %v3591_v22 }
 0x144   : > { %v2527_v50 = vpop.f32.mrb[35].mxu0  ;;  %v2615_v20 = vpop.f32.mrb[35].mxu1 }
 0x145   : > { %v3630_v52 = vadd.f32 %v2613_v42, %v1468_v14  ;;  %v2528_v48 = vadd.f32 %v2527_v50, %v2526_v46  ;;  %v2616_v57 = vadd.f32 %v2615_v20, %v2614_v47  ;;  %v1492_v50 = vadd.f32 %v3618_v24, %v3591_v22 }
 0x147   : > { %v3632_v59 = vadd.f32 %v2616_v57, %v1471_v51 }
 0x149   : > { %v2529_v62 = vpop.f32.mrb[36].mxu0  ;;  %v2617_v63 = vpop.f32.mrb[36].mxu1 }
 0x14a   : > { %v2530_v0 = vpop.f32.mrb[37].mxu0  ;;  %v2618_v54 = vpop.f32.mrb[37].mxu1 }
 0x14b   : > { %v3636_v3 = vadd.f32 %v2530_v0, %v2529_v62  ;;  %v2619_v5 = vadd.f32 %v2618_v54, %v2617_v63  ;;  %v2532_v6 = vpop.f32.mrb[38].mxu0  ;;  %v2620_v7 = vpop.f32.mrb[38].mxu1  ;;  %v1495_v0 = vadd.f32 %v2522_v32, %v3591_v22  ;;  %v1503_v32 = vadd.f32 %v2528_v48, %v3591_v22 }
 0x14c   : > { %v2533_v10 = vpop.f32.mrb[39].mxu0  ;;  %v2621_v36 = vpop.f32.mrb[39].mxu1 }
 0x14d   : > { %v3639_v13 = vadd.f32 %v2619_v5, %v1476_v28  ;;  %v2534_v17 = vadd.f32 %v2533_v10, %v2532_v6  ;;  %v2622_v18 = vadd.f32 %v2621_v36, %v2620_v7  ;;  %v1508_v48 = vadd.f32 %v3636_v3, %v3591_v22 }
 0x14f   : > { %v3641_v19 = vadd.f32 %v2622_v18, %v1479_v60  ;;  %v1500_v60 = vadd.f32 %v3627_v43, %v3591_v22 }
 0x151   : > { %v2535_v23 = vpop.f32.mrb[40].mxu0  ;;  %v2623_v2 = vpop.f32.mrb[40].mxu1 }
 0x152   : > { %v2536_v25 = vpop.f32.mrb[41].mxu0  ;;  %v2624_v26 = vpop.f32.mrb[41].mxu1 }
 0x153   : > { %v3645_v27 = vadd.f32 %v2536_v25, %v2535_v23  ;;  %v2625_v29 = vadd.f32 %v2624_v26, %v2623_v2  ;;  %v2538_v30 = vpop.f32.mrb[42].mxu0  ;;  %v2626_v8 = vpop.f32.mrb[42].mxu1 }
 0x154   : > { %v2539_v33 = vpop.f32.mrb[43].mxu0  ;;  %v2627_v55 = vpop.f32.mrb[43].mxu1 }
 0x155   : > { %v3648_v39 = vadd.f32 %v2625_v29, %v1484_v45  ;;  %v3650_v40 = vadd.f32 %v2539_v33, %v2538_v30  ;;  %v2628_v41 = vadd.f32 %v2627_v55, %v2626_v8 }
 0x157   : > { %v3652_v14 = vadd.f32 %v2628_v41, %v1487_v37 }
 0x159   : > { %v2541_v42 = vpop.f32.mrb[44].mxu0  ;;  %v2629_v46 = vpop.f32.mrb[44].mxu1 }
 0x15a   : > { %v2542_v47 = vpop.f32.mrb[45].mxu0  ;;  %v2630_v1 = vpop.f32.mrb[45].mxu1 }
 0x15b   : > { %v3656_v20 = vadd.f32 %v2542_v47, %v2541_v42  ;;  %v2631_v51 = vadd.f32 %v2630_v1, %v2629_v46  ;;  %v2544_v57 = vpop.f32.mrb[46].mxu0  ;;  %v2632_v62 = vpop.f32.mrb[46].mxu1 }
 0x15c   : > { %v2545_v12 = vpop.f32.mrb[47].mxu0  ;;  %v2633_v63 = vpop.f32.mrb[47].mxu1 }
 0x15d   : > { %v3659_v54 = vadd.f32 %v2631_v51, %v1492_v50  ;;  %v3661_v28 = vadd.f32 %v2545_v12, %v2544_v57  ;;  %v2634_v5 = vadd.f32 %v2633_v63, %v2632_v62  ;;  %v1511_v57 = vadd.f32 %v2534_v17, %v3591_v22 }
 0x15e   : > { %v1516_v17 = vadd.f32 %v3645_v27, %v3591_v22 }
 0x15f   : > { %v3663_v6 = vadd.f32 %v2634_v5, %v1495_v0 }
 0x161   : > { %v2635_v7 = vpop.f32.mrb[48].mxu1  ;;  %v2699_v10 = vpop.f32.mrb[48].mxu0 }
 0x162   : > { %v2636_v36 = vpop.f32.mrb[49].mxu1  ;;  %v2700_v24 = vpop.f32.mrb[49].mxu0 }
 0x163   : > { %v2637_v18 = vadd.f32 %v2636_v36, %v2635_v7  ;;  %v2701_v23 = vadd.f32 %v2700_v24, %v2699_v10  ;;  %v2638_v2 = vpop.f32.mrb[50].mxu1  ;;  %v2702_v25 = vpop.f32.mrb[50].mxu0 }
 0x164   : > { %v2639_v26 = vpop.f32.mrb[51].mxu1  ;;  %v2703_v45 = vpop.f32.mrb[51].mxu0 }
 0x165   : > { %v3668_v29 = vadd.f32 %v2637_v18, %v1500_v60  ;;  %v2640_v30 = vadd.f32 %v2639_v26, %v2638_v2  ;;  %v2704_v8 = vadd.f32 %v2703_v45, %v2702_v25  ;;  %v3671_v33 = vadd.f32 %v2701_v23, %v3597_v35 }
 0x167   : > { %v3673_v55 = vadd.f32 %v2640_v30, %v1503_v32  ;;  %v3676_v37 = vadd.f32 %v2704_v8, %v3599_v38 }
 0x169   : > { %v2641_v43 = vpop.f32.mrb[52].mxu1  ;;  %v2705_v41 = vpop.f32.mrb[52].mxu0 }
 0x16a   : > { %v2642_v42 = vpop.f32.mrb[53].mxu1  ;;  %v2706_v46 = vpop.f32.mrb[53].mxu0 }
 0x16b   : > { %v2643_v47 = vadd.f32 %v2642_v42, %v2641_v43  ;;  %v2707_v1 = vadd.f32 %v2706_v46, %v2705_v41  ;;  %v2644_v50 = vpop.f32.mrb[54].mxu1  ;;  %v2708_v51 = vpop.f32.mrb[54].mxu0 }
 0x16c   : > { %v2645_v35 = vpop.f32.mrb[55].mxu1  ;;  %v2709_v62 = vpop.f32.mrb[55].mxu0 }
 0x16d   : > { %v3681_v12 = vadd.f32 %v2643_v47, %v1508_v48  ;;  %v2646_v63 = vadd.f32 %v2645_v35, %v2644_v50  ;;  %v2710_v38 = vadd.f32 %v2709_v62, %v2708_v51  ;;  %v3684_v0 = vadd.f32 %v2707_v1, %v3605_v53 }
 0x16e   : > { %v1519_v53 = vadd.f32 %v3650_v40, %v3591_v22  ;;  %v1524_v40 = vadd.f32 %v3656_v20, %v3591_v22 }
 0x16f   : > { %v3686_v5 = vadd.f32 %v2646_v63, %v1511_v57  ;;  %v3689_v7 = vadd.f32 %v2710_v38, %v3607_v58 }
 0x171   : > { %v2647_v3 = vpop.f32.mrb[56].mxu1  ;;  %v2711_v10 = vpop.f32.mrb[56].mxu0 }
 0x172   : > { %v2648_v36 = vpop.f32.mrb[57].mxu1  ;;  %v2712_v24 = vpop.f32.mrb[57].mxu0 }
 0x173   : > { %v2649_v60 = vadd.f32 %v2648_v36, %v2647_v3  ;;  %v2713_v18 = vadd.f32 %v2712_v24, %v2711_v10  ;;  %v2650_v23 = vpop.f32.mrb[58].mxu1  ;;  %v2714_v2 = vpop.f32.mrb[58].mxu0 }
 0x174   : > { %v2651_v25 = vpop.f32.mrb[59].mxu1  ;;  %v2715_v32 = vpop.f32.mrb[59].mxu0 }
 0x175   : > { %v3695_v26 = vadd.f32 %v2649_v60, %v1516_v17  ;;  %v2652_v58 = vadd.f32 %v2651_v25, %v2650_v23  ;;  %v2716_v45 = vadd.f32 %v2715_v32, %v2714_v2  ;;  %v3698_v30 = vadd.f32 %v2713_v18, %v3613_v11 }
 0x176   : > { %v1527_v11 = vadd.f32 %v3661_v28, %v3591_v22  ;;  %v1532_v28 = vadd.f32 %v3571_v44, %v3591_v22 }
 0x177   : > { %v3700_v8 = vadd.f32 %v2652_v58, %v1519_v53  ;;  %v3703_v27 = vadd.f32 %v2716_v45, %v3615_v15 }
 0x179   : > { %v2653_v43 = vpop.f32.mrb[60].mxu1  ;;  %v2717_v41 = vpop.f32.mrb[60].mxu0 }
 0x17a   : > { %v2654_v42 = vpop.f32.mrb[61].mxu1  ;;  %v2718_v46 = vpop.f32.mrb[61].mxu0 }
 0x17b   : > { %v2655_v48 = vadd.f32 %v2654_v42, %v2653_v43  ;;  %v2719_v47 = vadd.f32 %v2718_v46, %v2717_v41  ;;  %v2656_v1 = vpop.f32.mrb[62].mxu1  ;;  %v2720_v50 = vpop.f32.mrb[62].mxu0 }
 0x17c   : > { %v2657_v51 = vpop.f32.mrb[63].mxu1  ;;  %v2721_v57 = vpop.f32.mrb[63].mxu0 }
 0x17d   : > { %v3709_v35 = vadd.f32 %v2655_v48, %v1524_v40  ;;  %v2658_v15 = vadd.f32 %v2657_v51, %v2656_v1  ;;  %v2722_v62 = vadd.f32 %v2721_v57, %v2720_v50  ;;  %v3712_v63 = vadd.f32 %v2719_v47, %v3621_v31 }
 0x17e   : > { %v1535_v31 = vadd.f32 %v3573_v49, %v3591_v22  ;;  %v1540_v49 = vadd.f32 %v3576_v56, %v3591_v22 }
 0x17f   : > { %v3714_v38 = vadd.f32 %v2658_v15, %v1527_v11  ;;  %v3717_v20 = vadd.f32 %v2722_v62, %v3623_v34 }
 0x181   : > { %v2659_v3 = vpop.f32.mrb[64].mxu1  ;;  %v2723_v10 = vpop.f32.mrb[64].mxu0 }
 0x182   : > { %v2660_v36 = vpop.f32.mrb[65].mxu1  ;;  %v2724_v24 = vpop.f32.mrb[65].mxu0 }
 0x183   : > { %v2661_v17 = vadd.f32 %v2660_v36, %v2659_v3  ;;  %v2725_v60 = vadd.f32 %v2724_v24, %v2723_v10  ;;  %v2662_v18 = vpop.f32.mrb[66].mxu1  ;;  %v2726_v23 = vpop.f32.mrb[66].mxu0 }
 0x184   : > { %v2663_v2 = vpop.f32.mrb[67].mxu1  ;;  %v2727_v53 = vpop.f32.mrb[67].mxu0 }
 0x185   : > { %v3723_v25 = vadd.f32 %v2661_v17, %v1532_v28  ;;  %v2664_v34 = vadd.f32 %v2663_v2, %v2662_v18  ;;  %v2728_v32 = vadd.f32 %v2727_v53, %v2726_v23  ;;  %v3726_v58 = vadd.f32 %v2725_v60, %v3630_v52 }
 0x186   : > { %v1543_v52 = vadd.f32 %v3578_v61, %v3591_v22  ;;  %v1548_v61 = vadd.f32 %v3580_v4, %v3591_v22 }
 0x187   : > { %v3728_v45 = vadd.f32 %v2664_v34, %v1535_v31  ;;  %v3731_v44 = vadd.f32 %v2728_v32, %v3632_v59 }
 0x189   : > { %v2665_v43 = vpop.f32.mrb[68].mxu1  ;;  %v2729_v41 = vpop.f32.mrb[68].mxu0 }
 0x18a   : > { %v2666_v42 = vpop.f32.mrb[69].mxu1  ;;  %v2730_v46 = vpop.f32.mrb[69].mxu0 }
 0x18b   : > { %v2667_v40 = vadd.f32 %v2666_v42, %v2665_v43  ;;  %v2731_v48 = vadd.f32 %v2730_v46, %v2729_v41  ;;  %v2668_v47 = vpop.f32.mrb[70].mxu1  ;;  %v2732_v1 = vpop.f32.mrb[70].mxu0  ;;  %v1556_v46 = vadd.f32 %v3584_v16, %v3591_v22 }
 0x18c   : > { %v2669_v50 = vpop.f32.mrb[71].mxu1  ;;  %v2733_v11 = vpop.f32.mrb[71].mxu0 }
 0x18d   : > { %v3737_v51 = vadd.f32 %v2667_v40, %v1540_v49  ;;  %v2670_v59 = vadd.f32 %v2669_v50, %v2668_v47  ;;  %v2734_v57 = vadd.f32 %v2733_v11, %v2732_v1  ;;  %v3740_v15 = vadd.f32 %v2731_v48, %v3639_v13 }
 0x18e   : > { %v1551_v13 = vadd.f32 %v3582_v9, %v3591_v22  ;;  %v1559_v47 = vadd.f32 %v3586_v21, %v3591_v22 }
 0x18f   : > { %v3742_v62 = vadd.f32 %v2670_v59, %v1543_v52  ;;  %v3745_v56 = vadd.f32 %v2734_v57, %v3641_v19 }
 0x191   : > { %v2671_v3 = vpop.f32.mrb[72].mxu1  ;;  %v2735_v10 = vpop.f32.mrb[72].mxu0 }
 0x192   : > { %v2672_v36 = vpop.f32.mrb[73].mxu1  ;;  %v2736_v24 = vpop.f32.mrb[73].mxu0 }
 0x193   : > { %v2673_v28 = vadd.f32 %v2672_v36, %v2671_v3  ;;  %v2737_v17 = vadd.f32 %v2736_v24, %v2735_v10  ;;  %v2674_v60 = vpop.f32.mrb[74].mxu1  ;;  %v2738_v18 = vpop.f32.mrb[74].mxu0  ;;  %v2079_v36 = vld [vmem:[%s3780_s13 + $0x10] sm:$0xff] }
 0x194   : > { %v2675_v23 = vpop.f32.mrb[75].mxu1  ;;  %v2739_v31 = vpop.f32.mrb[75].mxu0 }
 0x195   : > { %v3751_v2 = vadd.f32 %v2673_v28, %v1548_v61  ;;  %v2676_v19 = vadd.f32 %v2675_v23, %v2674_v60  ;;  %v2740_v53 = vadd.f32 %v2739_v31, %v2738_v18  ;;  %v3754_v34 = vadd.f32 %v2737_v17, %v3648_v39  ;;  %v2077_v60 = vld [vmem:[%s3780_s13] sm:$0xff] }
 0x197   : > { %v3756_v32 = vadd.f32 %v2676_v19, %v1551_v13  ;;  %v3759_v4 = vadd.f32 %v2740_v53, %v3652_v14  ;;  %v2080_v19 = vld [vmem:[%s3780_s13 + $0x18] sm:$0xff] }
 0x199   : > { %v2677_v43 = vpop.f32.mrb[76].mxu1  ;;  %v2741_v41 = vpop.f32.mrb[76].mxu0 }
 0x19a   : > { %v2678_v42 = vpop.f32.mrb[77].mxu1  ;;  %v2742_v9 = vpop.f32.mrb[77].mxu0 }
 0x19b   : > { %v2679_v49 = vadd.f32 %v2678_v42, %v2677_v43  ;;  %v2743_v40 = vadd.f32 %v2742_v9, %v2741_v41  ;;  %v2680_v48 = vpop.f32.mrb[78].mxu1  ;;  %v2744_v39 = vpop.f32.mrb[78].mxu0  ;;  %v2078_v9 = vld [vmem:[%s3780_s13 + $0x8] sm:$0xff] }
 0x19c   : > { %v2681_v1 = vpop.f32.mrb[79].mxu1  ;;  %v2745_v14 = vpop.f32.mrb[79].mxu0 }
 0x19d   : > { %v3765_v52 = vadd.f32 %v2679_v49, %v1556_v46  ;;  %v2682_v50 = vadd.f32 %v2681_v1, %v2680_v48  ;;  %v2746_v11 = vadd.f32 %v2745_v14, %v2744_v39  ;;  %v3769_v59 = vadd.f32 %v2743_v40, %v3659_v54 }
 0x19f   : > { %v3771_v57 = vadd.f32 %v2682_v50, %v1559_v47  ;;  %v3775_v16 = vadd.f32 %v2746_v11, %v3663_v6  ;;  %v2083_v47 = vld [vmem:[%s3780_s13 + $0x30] sm:$0xff] }
 0x1a1   : > { %v2747_v21 = vpop.f32.mrb[80].mxu0  ;;  %v2831_v22 = vpop.f32.mrb[80].mxu1 }
 0x1a2   : > { %v1927_v54 = vadd.f32 %v2831_v22, %v3684_v0  ;;  %v2748_v3 = vpop.f32.mrb[81].mxu0  ;;  %v1918_v10 = vpop.f32.mrb[81].mxu1  ;;  %v2081_v22 = vld [vmem:[%s3780_s13 + $0x20] sm:$0xff] }
 0x1a3   : > { %v2749_v24 = vadd.f32 %v2748_v3, %v2747_v21  ;;  %v1919_v6 = vadd.f32 %v1918_v10, %v3671_v33  ;;  %v2750_v61 = vpop.f32.mrb[82].mxu0  ;;  %v2832_v28 = vpop.f32.mrb[82].mxu1 }
 0x1a4   : > { %v2047_v17 = vmul.f32 0.2, %v1927_v54  ;;  %v1930_v18 = vadd.f32 %v2832_v28, %v3689_v7  ;;  %v2751_v13 = vpop.f32.mrb[83].mxu0  ;;  %v1921_v23 = vpop.f32.mrb[83].mxu1 }
 0x1a5   : > { %v2045_v31 = vmul.f32 0.2, %v1919_v6  ;;  %v2752_v53 = vadd.f32 %v2751_v13, %v2750_v61  ;;  %v1922_v0 = vadd.f32 %v1921_v23, %v3676_v37  ;;  %v3792_v43 = vadd.f32 %v2749_v24, %v3668_v29 }
 0x1a6   : > { %v2111_v41 = vadd.f32 %v2079_v36, %v2047_v17  ;;  %v2048_v42 = vmul.f32 0.2, %v1930_v18  ;;  %v2082_v17 = vld [vmem:[%s3780_s13 + $0x28] sm:$0xff] }
 0x1a7   : > { %v2109_v33 = vadd.f32 %v2077_v60, %v2045_v31  ;;  %v2046_v46 = vmul.f32 0.2, %v1922_v0  ;;  %v3796_v49 = vadd.f32 %v2752_v53, %v3673_v55  ;;  %v2087_v0 = vld [vmem:[%s3780_s13 + $0x50] sm:$0xff] }
 0x1a8   : > { %2143 = vst [vmem:[%s3798_s14 + $0x10] sm:$0xff] %v2111_v41  ;;  %v2112_v37 = vadd.f32 %v2080_v19, %v2048_v42 }
 0x1a9   : > { %2141 = vst [vmem:[%s3798_s14] sm:$0xff] %v2109_v33  ;;  %v2110_v29 = vadd.f32 %v2078_v9, %v2046_v46  ;;  %v2753_v7 = vpop.f32.mrb[84].mxu0  ;;  %v2835_v40 = vpop.f32.mrb[84].mxu1  ;;  %v2085_v46 = vld [vmem:[%s3780_s13 + $0x40] sm:$0xff] }
 0x1aa   : > { %2144 = vst [vmem:[%s3798_s14 + $0x18] sm:$0xff] %v2112_v37  ;;  %v1943_v48 = vadd.f32 %v2835_v40, %v3712_v63  ;;  %v2754_v39 = vpop.f32.mrb[85].mxu0  ;;  %v1934_v55 = vpop.f32.mrb[85].mxu1  ;;  %v2084_v63 = vld [vmem:[%s3780_s13 + $0x38] sm:$0xff] }
 0x1ab   : > { %2142 = vst [vmem:[%s3798_s14 + $0x8] sm:$0xff] %v2110_v29  ;;  %v2755_v1 = vadd.f32 %v2754_v39, %v2753_v7  ;;  %v1935_v14 = vadd.f32 %v1934_v55, %v3698_v30  ;;  %v2756_v50 = vpop.f32.mrb[86].mxu0  ;;  %v2836_v11 = vpop.f32.mrb[86].mxu1 }
 0x1ac   : > { %v2051_v21 = vmul.f32 0.2, %v1943_v48  ;;  %v1946_v54 = vadd.f32 %v2836_v11, %v3717_v20  ;;  %v2757_v3 = vpop.f32.mrb[87].mxu0  ;;  %v1937_v10 = vpop.f32.mrb[87].mxu1 }
 0x1ad   : > { %v2049_v36 = vmul.f32 0.2, %v1935_v14  ;;  %v2758_v24 = vadd.f32 %v2757_v3, %v2756_v50  ;;  %v1938_v6 = vadd.f32 %v1937_v10, %v3703_v27  ;;  %v3812_v61 = vadd.f32 %v2755_v1, %v3681_v12  ;;  %v2086_v1 = vld [vmem:[%s3780_s13 + $0x48] sm:$0xff]  ;;  %v2091_v10 = vld [vmem:[%s3780_s13 + $0x70] sm:$0xff] }
 0x1ae   : > { %v2115_v30 = vadd.f32 %v2083_v47, %v2051_v21  ;;  %v2052_v28 = vmul.f32 0.2, %v1946_v54 }
 0x1af   : > { %v2113_v60 = vadd.f32 %v2081_v22, %v2049_v36  ;;  %v2050_v18 = vmul.f32 0.2, %v1938_v6  ;;  %v3816_v20 = vadd.f32 %v2758_v24, %v3686_v5 }
 0x1b0   : > { %2147 = vst [vmem:[%s3798_s14 + $0x30] sm:$0xff] %v2115_v30  ;;  %v2116_v13 = vadd.f32 %v2084_v63, %v2052_v28  ;;  %v2089_v30 = vld [vmem:[%s3780_s13 + $0x60] sm:$0xff] }
 0x1b1   : > { %2145 = vst [vmem:[%s3798_s14 + $0x20] sm:$0xff] %v2113_v60  ;;  %v2114_v23 = vadd.f32 %v2082_v17, %v2050_v18  ;;  %v2759_v31 = vpop.f32.mrb[88].mxu0  ;;  %v2839_v27 = vpop.f32.mrb[88].mxu1 }
 0x1b2   : > { %2148 = vst [vmem:[%s3798_s14 + $0x38] sm:$0xff] %v2116_v13  ;;  %v1959_v12 = vadd.f32 %v2839_v27, %v3740_v15  ;;  %v2760_v19 = vpop.f32.mrb[89].mxu0  ;;  %v1950_v53 = vpop.f32.mrb[89].mxu1  ;;  %v2088_v15 = vld [vmem:[%s3780_s13 + $0x58] sm:$0xff] }
 0x1b3   : > { %2146 = vst [vmem:[%s3798_s14 + $0x28] sm:$0xff] %v2114_v23  ;;  %v2761_v41 = vadd.f32 %v2760_v19, %v2759_v31  ;;  %v1951_v5 = vadd.f32 %v1950_v53, %v3726_v58  ;;  %v2762_v42 = vpop.f32.mrb[90].mxu0  ;;  %v2840_v9 = vpop.f32.mrb[90].mxu1 }
 0x1b4   : > { %v2055_v33 = vmul.f32 0.2, %v1959_v12  ;;  %v1962_v37 = vadd.f32 %v2840_v9, %v3745_v56  ;;  %v2763_v29 = vpop.f32.mrb[91].mxu0  ;;  %v1953_v7 = vpop.f32.mrb[91].mxu1  ;;  %v2090_v12 = vld [vmem:[%s3780_s13 + $0x68] sm:$0xff] }
 0x1b5   : > { %v2053_v40 = vmul.f32 0.2, %v1951_v5  ;;  %v2764_v48 = vadd.f32 %v2763_v29, %v2762_v42  ;;  %v1954_v39 = vadd.f32 %v1953_v7, %v3731_v44  ;;  %v3830_v55 = vadd.f32 %v2761_v41, %v3695_v26 }
 0x1b6   : > { %v2119_v58 = vadd.f32 %v2087_v0, %v2055_v33  ;;  %v2056_v47 = vmul.f32 0.2, %v1962_v37  ;;  %v2095_v33 = vld [vmem:[%s3780_s13 + $0x90] sm:$0xff] }
 0x1b7   : > { %v2117_v14 = vadd.f32 %v2085_v46, %v2053_v40  ;;  %v2054_v50 = vmul.f32 0.2, %v1954_v39  ;;  %v3834_v56 = vadd.f32 %v2764_v48, %v3700_v8  ;;  %v2093_v40 = vld [vmem:[%s3780_s13 + $0x80] sm:$0xff] }
 0x1b8   : > { %2151 = vst [vmem:[%s3798_s14 + $0x50] sm:$0xff] %v2119_v58  ;;  %v2120_v11 = vadd.f32 %v2088_v15, %v2056_v47 }
 0x1b9   : > { %2149 = vst [vmem:[%s3798_s14 + $0x40] sm:$0xff] %v2117_v14  ;;  %v2118_v21 = vadd.f32 %v2086_v1, %v2054_v50  ;;  %v2765_v22 = vpop.f32.mrb[92].mxu0  ;;  %v2843_v44 = vpop.f32.mrb[92].mxu1 }
 0x1ba   : > { %2152 = vst [vmem:[%s3798_s14 + $0x58] sm:$0xff] %v2120_v11  ;;  %v1975_v26 = vadd.f32 %v2843_v44, %v3769_v59  ;;  %v2766_v54 = vpop.f32.mrb[93].mxu0  ;;  %v1966_v3 = vpop.f32.mrb[93].mxu1  ;;  %v2092_v59 = vld [vmem:[%s3780_s13 + $0x78] sm:$0xff]  ;;  %v2094_v11 = vld [vmem:[%s3780_s13 + $0x88] sm:$0xff] }
 0x1bb   : > { %2150 = vst [vmem:[%s3798_s14 + $0x48] sm:$0xff] %v2118_v21  ;;  %v2767_v36 = vadd.f32 %v2766_v54, %v2765_v22  ;;  %v1967_v8 = vadd.f32 %v1966_v3, %v3754_v34  ;;  %v2768_v63 = vpop.f32.mrb[94].mxu0  ;;  %v2844_v24 = vpop.f32.mrb[94].mxu1 }
 0x1bc   : > { %v2059_v6 = vmul.f32 0.2, %v1975_v26  ;;  %v1978_v28 = vadd.f32 %v2844_v24, %v3775_v16  ;;  %v2769_v17 = vpop.f32.mrb[95].mxu0  ;;  %v1969_v60 = vpop.f32.mrb[95].mxu1 }
 0x1bd   : > { %v2057_v18 = vmul.f32 0.2, %v1967_v8  ;;  %v2770_v13 = vadd.f32 %v2769_v17, %v2768_v63  ;;  %v1970_v23 = vadd.f32 %v1969_v60, %v3759_v4  ;;  %v1846_v31 = vadd.f32 %v2767_v36, %v3709_v35  ;;  %v2099_v36 = vld [vmem:[%s3780_s13 + $0xb0] sm:$0xff] }
 0x1be   : > { %v2123_v27 = vadd.f32 %v2091_v10, %v2059_v6  ;;  %v2060_v34 = vmul.f32 0.2, %v1978_v28 }
 0x1bf   : > { %v2121_v19 = vadd.f32 %v2089_v30, %v2057_v18  ;;  %v2058_v53 = vmul.f32 0.2, %v1970_v23  ;;  %v1849_v16 = vadd.f32 %v2770_v13, %v3714_v38  ;;  %v2097_v30 = vld [vmem:[%s3780_s13 + $0xa0] sm:$0xff] }
 0x1c0   : > { %2155 = vst [vmem:[%s3798_s14 + $0x70] sm:$0xff] %v2123_v27  ;;  %v2124_v0 = vadd.f32 %v2092_v59, %v2060_v34  ;;  %v2100_v59 = vld [vmem:[%s3780_s13 + $0xb8] sm:$0xff]  ;;  %v2098_v34 = vld [vmem:[%s3780_s13 + $0xa8] sm:$0xff] }
 0x1c1   : > { %2153 = vst [vmem:[%s3798_s14 + $0x60] sm:$0xff] %v2121_v19  ;;  %v2122_v41 = vadd.f32 %v2090_v12, %v2058_v53  ;;  %v2771_v5 = vpop.f32.mrb[96].mxu0  ;;  %v2847_v42 = vpop.f32.mrb[96].mxu1 }
 0x1c2   : > { %2156 = vst [vmem:[%s3798_s14 + $0x78] sm:$0xff] %v2124_v0  ;;  %v1991_v35 = vadd.f32 %v2847_v42, %v3812_v61  ;;  %v2772_v4 = vpop.f32.mrb[97].mxu0  ;;  %v1982_v9 = vpop.f32.mrb[97].mxu1  ;;  %v2096_v61 = vld [vmem:[%s3780_s13 + $0x98] sm:$0xff] }
 0x1c3   : > { %2154 = vst [vmem:[%s3798_s14 + $0x68] sm:$0xff] %v2122_v41  ;;  %v2773_v46 = vadd.f32 %v2772_v4, %v2771_v5  ;;  %v1983_v37 = vadd.f32 %v1982_v9, %v3792_v43  ;;  %v2774_v38 = vpop.f32.mrb[98].mxu0  ;;  %v2848_v29 = vpop.f32.mrb[98].mxu1 }
 0x1c4   : > { %v2063_v7 = vmul.f32 0.2, %v1991_v35  ;;  %v1994_v15 = vadd.f32 %v2848_v29, %v3816_v20  ;;  %v2775_v48 = vpop.f32.mrb[99].mxu0  ;;  %v1985_v39 = vpop.f32.mrb[99].mxu1  ;;  %v2103_v35 = vld [vmem:[%s3780_s13 + $0xd0] sm:$0xff] }
 0x1c5   : > { %v2061_v58 = vmul.f32 0.2, %v1983_v37  ;;  %v2776_v47 = vadd.f32 %v2775_v48, %v2774_v38  ;;  %v1986_v1 = vadd.f32 %v1985_v39, %v3796_v49  ;;  %v1854_v14 = vadd.f32 %v2773_v46, %v3723_v25  ;;  %v2101_v37 = vld [vmem:[%s3780_s13 + $0xc0] sm:$0xff] }
 0x1c6   : > { %v2127_v50 = vadd.f32 %v2095_v33, %v2063_v7  ;;  %v2064_v43 = vmul.f32 0.2, %v1994_v15  ;;  %v2104_v15 = vld [vmem:[%s3780_s13 + $0xd8] sm:$0xff] }
 0x1c7   : > { %v2125_v21 = vadd.f32 %v2093_v40, %v2061_v58  ;;  %v2062_v22 = vmul.f32 0.2, %v1986_v1  ;;  %v1857_v20 = vadd.f32 %v2776_v47, %v3728_v45  ;;  %v2102_v1 = vld [vmem:[%s3780_s13 + $0xc8] sm:$0xff] }
 0x1c8   : > { %2159 = vst [vmem:[%s3798_s14 + $0x90] sm:$0xff] %v2127_v50  ;;  %v2128_v44 = vadd.f32 %v2096_v61, %v2064_v43 }
 0x1c9   : > { %2157 = vst [vmem:[%s3798_s14 + $0x80] sm:$0xff] %v2125_v21  ;;  %v2126_v26 = vadd.f32 %v2094_v11, %v2062_v22  ;;  %v2777_v54 = vpop.f32.mrb[100].mxu0  ;;  %v2851_v3 = vpop.f32.mrb[100].mxu1 }
 0x1ca   : > { %2160 = vst [vmem:[%s3798_s14 + $0x98] sm:$0xff] %v2128_v44  ;;  %v2007_v49 = vadd.f32 %v2851_v3, %v1846_v31  ;;  %v2778_v25 = vpop.f32.mrb[101].mxu0  ;;  %v1998_v10 = vpop.f32.mrb[101].mxu1 }
 0x1cb   : > { %2158 = vst [vmem:[%s3798_s14 + $0x88] sm:$0xff] %v2126_v26  ;;  %v2779_v8 = vadd.f32 %v2778_v25, %v2777_v54  ;;  %v1999_v63 = vadd.f32 %v1998_v10, %v3830_v55  ;;  %v2780_v24 = vpop.f32.mrb[102].mxu0  ;;  %v2852_v45 = vpop.f32.mrb[102].mxu1  ;;  %v2105_v25 = vld [vmem:[%s3780_s13 + $0xe0] sm:$0xff] }
 0x1cc   : > { %v2067_v6 = vmul.f32 0.2, %v2007_v49  ;;  %v2010_v28 = vadd.f32 %v2852_v45, %v1849_v16  ;;  %v2781_v17 = vpop.f32.mrb[103].mxu0  ;;  %v2001_v60 = vpop.f32.mrb[103].mxu1  ;;  %v2106_v45 = vld [vmem:[%s3780_s13 + $0xe8] sm:$0xff] }
 0x1cd   : > { %v2065_v18 = vmul.f32 0.2, %v1999_v63  ;;  %v2782_v13 = vadd.f32 %v2781_v17, %v2780_v24  ;;  %v2002_v23 = vadd.f32 %v2001_v60, %v3834_v56  ;;  %v1862_v31 = vadd.f32 %v2779_v8, %v3737_v51  ;;  %v2107_v60 = vld [vmem:[%s3780_s13 + $0xf0] sm:$0xff] }
 0x1ce   : > { %v2131_v27 = vadd.f32 %v2099_v36, %v2067_v6  ;;  %v2068_v55 = vmul.f32 0.2, %v2010_v28 }
 0x1cf   : > { %v2129_v12 = vadd.f32 %v2097_v30, %v2065_v18  ;;  %v2066_v19 = vmul.f32 0.2, %v2002_v23  ;;  %v1865_v53 = vadd.f32 %v2782_v13, %v3742_v62  ;;  %v2108_v13 = vld [vmem:[%s3780_s13 + $0xf8] sm:$0xff] }
 0x1d0   : > { %2163 = vst [vmem:[%s3798_s14 + $0xb0] sm:$0xff] %v2131_v27  ;;  %v2132_v16 = vadd.f32 %v2100_v59, %v2068_v55 }
 0x1d1   : > { %2161 = vst [vmem:[%s3798_s14 + $0xa0] sm:$0xff] %v2129_v12  ;;  %v2130_v0 = vadd.f32 %v2098_v34, %v2066_v19  ;;  %v2783_v41 = vpop.f32.mrb[104].mxu0  ;;  %v2855_v5 = vpop.f32.mrb[104].mxu1 }
 0x1d2   : > { %2164 = vst [vmem:[%s3798_s14 + $0xb8] sm:$0xff] %v2132_v16  ;;  %v2023_v56 = vadd.f32 %v2855_v5, %v1862_v31  ;;  %v2784_v51 = vpop.f32.mrb[105].mxu0  ;;  %v2014_v42 = vpop.f32.mrb[105].mxu1 }
 0x1d3   : > { %2162 = vst [vmem:[%s3798_s14 + $0xa8] sm:$0xff] %v2130_v0  ;;  %v2785_v4 = vadd.f32 %v2784_v51, %v2783_v41  ;;  %v2015_v9 = vadd.f32 %v2014_v42, %v1854_v14  ;;  %v2786_v33 = vpop.f32.mrb[106].mxu0  ;;  %v2856_v46 = vpop.f32.mrb[106].mxu1 }
 0x1d4   : > { %v2071_v62 = vmul.f32 0.2, %v2023_v56  ;;  %v2026_v38 = vadd.f32 %v2856_v46, %v1865_v53  ;;  %v2787_v29 = vpop.f32.mrb[107].mxu0  ;;  %v2017_v7 = vpop.f32.mrb[107].mxu1 }
 0x1d5   : > { %v2069_v40 = vmul.f32 0.2, %v2015_v9  ;;  %v2788_v48 = vadd.f32 %v2787_v29, %v2786_v33  ;;  %v2018_v39 = vadd.f32 %v2017_v7, %v1857_v20  ;;  %v1870_v58 = vadd.f32 %v2785_v4, %v3751_v2 }
 0x1d6   : > { %v2135_v61 = vadd.f32 %v2103_v35, %v2071_v62  ;;  %v2072_v47 = vmul.f32 0.2, %v2026_v38 }
 0x1d7   : > { %v2133_v14 = vadd.f32 %v2101_v37, %v2069_v40  ;;  %v2070_v50 = vmul.f32 0.2, %v2018_v39  ;;  %v1873_v43 = vadd.f32 %v2788_v48, %v3756_v32 }
 0x1d8   : > { %2167 = vst [vmem:[%s3798_s14 + $0xd0] sm:$0xff] %v2135_v61  ;;  %v2136_v11 = vadd.f32 %v2104_v15, %v2072_v47 }
 0x1d9   : > { %2165 = vst [vmem:[%s3798_s14 + $0xc0] sm:$0xff] %v2133_v14  ;;  %v2134_v21 = vadd.f32 %v2102_v1, %v2070_v50  ;;  %v2789_v22 = vpop.f32.mrb[108].mxu0  ;;  %v2859_v44 = vpop.f32.mrb[108].mxu1 }
 0x1da   : > { %2168 = vst [vmem:[%s3798_s14 + $0xd8] sm:$0xff] %v2136_v11  ;;  %v2790_v20 = vpop.f32.mrb[109].mxu0  ;;  %v2030_v26 = vpop.f32.mrb[109].mxu1 }
 0x1db   : > { %2166 = vst [vmem:[%s3798_s14 + $0xc8] sm:$0xff] %v2134_v21  ;;  %v2791_v2 = vadd.f32 %v2790_v20, %v2789_v22  ;;  %v2031_v54 = vadd.f32 %v2030_v26, %v1870_v58  ;;  %v2792_v3 = vpop.f32.mrb[110].mxu0  ;;  %v2860_v49 = vpop.f32.mrb[110].mxu1 }
 0x1dc   : > { %v2793_v10 = vpop.f32.mrb[111].mxu0  ;;  %v2033_v32 = vpop.f32.mrb[111].mxu1 }
 0x1dd   : > { %v1878_v36 = vadd.f32 %v2791_v2, %v3765_v52  ;;  %v2073_v8 = vmul.f32 0.2, %v2031_v54  ;;  %v2794_v63 = vadd.f32 %v2793_v10, %v2792_v3  ;;  %v2034_v24 = vadd.f32 %v2033_v32, %v1873_v43 }
 0x1df   : > { %v2039_v6 = vadd.f32 %v2859_v44, %v1878_v36  ;;  %v2137_v30 = vadd.f32 %v2105_v25, %v2073_v8  ;;  %v1881_v28 = vadd.f32 %v2794_v63, %v3771_v57  ;;  %v2074_v17 = vmul.f32 0.2, %v2034_v24 }
 0x1e1   : > { %v2075_v18 = vmul.f32 0.2, %v2039_v6  ;;  %2169 = vst [vmem:[%s3798_s14 + $0xe0] sm:$0xff] %v2137_v30  ;;  %v2042_v59 = vadd.f32 %v2860_v49, %v1881_v28  ;;  %v2138_v52 = vadd.f32 %v2106_v45, %v2074_v17 }
 0x1e3   : > { %v2139_v23 = vadd.f32 %v2107_v60, %v2075_v18  ;;  %v2076_v31 = vmul.f32 0.2, %v2042_v59  ;;  %2170 = vst [vmem:[%s3798_s14 + $0xe8] sm:$0xff] %v2138_v52 }
 0x1e5   : > { %2171 = vst [vmem:[%s3798_s14 + $0xf0] sm:$0xff] %v2139_v23  ;;  %v2140_v57 = vadd.f32 %v2108_v13, %v2076_v31 }
 0x1e7   : > { %2172 = vst [vmem:[%s3798_s14 + $0xf8] sm:$0xff] %v2140_v57 }
 0x1e8   : > { %3146 = shalt.err (!%p3143_p3)
}
 0x1e9   : > { %s3147_s8 = scalar_lea.hbm %s3903_s28, 4096  ;;  %s3151_s11 = scalar_lea.hbm %s3956_s4, 8192 }
 0x1ea   : > { %p3148_p4 = scmp.ne.s32.totalorder %s3903_s28, %s3147_s8  ;;  %p3152_p9 = scmp.lt.u32.totalorder %s3903_s28, %s3956_s4 }
 0x1eb   : > { %p3153_p10 = scmp.lt.u32.totalorder %s3151_s11, %s3147_s8  ;;  %p3155_p12 = scmp.lt.u32.totalorder %s3147_s8, %s3903_s28 }
 0x1ec   : > { %p3149_p7 = pnand %p3148_p4, %p3263_p5 }
 0x1ed   : > { %p3154_p11 = por %p3153_p10, %p3152_p9 }
 0x1ee   : > { %p3150_p8 = pneg %p3149_p7 }
 0x1ef   : > { %p3156_p13 = por %p3155_p12, %p3154_p11 }
 0x1f1   : > { %p3157_p0 = pnand %p3156_p13, %p3150_p8 }
 0x1f3   : > { %3160 = shalt.err (!%p3157_p0)
}
 0x1f4   : > { %s3198_s29 = smov 128   ;;  %s3199_s14 = smov 8  }
 0x1f5   : > { %2878 = dma.vmem_to_hbm [thread:$0]  (%p3263_p5), %s3905_s22, 4096, %s3903_s28, %s3911_s19, %s3198_s29, %s3198_s29, %s3199_s14  }
 0x1f6 PF: > { %p2884_p1 = scmp.ge.s32.totalorder %s3195_s18, 2  ;;  %s2202_s20 = sand.u32 1, %s3183_s15  }
 0x1f7   : > { %s2203_s23 = scalar_lea.sflag [#allocation3], %s2202_s20 }
 0x1f8   : > { %p2881_p2 = pnand %p2884_p1, %p3267_p6 }
 0x1fa   : > { %3178 = dma.done.wait (!%p2881_p2), %s2203_s23, 4096  }
 0x1fb   : > { %3180 = vsyncadd (!%p2881_p2), %s2203_s23, 4294963200  ;;  %p14_p3 = scmp.ge.s32.totalorder %s3250_s21, 4   ;;  %s3959_s15 = smov %s3187_s16 }
 0x1fc   : > { %s3960_s16 = smov %s3191_s17  ;;  %s3961_s17 = smov %s3261_s24 }
 0x1fd   : > { %s3962_s18 = smov %s3250_s21  ;;  %16 = sbr.rel (!%p14_p3) target bundleno = 3 (0x3), region = 74 }
 0x204   :  { %2208 = vsyncpa [#allocation3], 1 }
 0x205   :  { %2210 = vsyncpa [#allocation3 + $0x1], 1 }

</bundles_post_ra>
